<compile_context>
chip_gen: v5e
topology: v5e:2x2
jax: 0.10.0
libtpu: 0.0.40
codegen_flags: <defaults>
</compile_context>

<pallas_src>
import jax
import jax.numpy as jnp
import numpy as np
from jax.experimental import pallas as pl
from jax.experimental.pallas import tpu as pltpu

# ---- hyperparameters (small demo sizes, consistent with the module) ---------
EMBED_DIM    = 32            # embedding_dim (reduced from 300 for the demo)
FILTER_SIZES = (3, 4, 5)
NUM_FILTERS  = 128
NUM_CLASSES  = 2
HIDDEN       = 128
BATCH        = 2
SEQ_LEN      = 16

FS_MAX  = max(FILTER_SIZES)
T_MAX   = SEQ_LEN - min(FILTER_SIZES) + 1                 # 14 valid positions (fs=3)
T_PAD   = ((T_MAX + 7) // 8) * 8                          # 16: sublane-aligned positions
L_PAD   = max(SEQ_LEN, T_PAD + FS_MAX - 1)                # 20: every window in-bounds
E_PAD   = 128                                             # lane-aligned embedding dim
B_PAD   = 8                                               # sublane-aligned batch per tower
F_TOTAL = NUM_FILTERS * len(FILTER_SIZES)                 # 384
OUT_PAD = 128                                             # lane-dense padded logit width


# ---------------- the single fused Pallas kernel -----------------------------
def siamese_fused_kernel(x_ref, wc_ref, mask_ref, bc_ref,
                         w1a_ref, w1b_ref, b1_ref, w2_ref, b2_ref, o_ref):
    """Whole SiameseCNN forward in one kernel.

    x_ref  : (2*B_PAD, L_PAD, E_PAD)  bf16  both towers stacked, zero-padded
    wc_ref : (FS_MAX, E_PAD, 3F)      bf16  per-window-offset conv weight slabs
    mask_ref:(1, T_PAD, 3F)           f32   additive 0/-inf position-validity mask
    bc_ref : (1, 3F)                  f32   conv biases stacked
    w1a_ref: (3F, HIDDEN)             bf16  fc[0] rows for tower-1 features
    w1b_ref: (3F, HIDDEN)             bf16  fc[0] rows for tower-2 features
    b1_ref : (1, HIDDEN)              f32
    w2_ref : (HIDDEN, OUT_PAD)        bf16  fc[2], zero-padded to 128 output lanes
    b2_ref : (1, OUT_PAD)             f32
    o_ref  : (B_PAD, OUT_PAD)         f32
    """
    x = x_ref[...]                                              # (2B_PAD, L_PAD, E_PAD)

    # ---- conv as FS_MAX accumulating matmuls over the window offset ----------
    # Every slice keeps the 128-lane minor dim; the reshape merges sublane-tile
    # aligned leading dims only (T_PAD=16), so no relayout copies are generated.
    acc = jnp.zeros((2 * B_PAD * T_PAD, F_TOTAL), jnp.float32)
    for j in range(FS_MAX):
        xj = x[:, j:j + T_PAD, :].reshape(2 * B_PAD * T_PAD, E_PAD)
        acc = acc + jnp.dot(xj, wc_ref[j],
                            preferred_element_type=jnp.float32)

    # ---- mask invalid positions, max-pool, then bias + ReLU (exact reorder) --
    s = acc.reshape(2 * B_PAD, T_PAD, F_TOTAL) + mask_ref[...]  # broadcast add
    pooled = jnp.max(s, axis=1)                                 # (2B_PAD, 3F)
    feat = jnp.maximum(pooled + bc_ref[...], 0.0)               # f32 epilogue

    # ---- siamese fc head: split-w1 dots instead of a 768-lane concat ----------
    f1 = feat[:B_PAD].astype(jnp.bfloat16)                      # tower-1 features
    f2 = feat[B_PAD:].astype(jnp.bfloat16)                      # tower-2 features
    h = (jnp.dot(f1, w1a_ref[...], preferred_element_type=jnp.float32)
         + jnp.dot(f2, w1b_ref[...], preferred_element_type=jnp.float32)
         + b1_ref[...])
    h = jnp.maximum(h, 0.0).astype(jnp.bfloat16)
    o_ref[...] = (jnp.dot(h, w2_ref[...], preferred_element_type=jnp.float32)
                  + b2_ref[...])


# ---------------- wrapper -----------------------------------------------------
def _vmem():
    return pl.BlockSpec(memory_space=pltpu.MemorySpace.VMEM)


def pack_params(params):
    """Repack PyTorch-layout params into the fused-kernel layout (done once)."""
    conv_ws, conv_bs, w1, b1, w2, b2 = params

    # Per-offset conv weight slabs, zero-padded on E and on filters with fs <= j.
    wc = np.zeros((FS_MAX, E_PAD, F_TOTAL), np.float32)
    for k, (fs, w) in enumerate(zip(FILTER_SIZES, conv_ws)):
        w3 = np.asarray(w).reshape(fs, EMBED_DIM, NUM_FILTERS)
        for j in range(fs):
            wc[j, :EMBED_DIM, k * NUM_FILTERS:(k + 1) * NUM_FILTERS] = w3[j]

    bc = jnp.concatenate(conv_bs, axis=1).astype(jnp.float32)   # (1, 3F)

    # Additive 0/-inf mask for padded / invalid positions (hoisted out of kernel).
    mask = np.zeros((1, T_PAD, F_TOTAL), np.float32)
    for k, fs in enumerate(FILTER_SIZES):
        mask[0, SEQ_LEN - fs + 1:, k * NUM_FILTERS:(k + 1) * NUM_FILTERS] = -np.inf

    w1a = w1[:F_TOTAL]                                          # rows for tower-1 feat
    w1b = w1[F_TOTAL:]                                          # rows for tower-2 feat
    w2p = jnp.zeros((HIDDEN, OUT_PAD), jnp.float32).at[:, :NUM_CLASSES].set(w2)
    b2p = jnp.zeros((1, OUT_PAD), jnp.float32).at[:, :NUM_CLASSES].set(b2)

    return (jnp.asarray(wc, jnp.bfloat16),
            jnp.asarray(mask, jnp.float32),
            bc,
            w1a.astype(jnp.bfloat16), w1b.astype(jnp.bfloat16),
            b1.astype(jnp.float32),
            w2p.astype(jnp.bfloat16), b2p.astype(jnp.float32))


def siamese_forward(x1, x2, packed):
    wc, mask, bc, w1a, w1b, b1, w2p, b2p = packed
    assert x1.shape == (BATCH, SEQ_LEN, EMBED_DIM)
    assert SEQ_LEN >= FS_MAX, "sequence shorter than largest filter size"

    def pad_tower(x):                                           # (B,L,E) -> (B_PAD,L_PAD,E_PAD)
        return jnp.pad(x, ((0, B_PAD - BATCH),
                           (0, L_PAD - SEQ_LEN),
                           (0, E_PAD - EMBED_DIM)))

    x = jnp.concatenate([pad_tower(x1), pad_tower(x2)],
                        axis=0).astype(jnp.bfloat16)            # (2*B_PAD, L_PAD, E_PAD)

    flops = (2 * (2 * B_PAD * T_PAD) * E_PAD * F_TOTAL * FS_MAX   # per-offset conv dots
             + 2 * (2 * B_PAD) * F_TOTAL * HIDDEN                 # fc1 (two half dots)
             + 2 * B_PAD * HIDDEN * OUT_PAD)                      # fc2
    bytes_accessed = (2 * (x.size + wc.size + w1a.size + w1b.size + w2p.size)
                      + 4 * (mask.size + bc.size + b1.size + b2p.size
                             + B_PAD * OUT_PAD))

    out = pl.pallas_call(
        siamese_fused_kernel,
        out_shape=jax.ShapeDtypeStruct((B_PAD, OUT_PAD), jnp.float32),
        in_specs=[_vmem()] * 9,
        out_specs=_vmem(),
        cost_estimate=pl.CostEstimate(flops=flops, transcendentals=0,
                                      bytes_accessed=bytes_accessed),
        # Fits easily here; re-budget per generation (64 MiB physical on v7x)
        # when the batch/sequence grid is added at production sizes.
        compiler_params=pltpu.CompilerParams(vmem_limit_bytes=32 * 1024 * 1024),
    )(x, wc, mask, bc, w1a, w1b, b1, w2p, b2p)
    return out[:BATCH, :NUM_CLASSES]                            # drop padded rows/lanes


# ---------------- deterministic parameter init (PyTorch-style uniform) --------
def init_params(key):
    keys = jax.random.split(key, 2 * len(FILTER_SIZES) + 4)
    conv_ws, conv_bs = [], []
    i = 0
    for fs in FILTER_SIZES:
        fan_in = fs * EMBED_DIM
        bound = 1.0 / np.sqrt(fan_in)
        conv_ws.append(jax.random.uniform(keys[i], (fan_in, NUM_FILTERS),
                                          jnp.float32, -bound, bound)); i += 1
        conv_bs.append(jax.random.uniform(keys[i], (1, NUM_FILTERS),
                                          jnp.float32, -bound, bound)); i += 1
    fc_in = NUM_FILTERS * len(FILTER_SIZES) * 2
    bnd1 = 1.0 / np.sqrt(fc_in)
    w1  = jax.random.uniform(keys[i], (fc_in, HIDDEN), jnp.float32, -bnd1, bnd1); i += 1
    bb1 = jax.random.uniform(keys[i], (1, HIDDEN),     jnp.float32, -bnd1, bnd1); i += 1
    bnd2 = 1.0 / np.sqrt(HIDDEN)
    w2  = jax.random.uniform(keys[i], (HIDDEN, NUM_CLASSES), jnp.float32, -bnd2, bnd2); i += 1
    bb2 = jax.random.uniform(keys[i], (1, NUM_CLASSES),      jnp.float32, -bnd2, bnd2)
    return conv_ws, conv_bs, w1, bb1, w2, bb2


# ---------------- pure-JAX reference (matches the PyTorch forward) ------------
def unfold(x, fs):
    """(B, L, E) -> (B, L-fs+1, fs*E), matching Conv2d's (fs, E) window flatten."""
    B, L, E = x.shape
    T = L - fs + 1
    return jnp.stack([x[:, t:t + fs, :].reshape(B, fs * E) for t in range(T)],
                     axis=1)


def reference(x1, x2, params):
    conv_ws, conv_bs, w1, b1, w2, b2 = params

    def once(x):
        outs = []
        for fs, w, b in zip(FILTER_SIZES, conv_ws, conv_bs):
            xu = unfold(x, fs)
            s = jnp.maximum(jnp.einsum('btk,kf->btf', xu, w) + b[None], 0.0)
            outs.append(jnp.max(s, axis=1))
        return jnp.concatenate(outs, axis=1)

    feat = jnp.concatenate([once(x1), once(x2)], axis=1)
    h = jnp.maximum(feat @ w1 + b1, 0.0)
    return h @ w2 + b2


if __name__ == "__main__":
    key = jax.random.PRNGKey(0)
    k_p, k_x1, k_x2 = jax.random.split(key, 3)
    params = init_params(k_p)
    packed = pack_params(params)

    x1 = jax.random.normal(k_x1, (BATCH, SEQ_LEN, EMBED_DIM), jnp.float32)
    x2 = jax.random.normal(k_x2, (BATCH, SEQ_LEN, EMBED_DIM), jnp.float32)

    out = jax.block_until_ready(jax.jit(siamese_forward)(x1, x2, packed))

    # Kernel feeds the MXU bf16 operands -> compare against a reference run on
    # bf16-round-tripped inputs/params (f32 math) with a bf16-appropriate tolerance.
    def bf16_round(t):
        return t.astype(jnp.bfloat16).astype(jnp.float32)

    params_r = jax.tree_util.tree_map(bf16_round, params)
    ref = jax.block_until_ready(reference(bf16_round(x1), bf16_round(x2), params_r))

    np.testing.assert_allclose(np.asarray(out), np.asarray(ref),
                               rtol=2e-2, atol=2e-2)
    assert out.shape == (BATCH, NUM_CLASSES)
    print("KERNEL_OK")
</pallas_src>

<mosaic_0001>
module attributes {stable_mosaic.version = 11 : i64} {
  func.func @siamese_fused_kernel(%arg0: memref<16x20x128xbf16, #tpu.memory_space<vmem>>, %arg1: memref<5x128x384xbf16, #tpu.memory_space<vmem>>, %arg2: memref<1x16x384xf32, #tpu.memory_space<vmem>>, %arg3: memref<1x384xf32, #tpu.memory_space<vmem>>, %arg4: memref<384x128xbf16, #tpu.memory_space<vmem>>, %arg5: memref<384x128xbf16, #tpu.memory_space<vmem>>, %arg6: memref<1x128xf32, #tpu.memory_space<vmem>>, %arg7: memref<128x128xbf16, #tpu.memory_space<vmem>>, %arg8: memref<1x128xf32, #tpu.memory_space<vmem>>, %arg9: memref<8x128xf32, #tpu.memory_space<vmem>>) attributes {dimension_semantics = [], scalar_prefetch = 0 : i64, scratch_operands = 0 : i64, tpu.core_type = #tpu.core_type<tc>} {
    %c0 = arith.constant 0 : index
    %c0_0 = arith.constant 0 : index
    %c0_1 = arith.constant 0 : index
    %0 = vector.load %arg0[%c0, %c0_0, %c0_1] : memref<16x20x128xbf16, #tpu.memory_space<vmem>>, vector<16x20x128xbf16>
    %cst = arith.constant 0.000000e+00 : f32
    %1 = vector.broadcast %cst : f32 to vector<256x384xf32>
    %2 = vector.extract_strided_slice %0 {offsets = [0, 0, 0], sizes = [16, 16, 128], strides = [1, 1, 1]} : vector<16x20x128xbf16> to vector<16x16x128xbf16>
    %3 = vector.shape_cast %2 : vector<16x16x128xbf16> to vector<256x128xbf16>
    %c0_2 = arith.constant 0 : index
    %c0_3 = arith.constant 0 : index
    %c0_4 = arith.constant 0 : index
    %4 = vector.load %arg1[%c0_2, %c0_3, %c0_4] : memref<5x128x384xbf16, #tpu.memory_space<vmem>>, vector<1x128x384xbf16>
    %5 = vector.shape_cast %4 : vector<1x128x384xbf16> to vector<128x384xbf16>
    %cst_5 = arith.constant dense<0.000000e+00> : vector<256x384xf32>
    %6 = tpu.matmul %3, %5, %cst_5 {dimension_numbers = #tpu.dot_dimension_numbers<[1], [0], [0], [1], [0, 0, 1, 1], [], []>} : vector<256x128xbf16>, vector<128x384xbf16>, vector<256x384xf32> -> vector<256x384xf32>
    %7 = arith.addf %1, %6 : vector<256x384xf32>
    %8 = vector.extract_strided_slice %0 {offsets = [0, 1, 0], sizes = [16, 16, 128], strides = [1, 1, 1]} : vector<16x20x128xbf16> to vector<16x16x128xbf16>
    %9 = vector.shape_cast %8 : vector<16x16x128xbf16> to vector<256x128xbf16>
    %c1 = arith.constant 1 : index
    %c0_6 = arith.constant 0 : index
    %c0_7 = arith.constant 0 : index
    %10 = vector.load %arg1[%c1, %c0_6, %c0_7] : memref<5x128x384xbf16, #tpu.memory_space<vmem>>, vector<1x128x384xbf16>
    %11 = vector.shape_cast %10 : vector<1x128x384xbf16> to vector<128x384xbf16>
    %cst_8 = arith.constant dense<0.000000e+00> : vector<256x384xf32>
    %12 = tpu.matmul %9, %11, %cst_8 {dimension_numbers = #tpu.dot_dimension_numbers<[1], [0], [0], [1], [0, 0, 1, 1], [], []>} : vector<256x128xbf16>, vector<128x384xbf16>, vector<256x384xf32> -> vector<256x384xf32>
    %13 = arith.addf %7, %12 : vector<256x384xf32>
    %14 = vector.extract_strided_slice %0 {offsets = [0, 2, 0], sizes = [16, 16, 128], strides = [1, 1, 1]} : vector<16x20x128xbf16> to vector<16x16x128xbf16>
    %15 = vector.shape_cast %14 : vector<16x16x128xbf16> to vector<256x128xbf16>
    %c2 = arith.constant 2 : index
    %c0_9 = arith.constant 0 : index
    %c0_10 = arith.constant 0 : index
    %16 = vector.load %arg1[%c2, %c0_9, %c0_10] : memref<5x128x384xbf16, #tpu.memory_space<vmem>>, vector<1x128x384xbf16>
    %17 = vector.shape_cast %16 : vector<1x128x384xbf16> to vector<128x384xbf16>
    %cst_11 = arith.constant dense<0.000000e+00> : vector<256x384xf32>
    %18 = tpu.matmul %15, %17, %cst_11 {dimension_numbers = #tpu.dot_dimension_numbers<[1], [0], [0], [1], [0, 0, 1, 1], [], []>} : vector<256x128xbf16>, vector<128x384xbf16>, vector<256x384xf32> -> vector<256x384xf32>
    %19 = arith.addf %13, %18 : vector<256x384xf32>
    %20 = vector.extract_strided_slice %0 {offsets = [0, 3, 0], sizes = [16, 16, 128], strides = [1, 1, 1]} : vector<16x20x128xbf16> to vector<16x16x128xbf16>
    %21 = vector.shape_cast %20 : vector<16x16x128xbf16> to vector<256x128xbf16>
    %c3 = arith.constant 3 : index
    %c0_12 = arith.constant 0 : index
    %c0_13 = arith.constant 0 : index
    %22 = vector.load %arg1[%c3, %c0_12, %c0_13] : memref<5x128x384xbf16, #tpu.memory_space<vmem>>, vector<1x128x384xbf16>
    %23 = vector.shape_cast %22 : vector<1x128x384xbf16> to vector<128x384xbf16>
    %cst_14 = arith.constant dense<0.000000e+00> : vector<256x384xf32>
    %24 = tpu.matmul %21, %23, %cst_14 {dimension_numbers = #tpu.dot_dimension_numbers<[1], [0], [0], [1], [0, 0, 1, 1], [], []>} : vector<256x128xbf16>, vector<128x384xbf16>, vector<256x384xf32> -> vector<256x384xf32>
    %25 = arith.addf %19, %24 : vector<256x384xf32>
    %26 = vector.extract_strided_slice %0 {offsets = [0, 4, 0], sizes = [16, 16, 128], strides = [1, 1, 1]} : vector<16x20x128xbf16> to vector<16x16x128xbf16>
    %27 = vector.shape_cast %26 : vector<16x16x128xbf16> to vector<256x128xbf16>
    %c4 = arith.constant 4 : index
    %c0_15 = arith.constant 0 : index
    %c0_16 = arith.constant 0 : index
    %28 = vector.load %arg1[%c4, %c0_15, %c0_16] : memref<5x128x384xbf16, #tpu.memory_space<vmem>>, vector<1x128x384xbf16>
    %29 = vector.shape_cast %28 : vector<1x128x384xbf16> to vector<128x384xbf16>
    %cst_17 = arith.constant dense<0.000000e+00> : vector<256x384xf32>
    %30 = tpu.matmul %27, %29, %cst_17 {dimension_numbers = #tpu.dot_dimension_numbers<[1], [0], [0], [1], [0, 0, 1, 1], [], []>} : vector<256x128xbf16>, vector<128x384xbf16>, vector<256x384xf32> -> vector<256x384xf32>
    %31 = arith.addf %25, %30 : vector<256x384xf32>
    %32 = vector.shape_cast %31 : vector<256x384xf32> to vector<16x16x384xf32>
    %c0_18 = arith.constant 0 : index
    %c0_19 = arith.constant 0 : index
    %c0_20 = arith.constant 0 : index
    %33 = vector.load %arg2[%c0_18, %c0_19, %c0_20] : memref<1x16x384xf32, #tpu.memory_space<vmem>>, vector<1x16x384xf32>
    %34 = vector.broadcast %33 : vector<1x16x384xf32> to vector<16x16x384xf32>
    %35 = arith.addf %32, %34 : vector<16x16x384xf32>
    %cst_21 = arith.constant dense<0xFF800000> : vector<16x384xf32>
    %36 = vector.multi_reduction <maximumf>, %35, %cst_21 [1] : vector<16x16x384xf32> to vector<16x384xf32>
    %c0_22 = arith.constant 0 : index
    %c0_23 = arith.constant 0 : index
    %37 = vector.load %arg3[%c0_22, %c0_23] : memref<1x384xf32, #tpu.memory_space<vmem>>, vector<1x384xf32>
    %38 = vector.broadcast %37 : vector<1x384xf32> to vector<16x384xf32>
    %39 = arith.addf %36, %38 : vector<16x384xf32>
    %cst_24 = arith.constant 0.000000e+00 : f32
    %40 = vector.broadcast %cst_24 : f32 to vector<16x384xf32>
    %41 = arith.maximumf %39, %40 : vector<16x384xf32>
    %42 = vector.extract_strided_slice %41 {offsets = [0, 0], sizes = [8, 384], strides = [1, 1]} : vector<16x384xf32> to vector<8x384xf32>
    %43 = arith.truncf %42 : vector<8x384xf32> to vector<8x384xbf16>
    %44 = vector.extract_strided_slice %41 {offsets = [8, 0], sizes = [8, 384], strides = [1, 1]} : vector<16x384xf32> to vector<8x384xf32>
    %45 = arith.truncf %44 : vector<8x384xf32> to vector<8x384xbf16>
    %c0_25 = arith.constant 0 : index
    %c0_26 = arith.constant 0 : index
    %46 = vector.load %arg4[%c0_25, %c0_26] : memref<384x128xbf16, #tpu.memory_space<vmem>>, vector<384x128xbf16>
    %cst_27 = arith.constant dense<0.000000e+00> : vector<8x128xf32>
    %47 = tpu.matmul %43, %46, %cst_27 {dimension_numbers = #tpu.dot_dimension_numbers<[1], [0], [0], [1], [0, 0, 1, 1], [], []>} : vector<8x384xbf16>, vector<384x128xbf16>, vector<8x128xf32> -> vector<8x128xf32>
    %c0_28 = arith.constant 0 : index
    %c0_29 = arith.constant 0 : index
    %48 = vector.load %arg5[%c0_28, %c0_29] : memref<384x128xbf16, #tpu.memory_space<vmem>>, vector<384x128xbf16>
    %cst_30 = arith.constant dense<0.000000e+00> : vector<8x128xf32>
    %49 = tpu.matmul %45, %48, %cst_30 {dimension_numbers = #tpu.dot_dimension_numbers<[1], [0], [0], [1], [0, 0, 1, 1], [], []>} : vector<8x384xbf16>, vector<384x128xbf16>, vector<8x128xf32> -> vector<8x128xf32>
    %50 = arith.addf %47, %49 : vector<8x128xf32>
    %c0_31 = arith.constant 0 : index
    %c0_32 = arith.constant 0 : index
    %51 = vector.load %arg6[%c0_31, %c0_32] : memref<1x128xf32, #tpu.memory_space<vmem>>, vector<1x128xf32>
    %52 = vector.broadcast %51 : vector<1x128xf32> to vector<8x128xf32>
    %53 = arith.addf %50, %52 : vector<8x128xf32>
    %cst_33 = arith.constant 0.000000e+00 : f32
    %54 = vector.broadcast %cst_33 : f32 to vector<8x128xf32>
    %55 = arith.maximumf %53, %54 : vector<8x128xf32>
    %56 = arith.truncf %55 : vector<8x128xf32> to vector<8x128xbf16>
    %c0_34 = arith.constant 0 : index
    %c0_35 = arith.constant 0 : index
    %57 = vector.load %arg7[%c0_34, %c0_35] : memref<128x128xbf16, #tpu.memory_space<vmem>>, vector<128x128xbf16>
    %cst_36 = arith.constant dense<0.000000e+00> : vector<8x128xf32>
    %58 = tpu.matmul %56, %57, %cst_36 {dimension_numbers = #tpu.dot_dimension_numbers<[1], [0], [0], [1], [0, 0, 1, 1], [], []>} : vector<8x128xbf16>, vector<128x128xbf16>, vector<8x128xf32> -> vector<8x128xf32>
    %c0_37 = arith.constant 0 : index
    %c0_38 = arith.constant 0 : index
    %59 = vector.load %arg8[%c0_37, %c0_38] : memref<1x128xf32, #tpu.memory_space<vmem>>, vector<1x128xf32>
    %60 = vector.broadcast %59 : vector<1x128xf32> to vector<8x128xf32>
    %61 = arith.addf %58, %60 : vector<8x128xf32>
    %c0_39 = arith.constant 0 : index
    %c0_40 = arith.constant 0 : index
    %62 = vector.load %arg9[%c0_39, %c0_40] : memref<8x128xf32, #tpu.memory_space<vmem>>, vector<8x128xf32>
    tpu.vector_store %arg9[%c0_39, %c0_40], %61 {strides = array<i32>} : memref<8x128xf32, #tpu.memory_space<vmem>>, vector<8x128xf32>,
    return
  }
}

</mosaic_0001>

<bundles_post_ra>
// kernel: siamese_forward.1
= control target key start
LH: loop header
LB: loop body
LE: loop exit
PB: predicated region body
PF: predicated region fallthrough
CT: control target
= control target key end

     0   :  { %14 = vsyncpa [#allocation3], 0  ;;  %s9136_s0 = inlined_call_operand.vmem [shape: bf16[16,20,128], index: 0, kind: input, shape index: {}]   ;;  %s9137_s1 = inlined_call_operand.hbm [shape: bf16[5,128,384], index: 1, kind: input, shape index: {}]   ;;  %s9138_s2 = inlined_call_operand.vmem [shape: f32[1,16,384], index: 2, kind: input, shape index: {}]   ;;  %s9139_s3 = inlined_call_operand.vmem [shape: f32[1,384], index: 3, kind: input, shape index: {}]   ;;  %s9140_s4 = inlined_call_operand.vmem [shape: bf16[384,128], index: 4, kind: input, shape index: {}]   ;;  %s9141_s5 = inlined_call_operand.hbm [shape: bf16[384,128], index: 5, kind: input, shape index: {}]   ;;  %s9142_s6 = inlined_call_operand.vmem [shape: f32[1,128], index: 6, kind: input, shape index: {}]   ;;  %s9143_s7 = inlined_call_operand.vmem [shape: bf16[128,128], index: 7, kind: input, shape index: {}]   ;;  %s9144_s8 = inlined_call_operand.vmem [shape: f32[1,128], index: 8, kind: input, shape index: {}]   ;;  %s9145_s9 = inlined_call_operand.vmem [shape: f32[8,128], index: 9, kind: output, shape index: {}]  }
   0x1   :  { %s22_s11 = sshll.u32 %s9137_s1, 4  ;;  %s23_s11 = int_to_ptr.hbm [resolvable:$true] %s22_s11 }
   0x2   :  { %15 = vsyncpa [#allocation5], 0  ;;  %s6298_s12 = smov [#allocation2]   ;;  %s41_s16 = sshll.u32 %s9141_s5, 4  ;;  %s42_s16 = int_to_ptr.hbm [resolvable:$true] %s41_s16 }
   0x3   :  { %s24_s13 = sshll.u32 %s6298_s12, 4  ;;  %s6299_s17 = smov 192   ;;  %s25_s13 = int_to_ptr.vmem [resolvable:$true] %s24_s13 }
   0x4   :  { %s6300_s18 = smov 12   ;;  %s6301_s19 = smov [#allocation4]  }
   0x5   :  { %30 = dma.hbm_to_vmem [thread:$0]  %s23_s11, 15360, %s25_s13, [#allocation3], %s6299_s17, %s6299_s17, %s6300_s18  }
   0x6   :  { %s43_s20 = sshll.u32 %s6301_s19, 4  ;;  %s6302_s21 = smov 64   ;;  %s44_s20 = int_to_ptr.vmem [resolvable:$true] %s43_s20 }
   0x7   :  { %s6303_s22 = smov 4  }
   0x8   :  { %49 = dma.hbm_to_vmem [thread:$0]  %s42_s16, 3072, %s44_s20, [#allocation5], %s6302_s21, %s6302_s21, %s6303_s22  }
   0x9   :  { %6294 = dma.done.wait [#allocation3], 15360  }
   0xa   :  { %6295 = vsyncadd [#allocation3], 4294951936 }
   0xb   :  { %6296 = dma.done.wait [#allocation5], 3072  }
   0xc   :  { %6297 = vsyncadd [#allocation5], 4294964224  ;;  %v5199_v0 = vld [vmem:[#allocation2 + $0x168] sm:$0xf]  ;;  %v5975_v1 = vld [vmem:[#allocation2 + $0x170] sm:$0xf0] }
   0xd   :  { %v5974_v2 = vld [vmem:[#allocation2 + $0x16c] sm:$0xf]  ;;  %v5200_v3 = vor.u32 %v5975_v1, %v5199_v0  ;;  %v5201_v4 = vld [vmem:[#allocation2 + $0x174] sm:$0xf0]  ;;  %v5207_v5 = vld [vmem:[#allocation2 + $0x170] sm:$0xf] }
   0xe   :  { %v5976_v6 = vld [vmem:[#allocation2 + $0x178] sm:$0xf0]  ;;  %v5204_v7 = vor.u32 %v5974_v2, %v5201_v4  ;;  %v5359_v9 = vld [vmem:[#allocation2 + $0xa8] sm:$0xf]  ;;  %v5951_v10 = vld [vmem:[#allocation2 + $0xb0] sm:$0xf0] }
   0xf   :  { %v5208_v8 = vor.u32 %v5976_v6, %v5207_v5  ;;  %v5187_v11 = vld [vmem:[#allocation2 + $0x150] sm:$0xf]  ;;  %756 = vmatpush.bf16.msra.mxu0 %v5200_v3  ;;  %v5360_v12 = vor.u32 %v5951_v10, %v5359_v9  ;;  %v5972_v13 = vld [vmem:[#allocation2 + $0x158] sm:$0xf0]  ;;  %v5971_v14 = vld [vmem:[#allocation2 + $0x154] sm:$0xf] }
  0x10   :  { %v5189_v15 = vld [vmem:[#allocation2 + $0x15c] sm:$0xf0]  ;;  %845 = vmatpush.bf16.msra.mxu1 %v5204_v7  ;;  %v5188_v16 = vor.u32 %v5972_v13, %v5187_v11  ;;  %v5195_v18 = vld [vmem:[#allocation2 + $0x158] sm:$0xf]  ;;  %v5973_v19 = vld [vmem:[#allocation2 + $0x160] sm:$0xf0] }
  0x11   :  { %934 = vmatpush.bf16.msra.mxu2 %v5208_v8  ;;  %v5192_v17 = vor.u32 %v5971_v14, %v5189_v15  ;;  %v5347_v20 = vld [vmem:[#allocation2 + $0x90] sm:$0xf]  ;;  %1247 = vmatpush.bf16.msra.mxu3 %v5360_v12  ;;  %v5196_v21 = vor.u32 %v5973_v19, %v5195_v18  ;;  %v5948_v22 = vld [vmem:[#allocation2 + $0x98] sm:$0xf0]  ;;  %v5175_v23 = vld [vmem:[#allocation2 + $0x138] sm:$0xf] }
  0x12   :  { %v5969_v24 = vld [vmem:[#allocation2 + $0x140] sm:$0xf0]  ;;  %v5348_v25 = vor.u32 %v5948_v22, %v5347_v20  ;;  %v5968_v26 = vld [vmem:[#allocation2 + $0x13c] sm:$0xf]  ;;  %v5177_v27 = vld [vmem:[#allocation2 + $0x144] sm:$0xf0] }
  0x13   :  { %v5183_v28 = vld [vmem:[#allocation2 + $0x140] sm:$0xf]  ;;  %757 = vmatpush.bf16.msra.mxu0 %v5188_v16  ;;  %v5176_v29 = vor.u32 %v5969_v24, %v5175_v23  ;;  %v5970_v30 = vld [vmem:[#allocation2 + $0x148] sm:$0xf0]  ;;  %v5335_v31 = vld [vmem:[#allocation2 + $0x78] sm:$0xf]  ;;  %v5180_v33 = vor.u32 %v5968_v26, %v5177_v27 }
  0x14   :  { %v5945_v32 = vld [vmem:[#allocation2 + $0x80] sm:$0xf0]  ;;  %846 = vmatpush.bf16.msra.mxu1 %v5192_v17  ;;  %v5184_v34 = vor.u32 %v5970_v30, %v5183_v28  ;;  %v5163_v35 = vld [vmem:[#allocation2 + $0x120] sm:$0xf]  ;;  %v5966_v36 = vld [vmem:[#allocation2 + $0x128] sm:$0xf0] }
  0x15   :  { %935 = vmatpush.bf16.msra.mxu2 %v5196_v21  ;;  %v5965_v37 = vld [vmem:[#allocation2 + $0x124] sm:$0xf]  ;;  %1248 = vmatpush.bf16.msra.mxu3 %v5348_v25  ;;  %v5336_v38 = vor.u32 %v5945_v32, %v5335_v31  ;;  %v5165_v39 = vld [vmem:[#allocation2 + $0x12c] sm:$0xf0]  ;;  %v5171_v40 = vld [vmem:[#allocation2 + $0x128] sm:$0xf]  ;;  %v5164_v44 = vor.u32 %v5966_v36, %v5163_v35 }
  0x16   :  { %v5967_v41 = vld [vmem:[#allocation2 + $0x130] sm:$0xf0]  ;;  %v5323_v42 = vld [vmem:[#allocation2 + $0x60] sm:$0xf]  ;;  %v5942_v43 = vld [vmem:[#allocation2 + $0x68] sm:$0xf0]  ;;  %v5168_v45 = vor.u32 %v5965_v37, %v5165_v39 }
  0x17   :  { %758 = vmatpush.bf16.msra.mxu0 %v5176_v29  ;;  %v5172_v46 = vor.u32 %v5967_v41, %v5171_v40  ;;  %v5151_v47 = vld [vmem:[#allocation2 + $0x108] sm:$0xf]  ;;  %v5963_v48 = vld [vmem:[#allocation2 + $0x110] sm:$0xf0]  ;;  %v5962_v49 = vld [vmem:[#allocation2 + $0x10c] sm:$0xf]  ;;  %v5324_v50 = vor.u32 %v5942_v43, %v5323_v42 }
  0x18   :  { %847 = vmatpush.bf16.msra.mxu1 %v5180_v33  ;;  %v5153_v51 = vld [vmem:[#allocation2 + $0x114] sm:$0xf0]  ;;  %v5159_v52 = vld [vmem:[#allocation2 + $0x110] sm:$0xf]  ;;  %v5964_v53 = vld [vmem:[#allocation2 + $0x118] sm:$0xf0]  ;;  %v5152_v57 = vor.u32 %v5963_v48, %v5151_v47 }
  0x19   :  { %936 = vmatpush.bf16.msra.mxu2 %v5184_v34  ;;  %1249 = vmatpush.bf16.msra.mxu3 %v5336_v38  ;;  %v5311_v54 = vld [vmem:[#allocation2 + $0x48] sm:$0xf]  ;;  %v5939_v55 = vld [vmem:[#allocation2 + $0x50] sm:$0xf0]  ;;  %v5139_v56 = vld [vmem:[#allocation2 + $0xf0] sm:$0xf]  ;;  %v5156_v61 = vor.u32 %v5962_v49, %v5153_v51  ;;  %v5160_v62 = vor.u32 %v5964_v53, %v5159_v52 }
  0x1a   :  { %v5960_v58 = vld [vmem:[#allocation2 + $0xf8] sm:$0xf0]  ;;  %v5959_v59 = vld [vmem:[#allocation2 + $0xf4] sm:$0xf]  ;;  %v5141_v60 = vld [vmem:[#allocation2 + $0xfc] sm:$0xf0]  ;;  %v5312_v2 = vor.u32 %v5939_v55, %v5311_v54 }
  0x1b   :  { %759 = vmatpush.bf16.msra.mxu0 %v5164_v44  ;;  %v5147_v63 = vld [vmem:[#allocation2 + $0xf8] sm:$0xf]  ;;  %v5961_v0 = vld [vmem:[#allocation2 + $0x100] sm:$0xf0]  ;;  %v5299_v1 = vld [vmem:[#allocation2 + $0x30] sm:$0xf]  ;;  %v5140_v9 = vor.u32 %v5960_v58, %v5139_v56  ;;  %v5144_v13 = vor.u32 %v5959_v59, %v5141_v60 }
  0x1c   :  { %848 = vmatpush.bf16.msra.mxu1 %v5168_v45  ;;  %vm144_vm0 = vsmask.f32 3328  ;;  %vm145_vm1 = vsmask.f32 7440  ;;  %v5936_v3 = vld [vmem:[#allocation2 + $0x38] sm:$0xf0]  ;;  %v5148_v14 = vor.u32 %v5961_v0, %v5147_v63 }
  0x1d   :  { %937 = vmatpush.bf16.msra.mxu2 %v5172_v46  ;;  %1250 = vmatpush.bf16.msra.mxu3 %v5324_v50  ;;  %v5127_v4 = vld [vmem:[#allocation2 + $0xd8] sm:$0xf]  ;;  %v5957_v5 = vld [vmem:[#allocation2 + $0xe0] sm:$0xf0]  ;;  %v5956_v6 = vld [vmem:[#allocation2 + $0xdc] sm:$0xf]  ;;  %v5300_v19 = vor.u32 %v5936_v3, %v5299_v1 }
  0x1e   :  { %v5129_v7 = vld [vmem:[#allocation2 + $0xe4] sm:$0xf0]  ;;  %v5135_v8 = vld [vmem:[#allocation2 + $0xe0] sm:$0xf]  ;;  %v5958_v10 = vld [vmem:[#allocation2 + $0xe8] sm:$0xf0]  ;;  %v5128_v23 = vor.u32 %v5957_v5, %v5127_v4 }
  0x1f   :  { %760 = vmatpush.bf16.msra.mxu0 %v5152_v57  ;;  %v5287_v11 = vld [vmem:[#allocation2 + $0x18] sm:$0xf]  ;;  %v5933_v12 = vld [vmem:[#allocation2 + $0x20] sm:$0xf0]  ;;  %v5115_v15 = vld [vmem:[#allocation2 + $0xc0] sm:$0xf]  ;;  %v5132_v28 = vor.u32 %v5956_v6, %v5129_v7  ;;  %v5136_v29 = vor.u32 %v5958_v10, %v5135_v8 }
  0x20   :  { %849 = vmatpush.bf16.msra.mxu1 %v5156_v61  ;;  %v5954_v16 = vld [vmem:[#allocation2 + $0xc8] sm:$0xf0]  ;;  %v5953_v17 = vld [vmem:[#allocation2 + $0xc4] sm:$0xf]  ;;  %v5117_v18 = vld [vmem:[#allocation2 + $0xcc] sm:$0xf0]  ;;  %v5288_v34 = vor.u32 %v5933_v12, %v5287_v11 }
  0x21   :  { %938 = vmatpush.bf16.msra.mxu2 %v5160_v62  ;;  %1251 = vmatpush.bf16.msra.mxu3 %v5312_v2  ;;  %v5123_v20 = vld [vmem:[#allocation2 + $0xc8] sm:$0xf]  ;;  %v6363_v21 = vld [vmem:[%s9136_s0] sm:$0xf]  ;;  %v65_v22 = vld [vmem:[%s9136_s0 + $0x4] sm:$0xf]  ;;  %v5116_v39 = vor.u32 %v5954_v16, %v5115_v15  ;;  %v5120_v40 = vor.u32 %v5953_v17, %v5117_v18 }
  0x22   :  { %v6371_v24 = vld [vmem:[%s9136_s0 + $0x8] sm:$0x3]  ;;  %v9202_v25 = vshrl.u32 %v6363_v21, 16  ;;  %v9197_v26 = vshll.u32 %v6363_v21, 16  ;;  %v157_v27 = vshll.u32 %v65_v22, 16  ;;  %v161_v31 = vshrl.u32 %v65_v22, 16  ;;  %vm6394_vm2 = vmor %vm144_vm0, %vm145_vm1 }
  0x23   :  { %761 = vmatpush.bf16.msra.mxu0 %v5140_v9  ;;  %v5955_v30 = vld [vmem:[#allocation2 + $0xd0] sm:$0xf0]  ;;  %v9196_v32 = vshll.u32 %v6371_v24, 16  ;;  %v6379_v33 = vld [vmem:[%s9136_s0 + $0xc] sm:$0xf]  ;;  %v5913_v5 = vld [vmem:[%s9136_s0] sm:$0xff] }
  0x24   :  { %850 = vmatpush.bf16.msra.mxu1 %v5144_v13  ;;  %v150_v35 = vrot.slane %v9202_v25, 4  ;;  %v153_v36 = vrot.slane %v9197_v26, 5  ;;  %v159_v37 = vrot.slane %v157_v27, 5  ;;  %v6388_v38 = vld [vmem:[%s9136_s0 + $0x10] sm:$0xf]  ;;  %v163_v43 = vrot.slane %v161_v31, 4 }
  0x25   :  { %939 = vmatpush.bf16.msra.mxu2 %v5148_v14  ;;  %1252 = vmatpush.bf16.msra.mxu3 %v5300_v19  ;;  %v5275_v41 = vld [vmem:[#allocation2] sm:$0xf]  ;;  %v5930_v42 = vld [vmem:[#allocation2 + $0x8] sm:$0xf0]  ;;  %v2240_v44 = vrot.slane %v161_v31, 5  ;;  %v5124_v45 = vor.u32 %v5955_v30, %v5123_v20  ;;  %v169_v47 = vrot.slane %v9196_v32, 5 }
  0x26   :  { %v154_v46 = vor.u32 %v153_v36, %v150_v35  ;;  %v2241_v48 = vrot.slane %v157_v27, 6  ;;  %v164_v50 = vor.u32 %v163_v43, %v159_v37  ;;  %v9195_v51 = vshrl.u32 %v6379_v33, 16  ;;  %v6406_v57 = vld [vmem:[%s9136_s0 + $0x14] sm:$0x3]  ;;  %v6430_v10 = vld [vmem:[%s9136_s0 + $0x18] sm:$0xf] }
  0x27   :  { %762 = vmatpush.bf16.msra.mxu0 %v5128_v23  ;;  %v9194_v52 = vshll.u32 %v6379_v33, 16  ;;  %v9192_v53 = vshll.u32 %v6388_v38, 16  ;;  %v5276_v54 = vor.u32 %v5930_v42, %v5275_v41  ;;  %v9193_v58 = vshrl.u32 %v6388_v38, 16  ;;  %v5950_v13 = vld [vmem:[#allocation2 + $0xac] sm:$0xf] }
  0x28   :  { %851 = vmatpush.bf16.msra.mxu1 %v5132_v28  ;;  %v155_v55 = vrot.slane %v154_v46, 4  ;;  %v6401_v56 = vor.u32 %v2241_v48, %v2240_v44  ;;  %v165_v59 = vrot.slane %v164_v50, 4  ;;  %v174_v60 = vrot.slane %v9195_v51, 4  ;;  %v5361_v14 = vld [vmem:[#allocation2 + $0xb4] sm:$0xf0] }
  0x29   :  { %940 = vmatpush.bf16.msra.mxu2 %v5136_v29  ;;  %1253 = vmatpush.bf16.msra.mxu3 %v5288_v34  ;;  %v177_v61 = vrot.slane %v9194_v52, 5  ;;  %v183_v62 = vrot.slane %v9192_v53, 5  ;;  %v187_v0 = vrot.slane %v9193_v58, 4  ;;  %v9190_v4 = vshll.u32 %v6406_v57, 16  ;;  %v6435_v15 = vld [vmem:[%s9136_s0 + $0x1c] sm:$0xf] }
  0x2a   :  { %v160_v63 = vsel %vm6394_vm2, %v155_v55, %v159_v37  ;;  %v170_v1 = vsel %vm6394_vm2, %v165_v59, %v169_v47  ;;  %v5364_v16 = vor.u32 %v5950_v13, %v5361_v14  ;;  %v9189_v17 = vshrl.u32 %v6430_v10, 16  ;;  %v6456_v35 = vld [vmem:[%s9136_s0 + $0x20] sm:$0x3]  ;;  %v6465_v43 = vld [vmem:[%s9136_s0 + $0x24] sm:$0xf] }
  0x2b   :  { %763 = vmatpush.bf16.msra.mxu0 %v5116_v39  ;;  %v564_v2 = vunpack.c.l.b16 %v160_v63  ;;  %v565_v3 = vunpack.c.l.b16 %v170_v1  ;;  %v178_v6 = vor.u32 %v177_v61, %v174_v60  ;;  %v188_v7 = vor.u32 %v187_v0, %v183_v62  ;;  %9293 = vst [vmem:[#allocation8_spill] sm:$0xff] %v6456_v35  ;;  %v5914_v39 = vld [vmem:[%s9136_s0 + $0xc] sm:$0xff]  ;;  %v6470_v44 = vld [vmem:[%s9136_s0 + $0x28] sm:$0xf]  ;;  %v5952_v48 = vld [vmem:[#allocation2 + $0xb8] sm:$0xf0] }
  0x2c   :  { %852 = vmatpush.bf16.msra.mxu1 %v5120_v40  ;;  %v193_v9 = vrot.slane %v9190_v4, 5  ;;  %v9188_v18 = vshll.u32 %v6430_v10, 16  ;;  %v9182_v22 = vshll.u32 %v6435_v15, 16  ;;  %v9183_v23 = vshrl.u32 %v6435_v15, 16  ;;  %9294 = vst [vmem:[#allocation9_spill] sm:$0xff] %v6465_v43 }
  0x2d   :  { %941 = vmatpush.bf16.msra.mxu2 %v5124_v45  ;;  %1254 = vmatpush.bf16.msra.mxu3 %v5276_v54  ;;  %v596_v8 = vpack.c.b16 %v565_v3, %v564_v2  ;;  %v179_v11 = vrot.slane %v178_v6, 4  ;;  %v189_v12 = vrot.slane %v188_v7, 4  ;;  %v198_v29 = vrot.slane %v9189_v17, 4  ;;  %9295 = vst [vmem:[#allocation10_spill] sm:$0xff] %v6470_v44  ;;  %v5367_v47 = vld [vmem:[#allocation2 + $0xb0] sm:$0xf] }
  0x2e   :  { %v201_v30 = vrot.slane %v9188_v18, 5  ;;  %v207_v31 = vrot.slane %v9182_v22, 5  ;;  %v211_v34 = vrot.slane %v9183_v23, 4  ;;  %v9181_v41 = vshll.u32 %v6456_v35, 16  ;;  %v6493_v6 = vld [vmem:[%s9136_s0 + $0x2c] sm:$0x3] }
  0x2f   :  { %764 = vmatmul.bf16.vlgmr.msra.gmra.mxu0 %v596_v8  ;;  %853 = vmatmul.bf16.vlgmr.msra.gmra.mxu1 %v596_v8  ;;  %v184_v19 = vsel %vm6394_vm2, %v179_v11, %v183_v62  ;;  %v194_v20 = vsel %vm6394_vm2, %v189_v12, %v193_v9  ;;  %v5368_v50 = vor.u32 %v5952_v48, %v5367_v47  ;;  %v9180_v54 = vshrl.u32 %v6465_v43, 16  ;;  %v5915_v12 = vld [vmem:[%s9136_s0 + $0x18] sm:$0xff]  ;;  %v5319_v52 = vld [vmem:[#allocation2 + $0x50] sm:$0xf]  ;;  %v6113_v49 = vld [vmem:[%s9136_s0 + $0x4] sm:$0xf] }
  0x30   :  { %942 = vmatmul.bf16.vlgmr.msra.gmra.mxu2 %v596_v8  ;;  %1255 = vmatmul.bf16.vlgmr.msra.gmra.mxu3 %v5913_v5  ;;  %v566_v27 = vunpack.c.l.b16 %v184_v19  ;;  %v567_v28 = vunpack.c.l.b16 %v194_v20  ;;  %v202_v37 = vor.u32 %v201_v30, %v198_v29  ;;  %v212_v40 = vor.u32 %v211_v34, %v207_v31  ;;  %9296 = vst [vmem:[#allocation11_spill] sm:$0xff] %v6493_v6  ;;  %v5471_v19 = vld [vmem:[#allocation2 + $0x228] sm:$0xf]  ;;  %v5999_v20 = vld [vmem:[#allocation2 + $0x230] sm:$0xf0] }
  0x31   :  { %1336 = vmatpush.bf16.msrb.mxu0 %v5364_v16  ;;  %v217_v46 = vrot.slane %v9181_v41, 5  ;;  %v9179_v59 = vshll.u32 %v6465_v43, 16  ;;  %v9177_v60 = vshll.u32 %v6470_v44, 16  ;;  %v9178_v61 = vshrl.u32 %v6470_v44, 16  ;;  %1425 = vmatpush.bf16.msrb.mxu1 %v5368_v50  ;;  %v6509_v29 = vld [vmem:[%s9136_s0 + $0x34] sm:$0xf] }
  0x32   :  { %v597_v36 = vpack.c.b16 %v567_v28, %v566_v27  ;;  %v203_v42 = vrot.slane %v202_v37, 4  ;;  %v213_v45 = vrot.slane %v212_v40, 4  ;;  %v222_v0 = vrot.slane %v9180_v54, 4  ;;  %v5947_v27 = vld [vmem:[#allocation2 + $0x94] sm:$0xf]  ;;  %9298 = vst [vmem:[#allocation13_spill] sm:$0xff] %v6509_v29 }
  0x33   :  { %v225_v2 = vrot.slane %v9179_v59, 5  ;;  %v231_v3 = vrot.slane %v9177_v60, 5  ;;  %v235_v5 = vrot.slane %v9178_v61, 4  ;;  %v9172_v11 = vshll.u32 %v6493_v6, 16  ;;  %v6504_v28 = vld [vmem:[%s9136_s0 + $0x30] sm:$0xf] }
  0x34   :  { %v208_v55 = vsel %vm6394_vm2, %v203_v42, %v207_v31  ;;  %v218_v62 = vsel %vm6394_vm2, %v213_v45, %v217_v46  ;;  %9297 = vst [vmem:[#allocation12_spill] sm:$0xff] %v6504_v28  ;;  %v5472_v30 = vor.u32 %v5999_v20, %v5471_v19  ;;  %v5349_v31 = vld [vmem:[#allocation2 + $0x9c] sm:$0xf0]  ;;  %v9164_v40 = vshll.u32 %v6504_v28, 16  ;;  %v6522_v48 = vld [vmem:[%s9136_s0 + $0x38] sm:$0x3] }
  0x35   :  { %v568_v63 = vunpack.c.l.b16 %v208_v55  ;;  %v569_v1 = vunpack.c.l.b16 %v218_v62  ;;  %v226_v8 = vor.u32 %v225_v2, %v222_v0  ;;  %v236_v9 = vor.u32 %v235_v5, %v231_v3  ;;  %9299 = vst [vmem:[#allocation14_spill] sm:$0xff] %v6522_v48  ;;  %v5916_v2 = vld [vmem:[%s9136_s0 + $0x24] sm:$0xff]  ;;  %v5938_v41 = vld [vmem:[#allocation2 + $0x4c] sm:$0xf]  ;;  %v5313_v22 = vld [vmem:[#allocation2 + $0x54] sm:$0xf0] }
  0x36   :  { %v241_v16 = vrot.slane %v9172_v11, 5  ;;  %v5352_v34 = vor.u32 %v5947_v27, %v5349_v31  ;;  %1870 = vmatpush.bf16.msrb.mxu2 %v5472_v30  ;;  %v9162_v42 = vshll.u32 %v6509_v29, 16  ;;  %v9163_v45 = vshrl.u32 %v6509_v29, 16  ;;  %v5940_v51 = vld [vmem:[#allocation2 + $0x58] sm:$0xf0] }
  0x37   :  { %v598_v7 = vpack.c.b16 %v569_v1, %v568_v63  ;;  %v227_v13 = vrot.slane %v226_v8, 4  ;;  %v237_v14 = vrot.slane %v236_v9, 4  ;;  %v249_v55 = vrot.slane %v9164_v40, 5  ;;  %v6541_v8 = vld [vmem:[%s9136_s0 + $0x3c] sm:$0xf] }
  0x38   :  { %1337 = vmatpush.bf16.msrb.mxu0 %v5352_v34  ;;  %v255_v62 = vrot.slane %v9162_v42, 5  ;;  %v259_v63 = vrot.slane %v9163_v45, 4  ;;  %v9161_v1 = vshll.u32 %v6522_v48, 16  ;;  %9300 = vst [vmem:[#allocation15_spill] sm:$0xff] %v6541_v8  ;;  %v6546_v9 = vld [vmem:[%s9136_s0 + $0x40] sm:$0xf]  ;;  %v5320_v32 = vor.u32 %v5940_v51, %v5319_v52 }
  0x39   :  { %v242_v37 = vsel %vm6394_vm2, %v237_v14, %v241_v16  ;;  %9301 = vst [vmem:[#allocation16_spill] sm:$0xff] %v6546_v9  ;;  %v5355_v14 = vld [vmem:[#allocation2 + $0x98] sm:$0xf]  ;;  %v5949_v16 = vld [vmem:[#allocation2 + $0xa0] sm:$0xf0]  ;;  %v9160_v20 = vshrl.u32 %v6541_v8, 16 }
  0x3a   :  { %v571_v47 = vunpack.c.l.b16 %v242_v37  ;;  %v260_v5 = vor.u32 %v259_v63, %v255_v62  ;;  %v5356_v19 = vor.u32 %v5949_v16, %v5355_v14  ;;  %v9154_v27 = vshll.u32 %v6541_v8, 16  ;;  %v6578_v16 = vld [vmem:[%s9136_s0 + $0x48] sm:$0xf]  ;;  %v5978_v8 = vld [vmem:[#allocation2 + $0x188] sm:$0xf0] }
  0x3b   :  { %v9147_v30 = vshll.u32 %v6546_v9, 16  ;;  %v9153_v31 = vshrl.u32 %v6546_v9, 16  ;;  %v270_v37 = vrot.slane %v9160_v20, 4  ;;  %9303 = vst [vmem:[#allocation18_spill] sm:$0xff] %v6578_v16  ;;  %v5389_v29 = vld [vmem:[#allocation2 + $0x18c] sm:$0xf0] }
  0x3c   :  { %1426 = vmatpush.bf16.msrb.mxu1 %v5356_v19  ;;  %v6583_v19 = vld [vmem:[%s9136_s0 + $0x4c] sm:$0xf]  ;;  %vm1530_vm3 = vcmask 1042432   ;;  %vm1531_vm4 = vcmask 1046532   ;;  %vm2233_vm6 = vsmask.f32 2304 }
  0x3d   :  { %9304 = vst [vmem:[#allocation19_spill] sm:$0xff] %v6583_v19  ;;  %vm7050_vm5 = vmor %vm1530_vm3, %vm1531_vm4  ;;  %vm2234_vm7 = vsmask.f32 6416  ;;  %vm3064_vm9 = vcmask 1041408   ;;  %vm3065_vm10 = vcmask 1045508   ;;  %vm4502_vm12 = vcmask 1041409  }
  0x3e   :  { %vm7554_vm8 = vmor %vm2233_vm6, %vm2234_vm7  ;;  %vm4505_vm13 = vcmask 1042434   ;;  %vm4508_vm14 = vcmask 1043459   ;;  %vm4511_vm15 = vcmask 1044484   ;;  %vm4514_vm0 = vcmask 1045509  }
  0x3f   :  { %769 = vmatmul.bf16.gmra.mxu0 %v597_v36  ;;  %858 = vmatmul.bf16.gmra.mxu1 %v597_v36  ;;  %vm8177_vm11 = vmor %vm3064_vm9, %vm3065_vm10  ;;  %vm4517_vm1 = vcmask 1046534  }
  0x40   :  { %947 = vmatmul.bf16.gmra.mxu2 %v597_v36  ;;  %1260 = vmatmul.bf16.gmra.mxu3 %v5914_v39  ;;  %v232_v36 = vsel %vm6394_vm2, %v227_v13, %v231_v3  ;;  %v9170_v39 = vshrl.u32 %v6504_v28, 16  ;;  %v261_v13 = vrot.slane %v260_v5, 4 }
  0x41   :  { %v570_v46 = vunpack.c.l.b16 %v232_v36 }
  0x42   :  { %v246_v50 = vrot.slane %v9170_v39, 4 }
  0x43   :  { %v599_v0 = vpack.c.b16 %v571_v47, %v570_v46  ;;  %v273_v46 = vrot.slane %v9154_v27, 5  ;;  %v279_v47 = vrot.slane %v9147_v30, 5  ;;  %v9148_v30 = vshll.u32 %v6583_v19, 16 }
  0x44   :  { %v250_v3 = vor.u32 %v249_v55, %v246_v50  ;;  %v283_v50 = vrot.slane %v9153_v31, 4 }
  0x4f   :  { %774 = vmatmul.bf16.gmra.mxu0 %v598_v7  ;;  %863 = vmatmul.bf16.gmra.mxu1 %v598_v7 }
  0x50   :  { %952 = vmatmul.bf16.gmra.mxu2 %v598_v7  ;;  %1265 = vmatmul.bf16.gmra.mxu3 %v5915_v12  ;;  %v265_v7 = vrot.slane %v9161_v1, 5  ;;  %v251_v12 = vrot.slane %v250_v3, 4 }
  0x52   :  { %v256_v34 = vsel %vm6394_vm2, %v251_v12, %v255_v62  ;;  %v266_v36 = vsel %vm6394_vm2, %v261_v13, %v265_v7  ;;  %v6567_v62 = vld [vmem:[%s9136_s0 + $0x44] sm:$0x3]  ;;  %v5917_v7 = vld [vmem:[%s9136_s0 + $0x30] sm:$0xff] }
  0x53   :  { %v572_v55 = vunpack.c.l.b16 %v256_v34  ;;  %v573_v63 = vunpack.c.l.b16 %v266_v36  ;;  %9302 = vst [vmem:[#allocation17_spill] sm:$0xff] %v6567_v62  ;;  %v9146_v3 = vshll.u32 %v6567_v62, 16  ;;  %v5459_v34 = vld [vmem:[#allocation2 + $0x210] sm:$0xf]  ;;  %v5996_v36 = vld [vmem:[#allocation2 + $0x218] sm:$0xf0] }
  0x55   :  { %v600_v5 = vpack.c.b16 %v573_v63, %v572_v55  ;;  %v289_v14 = vrot.slane %v9146_v3, 5  ;;  %v9150_v3 = vshll.u32 %v6578_v16, 16 }
  0x5f   :  { %779 = vmatmul.bf16.gmra.mxu0 %v599_v0  ;;  %868 = vmatmul.bf16.gmra.mxu1 %v599_v0 }
  0x60   :  { %957 = vmatmul.bf16.gmra.mxu2 %v599_v0  ;;  %1270 = vmatmul.bf16.gmra.mxu3 %v5916_v2  ;;  %v274_v0 = vor.u32 %v273_v46, %v270_v37  ;;  %v284_v2 = vor.u32 %v283_v50, %v279_v47  ;;  %v5944_v37 = vld [vmem:[#allocation2 + $0x7c] sm:$0xf]  ;;  %v5460_v46 = vor.u32 %v5996_v36, %v5459_v34  ;;  %v5337_v50 = vld [vmem:[#allocation2 + $0x84] sm:$0xf0] }
  0x62   :  { %v275_v12 = vrot.slane %v274_v0, 4  ;;  %v285_v13 = vrot.slane %v284_v2, 4  ;;  %v5340_v0 = vor.u32 %v5944_v37, %v5337_v50  ;;  %v9151_v2 = vshrl.u32 %v6578_v16, 16  ;;  %1871 = vmatpush.bf16.msrb.mxu2 %v5460_v46 }
  0x64   :  { %v280_v55 = vsel %vm6394_vm2, %v275_v12, %v279_v47  ;;  %v290_v63 = vsel %vm6394_vm2, %v285_v13, %v289_v14  ;;  %1338 = vmatpush.bf16.msrb.mxu0 %v5340_v0  ;;  %v294_v36 = vrot.slane %v9151_v2, 4  ;;  %v297_v47 = vrot.slane %v9150_v3, 5  ;;  %v6604_v14 = vld [vmem:[%s9136_s0 + $0x50] sm:$0x3]  ;;  %v5343_v3 = vld [vmem:[#allocation2 + $0x80] sm:$0xf] }
  0x65   :  { %v575_v34 = vunpack.c.l.b16 %v290_v63  ;;  %v303_v12 = vrot.slane %v9148_v30, 5  ;;  %9305 = vst [vmem:[#allocation20_spill] sm:$0xff] %v6604_v14  ;;  %v5918_v63 = vld [vmem:[%s9136_s0 + $0x3c] sm:$0xff]  ;;  %v5946_v2 = vld [vmem:[#allocation2 + $0x88] sm:$0xf0] }
  0x66   :  { %v298_v46 = vor.u32 %v297_v47, %v294_v36  ;;  %v5344_v36 = vor.u32 %v5946_v2, %v5343_v3  ;;  %v6633_v3 = vld [vmem:[%s9136_s0 + $0x5c] sm:$0x3] }
  0x67   :  { %9308 = vst [vmem:[#allocation23_spill] sm:$0xff] %v6633_v3 }
  0x68   :  { %v299_v0 = vrot.slane %v298_v46, 4  ;;  %1427 = vmatpush.bf16.msrb.mxu1 %v5344_v36  ;;  %v9159_v36 = vshll.u32 %v6633_v3, 16  ;;  %v5449_v3 = vld [vmem:[#allocation2 + $0x204] sm:$0xf0] }
  0x6a   :  { %v304_v47 = vsel %vm6394_vm2, %v299_v0, %v303_v12 }
  0x6f   :  { %784 = vmatmul.bf16.gmra.mxu0 %v600_v5  ;;  %873 = vmatmul.bf16.gmra.mxu1 %v600_v5 }
  0x70   :  { %962 = vmatmul.bf16.gmra.mxu2 %v600_v5  ;;  %1275 = vmatmul.bf16.gmra.mxu3 %v5917_v7  ;;  %v9149_v5 = vshrl.u32 %v6583_v19, 16  ;;  %v574_v7 = vunpack.c.l.b16 %v280_v55  ;;  %v9152_v55 = vshll.u32 %v6604_v14, 16  ;;  %v5399_v14 = vld [vmem:[#allocation2 + $0x198] sm:$0xf]  ;;  %v5980_v19 = vld [vmem:[#allocation2 + $0x19c] sm:$0xf] }
  0x72   :  { %v307_v13 = vrot.slane %v9149_v5, 4  ;;  %v601_v37 = vpack.c.b16 %v575_v34, %v574_v7  ;;  %v313_v5 = vrot.slane %v9152_v55, 5  ;;  %v6615_v7 = vld [vmem:[%s9136_s0 + $0x54] sm:$0xf]  ;;  %v6620_v34 = vld [vmem:[%s9136_s0 + $0x58] sm:$0xf]  ;;  %v576_v55 = vunpack.c.l.b16 %v304_v47 }
  0x73   :  { %9306 = vst [vmem:[#allocation21_spill] sm:$0xff] %v6615_v7  ;;  %v9155_v46 = vshll.u32 %v6615_v7, 16  ;;  %v5919_v47 = vld [vmem:[%s9136_s0 + $0x48] sm:$0xff] }
  0x74   :  { %v308_v50 = vor.u32 %v307_v13, %v303_v12  ;;  %9307 = vst [vmem:[#allocation22_spill] sm:$0xff] %v6620_v34 }
  0x76   :  { %v309_v30 = vrot.slane %v308_v50, 4  ;;  %v9156_v50 = vshll.u32 %v6620_v34, 16 }
  0x78   :  { %v314_v13 = vsel %vm6394_vm2, %v309_v30, %v313_v5  ;;  %v321_v30 = vrot.slane %v9155_v46, 5  ;;  %v327_v5 = vrot.slane %v9156_v50, 5  ;;  %v337_v46 = vrot.slane %v9159_v36, 5  ;;  %v6652_v50 = vld [vmem:[%s9136_s0 + $0x60] sm:$0xf] }
  0x79   :  { %v577_v31 = vunpack.c.l.b16 %v314_v13  ;;  %9309 = vst [vmem:[#allocation24_spill] sm:$0xff] %v6652_v50  ;;  %v9166_v36 = vshll.u32 %v6652_v50, 16 }
  0x7b   :  { %v602_v0 = vpack.c.b16 %v577_v31, %v576_v55  ;;  %v6657_v31 = vld [vmem:[%s9136_s0 + $0x64] sm:$0xf] }
  0x7c   :  { %9310 = vst [vmem:[#allocation25_spill] sm:$0xff] %v6657_v31  ;;  %v9165_v20 = vshll.u32 %v6657_v31, 16  ;;  %v9169_v1 = vshrl.u32 %v6657_v31, 16 }
  0x7e   :  { %v351_v45 = vrot.slane %v9165_v20, 5  ;;  %v5920_v20 = vld [vmem:[%s9136_s0 + $0x54] sm:$0xff] }
  0x7f   :  { %789 = vmatmul.bf16.gmra.mxu0 %v601_v37  ;;  %878 = vmatmul.bf16.gmra.mxu1 %v601_v37 }
  0x80   :  { %967 = vmatmul.bf16.gmra.mxu2 %v601_v37  ;;  %1280 = vmatmul.bf16.gmra.mxu3 %v5918_v63  ;;  %v9158_v37 = vshrl.u32 %v6615_v7, 16  ;;  %v9157_v63 = vshrl.u32 %v6620_v34, 16  ;;  %v5425_v7 = vld [vmem:[#allocation2 + $0x1d4] sm:$0xf0] }
  0x82   :  { %v318_v2 = vrot.slane %v9158_v37, 4  ;;  %v331_v12 = vrot.slane %v9157_v63, 4  ;;  %v9167_v37 = vshrl.u32 %v6652_v50, 16 }
  0x84   :  { %v322_v13 = vor.u32 %v321_v30, %v318_v2  ;;  %v332_v27 = vor.u32 %v331_v12, %v327_v5  ;;  %v5447_v30 = vld [vmem:[#allocation2 + $0x1f8] sm:$0xf]  ;;  %v5993_v12 = vld [vmem:[#allocation2 + $0x200] sm:$0xf0] }
  0x85   :  { %v5448_v63 = vor.u32 %v5993_v12, %v5447_v30  ;;  %v342_v30 = vrot.slane %v9167_v37, 4  ;;  %v345_v12 = vrot.slane %v9166_v36, 5 }
  0x86   :  { %v323_v55 = vrot.slane %v322_v13, 4  ;;  %v333_v2 = vrot.slane %v332_v27, 4  ;;  %v5325_v27 = vld [vmem:[#allocation2 + $0x6c] sm:$0xf0] }
  0x87   :  { %1872 = vmatpush.bf16.msrb.mxu2 %v5448_v63  ;;  %v355_v63 = vrot.slane %v9169_v1, 4 }
  0x88   :  { %v328_v42 = vsel %vm6394_vm2, %v323_v55, %v327_v5  ;;  %v346_v55 = vor.u32 %v345_v12, %v342_v30 }
  0x89   :  { %v578_v40 = vunpack.c.l.b16 %v328_v42 }
  0x8a   :  { %v347_v36 = vrot.slane %v346_v55, 4  ;;  %v5331_v55 = vld [vmem:[#allocation2 + $0x68] sm:$0xf] }
  0x8f   :  { %794 = vmatmul.bf16.gmra.mxu0 %v602_v0  ;;  %883 = vmatmul.bf16.gmra.mxu1 %v602_v0 }
  0x90   :  { %972 = vmatmul.bf16.gmra.mxu2 %v602_v0  ;;  %1285 = vmatmul.bf16.gmra.mxu3 %v5919_v47  ;;  %v338_v0 = vsel %vm6394_vm2, %v333_v2, %v337_v46  ;;  %v5941_v47 = vld [vmem:[#allocation2 + $0x64] sm:$0xf]  ;;  %v6678_v46 = vld [vmem:[%s9136_s0 + $0x68] sm:$0x3]  ;;  %v356_v2 = vor.u32 %v355_v63, %v351_v45 }
  0x91   :  { %v5328_v13 = vor.u32 %v5941_v47, %v5325_v27  ;;  %v579_v5 = vunpack.c.l.b16 %v338_v0  ;;  %9311 = vst [vmem:[#allocation26_spill] sm:$0xff] %v6678_v46  ;;  %v9168_v47 = vshll.u32 %v6678_v46, 16  ;;  %v6689_v0 = vld [vmem:[%s9136_s0 + $0x6c] sm:$0xf] }
  0x92   :  { %v357_v37 = vrot.slane %v356_v2, 4  ;;  %9312 = vst [vmem:[#allocation27_spill] sm:$0xff] %v6689_v0  ;;  %v9171_v12 = vshrl.u32 %v6689_v0, 16  ;;  %v5943_v2 = vld [vmem:[#allocation2 + $0x70] sm:$0xf0] }
  0x93   :  { %1339 = vmatpush.bf16.msrb.mxu0 %v5328_v13  ;;  %v603_v27 = vpack.c.b16 %v579_v5, %v578_v40  ;;  %v361_v42 = vrot.slane %v9168_v47, 5  ;;  %v6694_v40 = vld [vmem:[%s9136_s0 + $0x70] sm:$0xf]  ;;  %v352_v13 = vsel %vm6394_vm2, %v347_v36, %v351_v45 }
  0x94   :  { %9313 = vst [vmem:[#allocation28_spill] sm:$0xff] %v6694_v40  ;;  %v9173_v63 = vshll.u32 %v6694_v40, 16  ;;  %v9174_v5 = vshrl.u32 %v6694_v40, 16  ;;  %v580_v47 = vunpack.c.l.b16 %v352_v13  ;;  %v366_v39 = vrot.slane %v9171_v12, 4 }
  0x95   :  { %v362_v30 = vsel %vm6394_vm2, %v357_v37, %v361_v42  ;;  %v6715_v42 = vld [vmem:[%s9136_s0 + $0x74] sm:$0x3] }
  0x96   :  { %v581_v1 = vunpack.c.l.b16 %v362_v30  ;;  %v375_v37 = vrot.slane %v9173_v63, 5  ;;  %v379_v36 = vrot.slane %v9174_v5, 4  ;;  %9314 = vst [vmem:[#allocation29_spill] sm:$0xff] %v6715_v42  ;;  %v5921_v63 = vld [vmem:[%s9136_s0 + $0x60] sm:$0xff] }
  0x98   :  { %v604_v13 = vpack.c.b16 %v581_v1, %v580_v47  ;;  %v5435_v1 = vld [vmem:[#allocation2 + $0x1e0] sm:$0xf]  ;;  %v5990_v47 = vld [vmem:[#allocation2 + $0x1e8] sm:$0xf0] }
  0x9f   :  { %799 = vmatmul.bf16.gmra.mxu0 %v603_v27  ;;  %888 = vmatmul.bf16.gmra.mxu1 %v603_v27 }
  0xa0   :  { %977 = vmatmul.bf16.gmra.mxu2 %v603_v27  ;;  %1290 = vmatmul.bf16.gmra.mxu3 %v5920_v20  ;;  %v9175_v20 = vshll.u32 %v6689_v0, 16  ;;  %v5332_v27 = vor.u32 %v5943_v2, %v5331_v55  ;;  %v380_v55 = vor.u32 %v379_v36, %v375_v37  ;;  %v9176_v2 = vshll.u32 %v6715_v42, 16 }
  0xa1   :  { %v5436_v36 = vor.u32 %v5990_v47, %v5435_v1 }
  0xa2   :  { %v369_v45 = vrot.slane %v9175_v20, 5  ;;  %1428 = vmatpush.bf16.msrb.mxu1 %v5332_v27  ;;  %v381_v5 = vrot.slane %v380_v55, 4  ;;  %v385_v20 = vrot.slane %v9176_v2, 5 }
  0xa3   :  { %1873 = vmatpush.bf16.msrb.mxu2 %v5436_v36 }
  0xa4   :  { %v370_v30 = vor.u32 %v369_v45, %v366_v39  ;;  %v6728_v39 = vld [vmem:[%s9136_s0 + $0x78] sm:$0xf]  ;;  %v6733_v45 = vld [vmem:[%s9136_s0 + $0x7c] sm:$0xf]  ;;  %v386_v54 = vsel %vm6394_vm2, %v381_v5, %v385_v20  ;;  %v6760_v5 = vld [vmem:[%s9136_s0 + $0x80] sm:$0x3] }
  0xa5   :  { %9315 = vst [vmem:[#allocation30_spill] sm:$0xff] %v6728_v39  ;;  %v9185_v2 = vshll.u32 %v6728_v39, 16  ;;  %v9186_v1 = vshll.u32 %v6733_v45, 16  ;;  %v9187_v47 = vshrl.u32 %v6733_v45, 16  ;;  %v583_v23 = vunpack.c.l.b16 %v386_v54 }
  0xa6   :  { %v371_v27 = vrot.slane %v370_v30, 4  ;;  %9316 = vst [vmem:[#allocation31_spill] sm:$0xff] %v6733_v45  ;;  %v9191_v18 = vshll.u32 %v6760_v5, 16  ;;  %1429 = vmatpush.bf16.msrb.mxu1 %v5320_v32 }
  0xa7   :  { %v403_v20 = vrot.slane %v9187_v47, 4  ;;  %9318 = vst [vmem:[#allocation33_spill] sm:$0xff] %v6760_v5 }
  0xac   :  { %v765_v12 = vpop.f32.mrf.mxu0  ;;  %v6718_v11 = vpop.f32.mrf.mxu1 }
  0xaf   :  { %804 = vmatmul.bf16.gmra.mxu0 %v604_v13  ;;  %893 = vmatmul.bf16.gmra.mxu1 %v604_v13 }
  0xb0   :  { %982 = vmatmul.bf16.gmra.mxu2 %v604_v13  ;;  %1295 = vmatmul.bf16.gmra.mxu3 %v5921_v63  ;;  %v376_v13 = vsel %vm6394_vm2, %v371_v27, %v375_v37  ;;  %v9184_v63 = vshrl.u32 %v6728_v39, 16  ;;  %v5316_v37 = vor.u32 %v5938_v41, %v5313_v22 }
  0xb1   :  { %v582_v27 = vunpack.c.l.b16 %v376_v13 }
  0xb2   :  { %v390_v36 = vrot.slane %v9184_v63, 4  ;;  %1340 = vmatpush.bf16.msrb.mxu0 %v5316_v37 }
  0xb3   :  { %v6735_v30 = vpop.f32.mrf.mxu2  ;;  %v1256_v55 = vpop.f32.mrf.mxu3  ;;  %v605_v54 = vpack.c.b16 %v583_v23, %v582_v27  ;;  %v409_v23 = vrot.slane %v9191_v18, 5  ;;  %v6782_v27 = vld [vmem:[%s9136_s0 + $0x88] sm:$0xf] }
  0xb4   :  { %9317 = vst [vmem:[#allocation32_spill] sm:$0xff] %v6735_v30  ;;  %v6741_v60 = vadd.f32 %v1256_v55, %v765_v12  ;;  %v767_v61 = vpop.f32.mrf.mxu0  ;;  %v6743_v59 = vpop.f32.mrf.mxu1  ;;  %v393_v12 = vrot.slane %v9185_v2, 5  ;;  %v399_v55 = vrot.slane %v9186_v1, 5  ;;  %v5922_v1 = vld [vmem:[%s9136_s0 + $0x6c] sm:$0xff]  ;;  %v9200_v53 = vshll.u32 %v6782_v27, 16 }
  0xb5   :  { %9321 = vst [vmem:[#allocation36_spill] sm:$0xff] %v6782_v27  ;;  %v9201_v58 = vshrl.u32 %v6782_v27, 16 }
  0xb6   :  { %v394_v13 = vor.u32 %v393_v12, %v390_v36  ;;  %v404_v47 = vor.u32 %v403_v20, %v399_v55 }
  0xb8   :  { %v395_v17 = vrot.slane %v394_v13, 4  ;;  %v405_v4 = vrot.slane %v404_v47, 4 }
  0xba   :  { %v410_v18 = vsel %vm6394_vm2, %v405_v4, %v409_v23  ;;  %v427_v4 = vrot.slane %v9201_v58, 4  ;;  %v6809_v23 = vld [vmem:[%s9136_s0 + $0x8c] sm:$0x3] }
  0xbb   :  { %v6762_v22 = vpop.f32.mrf.mxu2  ;;  %v1258_v41 = vpop.f32.mrf.mxu3  ;;  %9323 = vst [vmem:[#allocation38_spill] sm:$0xff] %v6809_v23  ;;  %v9210_v25 = vshll.u32 %v6809_v23, 16 }
  0xbc   :  { %9319 = vst [vmem:[#allocation34_spill] sm:$0xff] %v6762_v22  ;;  %v6764_v63 = vadd.f32 %v1258_v41, %v767_v61  ;;  %v770_v2 = vpop.f32.mrf.mxu0  ;;  %v6766_v37 = vpop.f32.mrf.mxu1  ;;  %v6777_v61 = vld [vmem:[%s9136_s0 + $0x84] sm:$0xf] }
  0xbd   :  { %9320 = vst [vmem:[#allocation35_spill] sm:$0xff] %v6777_v61  ;;  %v9198_v47 = vshrl.u32 %v6777_v61, 16  ;;  %v9199_v20 = vshll.u32 %v6777_v61, 16  ;;  %v5301_v61 = vld [vmem:[#allocation2 + $0x3c] sm:$0xf0] }
  0xbf   :  { %809 = vmatmul.bf16.gmra.mxu0 %v605_v54  ;;  %898 = vmatmul.bf16.gmra.mxu1 %v605_v54  ;;  %v414_v26 = vrot.slane %v9198_v47, 4 }
  0xc0   :  { %987 = vmatmul.bf16.gmra.mxu2 %v605_v54  ;;  %1300 = vmatmul.bf16.gmra.mxu3 %v5922_v1  ;;  %v400_v1 = vsel %vm6394_vm2, %v395_v17, %v399_v55  ;;  %v585_v55 = vunpack.c.l.b16 %v410_v18 }
  0xc1   :  { %v584_v17 = vunpack.c.l.b16 %v400_v1 }
  0xc3   :  { %v6784_v36 = vpop.f32.mrf.mxu2  ;;  %v1261_v12 = vpop.f32.mrf.mxu3  ;;  %v606_v18 = vpack.c.b16 %v585_v55, %v584_v17  ;;  %v6824_v17 = vld [vmem:[%s9136_s0 + $0x90] sm:$0xf]  ;;  %v433_v55 = vrot.slane %v9210_v25, 5  ;;  %v5935_v25 = vld [vmem:[#allocation2 + $0x34] sm:$0xf] }
  0xc4   :  { %9322 = vst [vmem:[#allocation37_spill] sm:$0xff] %v6784_v36  ;;  %v6790_v41 = vadd.f32 %v1261_v12, %v770_v2  ;;  %v772_v54 = vpop.f32.mrf.mxu0  ;;  %v6792_v13 = vpop.f32.mrf.mxu1  ;;  %v417_v2 = vrot.slane %v9199_v20, 5  ;;  %v423_v12 = vrot.slane %v9200_v53, 5  ;;  %v5923_v53 = vld [vmem:[%s9136_s0 + $0x78] sm:$0xff]  ;;  %v9328_v23 = vshll.u32 %v6824_v17, 16 }
  0xc5   :  { %9325 = vst [vmem:[#allocation40_spill] sm:$0xff] %v6824_v17 }
  0xc6   :  { %v418_v1 = vor.u32 %v417_v2, %v414_v26  ;;  %v428_v58 = vor.u32 %v427_v4, %v423_v12  ;;  %v6829_v26 = vld [vmem:[%s9136_s0 + $0x94] sm:$0xf]  ;;  %v5423_v2 = vld [vmem:[#allocation2 + $0x1c8] sm:$0xf] }
  0xc7   :  { %9326 = vst [vmem:[#allocation41_spill] sm:$0xff] %v6829_v26  ;;  %v5987_v4 = vld [vmem:[#allocation2 + $0x1d0] sm:$0xf0] }
  0xc8   :  { %v419_v27 = vrot.slane %v418_v1, 4  ;;  %v9214_v1 = vshrl.u32 %v6824_v17, 16 }
  0xca   :  { %v438_v5 = vrot.slane %v9214_v1, 4 }
  0xcb   :  { %v6811_v51 = vpop.f32.mrf.mxu2  ;;  %v1263_v52 = vpop.f32.mrf.mxu3 }
  0xcc   :  { %9324 = vst [vmem:[#allocation39_spill] sm:$0xff] %v6811_v51  ;;  %v6813_v47 = vadd.f32 %v1263_v52, %v772_v54  ;;  %v775_v20 = vpop.f32.mrf.mxu0  ;;  %v6815_v32 = vpop.f32.mrf.mxu1  ;;  %v429_v54 = vrot.slane %v428_v58, 4  ;;  %v5424_v52 = vor.u32 %v5987_v4, %v5423_v2  ;;  %v424_v2 = vsel %vm6394_vm2, %v419_v27, %v423_v12  ;;  %v6858_v12 = vld [vmem:[%s9136_s0 + $0x98] sm:$0x3] }
  0xcd   :  { %v5304_v51 = vor.u32 %v5935_v25, %v5301_v61  ;;  %v586_v22 = vunpack.c.l.b16 %v424_v2  ;;  %9331 = vst [vmem:[#allocation43_spill] sm:$0xff] %v6858_v12  ;;  %v5924_v2 = vld [vmem:[%s9136_s0 + $0x84] sm:$0xff] }
  0xce   :  { %1874 = vmatpush.bf16.msrb.mxu2 %v5424_v52  ;;  %v434_v4 = vsel %vm6394_vm2, %v429_v54, %v433_v55  ;;  %v441_v52 = vrot.slane %v9328_v23, 5  ;;  %v9219_v54 = vshll.u32 %v6858_v12, 16 }
  0xcf   :  { %814 = vmatmul.bf16.gmra.mxu0 %v606_v18  ;;  %903 = vmatmul.bf16.gmra.mxu1 %v606_v18  ;;  %v587_v27 = vunpack.c.l.b16 %v434_v4 }
  0xd0   :  { %992 = vmatmul.bf16.gmra.mxu2 %v606_v18  ;;  %1305 = vmatmul.bf16.gmra.mxu3 %v5923_v53  ;;  %v442_v25 = vor.u32 %v441_v52, %v438_v5  ;;  %v6875_v5 = vld [vmem:[%s9136_s0 + $0x9c] sm:$0xf] }
  0xd1   :  { %1341 = vmatpush.bf16.msrb.mxu0 %v5304_v51  ;;  %v607_v1 = vpack.c.b16 %v587_v27, %v586_v22  ;;  %9333 = vst [vmem:[#allocation45_spill] sm:$0xff] %v6875_v5  ;;  %v6880_v22 = vld [vmem:[%s9136_s0 + $0xa0] sm:$0xf]  ;;  %v9222_v27 = vshrl.u32 %v6875_v5, 16 }
  0xd2   :  { %v443_v4 = vrot.slane %v442_v25, 4  ;;  %9334 = vst [vmem:[#allocation46_spill] sm:$0xff] %v6880_v22  ;;  %v9223_v25 = vshll.u32 %v6875_v5, 16 }
  0xd3   :  { %v6837_v36 = vpop.f32.mrf.mxu2  ;;  %v1266_v45 = vpop.f32.mrf.mxu3 }
  0xd4   :  { %9327 = vst [vmem:[#allocation42_spill] sm:$0xff] %v6837_v36  ;;  %v6839_v53 = vadd.f32 %v1266_v45, %v775_v20  ;;  %v777_v58 = vpop.f32.mrf.mxu0  ;;  %v6841_v18 = vpop.f32.mrf.mxu1  ;;  %v9329_v45 = vshll.u32 %v6829_v26, 16  ;;  %v9330_v36 = vshrl.u32 %v6829_v26, 16  ;;  %v465_v42 = vrot.slane %v9223_v25, 5 }
  0xd6   :  { %v447_v20 = vrot.slane %v9329_v45, 5  ;;  %v451_v39 = vrot.slane %v9330_v36, 4 }
  0xd8   :  { %v452_v61 = vor.u32 %v451_v39, %v447_v20  ;;  %v457_v39 = vrot.slane %v9219_v54, 5  ;;  %v448_v51 = vsel %vm6394_vm2, %v443_v4, %v447_v20  ;;  %v5307_v20 = vld [vmem:[#allocation2 + $0x38] sm:$0xf]  ;;  %v5937_v4 = vld [vmem:[#allocation2 + $0x40] sm:$0xf0] }
  0xda   :  { %v453_v17 = vrot.slane %v452_v61, 4  ;;  %v9226_v61 = vshll.u32 %v6880_v22, 16 }
  0xdb   :  { %v6861_v55 = vpop.f32.mrf.mxu2  ;;  %v1268_v23 = vpop.f32.mrf.mxu3 }
  0xdc   :  { %9332 = vst [vmem:[#allocation44_spill] sm:$0xff] %v6861_v55  ;;  %v6863_v45 = vadd.f32 %v1268_v23, %v777_v58  ;;  %v780_v26 = vpop.f32.mrf.mxu0  ;;  %v6865_v36 = vpop.f32.mrf.mxu1  ;;  %v458_v58 = vsel %vm6394_vm2, %v453_v17, %v457_v39  ;;  %v9229_v23 = vshrl.u32 %v6880_v22, 16  ;;  %v5308_v55 = vor.u32 %v5937_v4, %v5307_v20  ;;  %v5473_v22 = vld [vmem:[#allocation2 + $0x234] sm:$0xf0] }
  0xdd   :  { %v588_v17 = vunpack.c.l.b16 %v448_v51  ;;  %v589_v39 = vunpack.c.l.b16 %v458_v58  ;;  %v471_v30 = vrot.slane %v9226_v61, 5 }
  0xde   :  { %1430 = vmatpush.bf16.msrb.mxu1 %v5308_v55  ;;  %v5925_v55 = vld [vmem:[%s9136_s0 + $0x90] sm:$0xff] }
  0xdf   :  { %819 = vmatmul.bf16.gmra.mxu0 %v607_v1  ;;  %908 = vmatmul.bf16.gmra.mxu1 %v607_v1  ;;  %v608_v20 = vpack.c.b16 %v589_v39, %v588_v17  ;;  %v6929_v17 = vld [vmem:[%s9136_s0 + $0xac] sm:$0xf]  ;;  %v5411_v39 = vld [vmem:[#allocation2 + $0x1b0] sm:$0xf] }
  0xe0   :  { %997 = vmatmul.bf16.gmra.mxu2 %v607_v1  ;;  %1310 = vmatmul.bf16.gmra.mxu3 %v5924_v2  ;;  %9339 = vst [vmem:[#allocation51_spill] sm:$0xff] %v6929_v17 }
  0xe3   :  { %v6886_v52 = vpop.f32.mrf.mxu2  ;;  %v1271_v1 = vpop.f32.mrf.mxu3 }
  0xe4   :  { %9335 = vst [vmem:[#allocation47_spill] sm:$0xff] %v6886_v52  ;;  %v6892_v2 = vadd.f32 %v1271_v1, %v780_v26  ;;  %v782_v54 = vpop.f32.mrf.mxu0  ;;  %v6894_v12 = vpop.f32.mrf.mxu1  ;;  %v462_v52 = vrot.slane %v9222_v27, 4  ;;  %v475_v26 = vrot.slane %v9229_v23, 4  ;;  %v6907_v1 = vld [vmem:[%s9136_s0 + $0xa4] sm:$0x3] }
  0xe5   :  { %9336 = vst [vmem:[#allocation48_spill] sm:$0xff] %v6907_v1  ;;  %v9234_v25 = vshll.u32 %v6907_v1, 16  ;;  %v5998_v23 = vld [vmem:[#allocation2 + $0x22c] sm:$0xf] }
  0xe6   :  { %v466_v4 = vor.u32 %v465_v42, %v462_v52  ;;  %v476_v27 = vor.u32 %v475_v26, %v471_v30  ;;  %v5476_v52 = vor.u32 %v5998_v23, %v5473_v22  ;;  %v5984_v26 = vld [vmem:[#allocation2 + $0x1b8] sm:$0xf0] }
  0xe7   :  { %v481_v42 = vrot.slane %v9234_v25, 5  ;;  %v5461_v25 = vld [vmem:[#allocation2 + $0x21c] sm:$0xf0]  ;;  %v5992_v22 = vld [vmem:[#allocation2 + $0x1fc] sm:$0xf] }
  0xe8   :  { %v477_v0 = vrot.slane %v476_v27, 4  ;;  %1959 = vmatpush.bf16.msrb.mxu3 %v5476_v52  ;;  %v5932_v27 = vld [vmem:[#allocation2 + $0x1c] sm:$0xf] }
  0xeb   :  { %v6909_v51 = vpop.f32.mrf.mxu2  ;;  %v1273_v58 = vpop.f32.mrf.mxu3 }
  0xec   :  { %9337 = vst [vmem:[#allocation49_spill] sm:$0xff] %v6909_v51  ;;  %v6912_v5 = vadd.f32 %v1273_v58, %v782_v54  ;;  %v785_v61 = vpop.f32.mrf.mxu0  ;;  %v6914_v40 = vpop.f32.mrf.mxu1  ;;  %v467_v51 = vrot.slane %v466_v4, 4  ;;  %v6924_v54 = vld [vmem:[%s9136_s0 + $0xa8] sm:$0xf]  ;;  %v5412_v58 = vor.u32 %v5984_v26, %v5411_v39  ;;  %v5995_v4 = vld [vmem:[#allocation2 + $0x214] sm:$0xf]  ;;  %v482_v26 = vsel %vm6394_vm2, %v477_v0, %v481_v42 }
  0xed   :  { %9338 = vst [vmem:[#allocation50_spill] sm:$0xff] %v6924_v54  ;;  %v9344_v0 = vshrl.u32 %v6929_v17, 16 }
  0xee   :  { %1875 = vmatpush.bf16.msrb.mxu2 %v5412_v58  ;;  %v472_v52 = vsel %vm6394_vm2, %v467_v51, %v471_v30  ;;  %v9343_v30 = vshll.u32 %v6929_v17, 16 }
  0xef   :  { %824 = vmatmul.bf16.gmra.mxu0 %v608_v20  ;;  %913 = vmatmul.bf16.gmra.mxu1 %v608_v20  ;;  %v590_v58 = vunpack.c.l.b16 %v472_v52  ;;  %v499_v42 = vrot.slane %v9344_v0, 4 }
  0xf0   :  { %1002 = vmatmul.bf16.gmra.mxu2 %v608_v20  ;;  %1315 = vmatmul.bf16.gmra.mxu3 %v5925_v55  ;;  %v5464_v55 = vor.u32 %v5995_v4, %v5461_v25  ;;  %v5452_v20 = vor.u32 %v5992_v22, %v5449_v3  ;;  %v591_v25 = vunpack.c.l.b16 %v482_v26  ;;  %v9342_v4 = vshll.u32 %v6924_v54, 16  ;;  %v5989_v3 = vld [vmem:[#allocation2 + $0x1e4] sm:$0xf] }
  0xf1   :  { %v495_v51 = vrot.slane %v9343_v30, 5  ;;  %v5926_v30 = vld [vmem:[%s9136_s0 + $0x9c] sm:$0xff] }
  0xf2   :  { %1960 = vmatpush.bf16.msrb.mxu3 %v5464_v55  ;;  %v489_v34 = vrot.slane %v9342_v4, 5  ;;  %v609_v55 = vpack.c.b16 %v591_v25, %v590_v58 }
  0xf3   :  { %v6932_v1 = vpop.f32.mrf.mxu2  ;;  %v1276_v46 = vpop.f32.mrf.mxu3  ;;  %v500_v17 = vor.u32 %v499_v42, %v495_v51 }
  0xf4   :  { %9340 = vst [vmem:[#allocation52_spill] sm:$0xff] %v6932_v1  ;;  %v6937_v31 = vadd.f32 %v1276_v46, %v785_v61  ;;  %v787_v50 = vpop.f32.mrf.mxu0  ;;  %v6939_v39 = vpop.f32.mrf.mxu1  ;;  %v5289_v1 = vld [vmem:[#allocation2 + $0x24] sm:$0xf0]  ;;  %v9341_v46 = vshrl.u32 %v6924_v54, 16  ;;  %v5986_v54 = vld [vmem:[#allocation2 + $0x1cc] sm:$0xf] }
  0xf5   :  { %v5292_v23 = vor.u32 %v5932_v27, %v5289_v1  ;;  %v6956_v1 = vld [vmem:[%s9136_s0 + $0xb0] sm:$0x3]  ;;  %v5428_v58 = vor.u32 %v5986_v54, %v5425_v7 }
  0xf6   :  { %v486_v61 = vrot.slane %v9341_v46, 4  ;;  %9345 = vst [vmem:[#allocation53_spill] sm:$0xff] %v6956_v1  ;;  %1961 = vmatpush.bf16.msrb.mxu3 %v5452_v20  ;;  %v5437_v27 = vld [vmem:[#allocation2 + $0x1ec] sm:$0xf0]  ;;  %v9250_v20 = vshll.u32 %v6956_v1, 16 }
  0xf7   :  { %1342 = vmatpush.bf16.msrb.mxu0 %v5292_v23  ;;  %v5440_v52 = vor.u32 %v5989_v3, %v5437_v27  ;;  %v501_v3 = vrot.slane %v500_v17, 4  ;;  %v5983_v27 = vld [vmem:[#allocation2 + $0x1b4] sm:$0xf]  ;;  %v5981_v17 = vld [vmem:[#allocation2 + $0x1a0] sm:$0xf0] }
  0xf8   :  { %v490_v0 = vor.u32 %v489_v34, %v486_v61  ;;  %v505_v34 = vrot.slane %v9250_v20, 5  ;;  %v6978_v61 = vld [vmem:[%s9136_s0 + $0xb8] sm:$0xf] }
  0xf9   :  { %9348 = vst [vmem:[#allocation56_spill] sm:$0xff] %v6978_v61 }
  0xfa   :  { %1962 = vmatpush.bf16.msrb.mxu3 %v5440_v52  ;;  %v491_v25 = vrot.slane %v490_v0, 4  ;;  %v506_v42 = vsel %vm6394_vm2, %v501_v3, %v505_v34 }
  0xfb   :  { %v6958_v22 = vpop.f32.mrf.mxu2  ;;  %v1278_v23 = vpop.f32.mrf.mxu3 }
  0xfc   :  { %9346 = vst [vmem:[#allocation54_spill] sm:$0xff] %v6958_v22  ;;  %v6960_v26 = vadd.f32 %v1278_v23, %v787_v50  ;;  %v790_v46 = vpop.f32.mrf.mxu0  ;;  %v6962_v4 = vpop.f32.mrf.mxu1  ;;  %v6971_v50 = vld [vmem:[%s9136_s0 + $0xb4] sm:$0xf]  ;;  %v5413_v23 = vld [vmem:[#allocation2 + $0x1bc] sm:$0xf0] }
  0xfd   :  { %9347 = vst [vmem:[#allocation55_spill] sm:$0xff] %v6971_v50  ;;  %v5934_v22 = vld [vmem:[#allocation2 + $0x28] sm:$0xf0]  ;;  %v9352_v34 = vshll.u32 %v6971_v50, 16 }
  0xfe   :  { %1963 = vmatpush.bf16.msrb.mxu3 %v5428_v58  ;;  %v496_v58 = vsel %vm6394_vm2, %v491_v25, %v495_v51  ;;  %v593_v51 = vunpack.c.l.b16 %v506_v42  ;;  %v9351_v25 = vshrl.u32 %v6971_v50, 16  ;;  %v5283_v42 = vld [vmem:[#allocation2 + $0x8] sm:$0xf]  ;;  %v5387_v50 = vld [vmem:[#allocation2 + $0x180] sm:$0xf] }
  0xff   :  { %829 = vmatmul.bf16.gmra.mxu0 %v609_v55  ;;  %918 = vmatmul.bf16.gmra.mxu1 %v609_v55  ;;  %v513_v16 = vrot.slane %v9352_v34, 5  ;;  %v5388_v48 = vor.u32 %v5978_v8, %v5387_v50 }
 0x100   :  { %1007 = vmatmul.bf16.gmra.mxu2 %v609_v55  ;;  %1320 = vmatmul.bf16.gmra.mxu3 %v5926_v30  ;;  %v5416_v30 = vor.u32 %v5983_v27, %v5413_v23  ;;  %v5401_v55 = vld [vmem:[#allocation2 + $0x1a4] sm:$0xf0]  ;;  %v5400_v27 = vor.u32 %v5981_v17, %v5399_v14  ;;  %v510_v3 = vrot.slane %v9351_v25, 4  ;;  %v5277_v14 = vld [vmem:[#allocation2 + $0xc] sm:$0xf0] }
 0x101   :  { %v5404_v23 = vor.u32 %v5980_v19, %v5401_v55  ;;  %v5929_v19 = vld [vmem:[#allocation2 + $0x4] sm:$0xf] }
 0x102   :  { %1964 = vmatpush.bf16.msrb.mxu3 %v5416_v30  ;;  %v9354_v30 = vshrl.u32 %v6978_v61, 16  ;;  %1876 = vmatpush.bf16.msrb.mxu2 %v5400_v27  ;;  %v514_v25 = vor.u32 %v513_v16, %v510_v3  ;;  %v5280_v34 = vor.u32 %v5929_v19, %v5277_v14  ;;  %v5927_v27 = vld [vmem:[%s9136_s0 + $0xa8] sm:$0xff] }
 0x103   :  { %v6981_v52 = vpop.f32.mrf.mxu2  ;;  %v1281_v7 = vpop.f32.mrf.mxu3 }
 0x104   :  { %9349 = vst [vmem:[#allocation57_spill] sm:$0xff] %v6981_v52  ;;  %v6986_v0 = vadd.f32 %v1281_v7, %v790_v46  ;;  %v792_v20 = vpop.f32.mrf.mxu0  ;;  %v6988_v1 = vpop.f32.mrf.mxu1  ;;  %v5295_v52 = vld [vmem:[#allocation2 + $0x20] sm:$0xf]  ;;  %v6997_v46 = vld [vmem:[%s9136_s0 + $0xbc] sm:$0x3]  ;;  %v592_v7 = vunpack.c.l.b16 %v496_v58  ;;  %v523_v62 = vrot.slane %v9354_v30, 4  ;;  %1343 = vmatpush.bf16.msrb.mxu0 %v5280_v34 }
 0x105   :  { %v5296_v54 = vor.u32 %v5934_v22, %v5295_v52  ;;  %9350 = vst [vmem:[#allocation58_spill] sm:$0xff] %v6997_v46  ;;  %v9353_v22 = vshll.u32 %v6978_v61, 16 }
 0x106   :  { %1965 = vmatpush.bf16.msrb.mxu3 %v5404_v23  ;;  %v610_v58 = vpack.c.b16 %v593_v51, %v592_v7  ;;  %1877 = vmatpush.bf16.msrb.mxu2 %v5388_v48  ;;  %v9356_v51 = vshll.u32 %v6997_v46, 16 }
 0x107   :  { %1431 = vmatpush.bf16.msrb.mxu1 %v5296_v54  ;;  %v519_v52 = vrot.slane %v9353_v22, 5  ;;  %v5931_v54 = vld [vmem:[#allocation2 + $0x10] sm:$0xf0] }
 0x108   :  { %v5284_v9 = vor.u32 %v5931_v54, %v5283_v42  ;;  %v529_v3 = vrot.slane %v9356_v51, 5  ;;  %v5928_v54 = vld [vmem:[%s9136_s0 + $0xb4] sm:$0xff] }
 0x109   :  { %v524_v23 = vor.u32 %v523_v62, %v519_v52  ;;  %v6176_v51 = vld [vmem:[%s9136_s0 + $0xb4] sm:$0xff] }
 0x10b   :  { %v7008_v17 = vpop.f32.mrf.mxu2  ;;  %v1283_v55 = vpop.f32.mrf.mxu3  ;;  %1432 = vmatpush.bf16.msrb.mxu1 %v5284_v9  ;;  %v525_v7 = vrot.slane %v524_v23, 4 }
 0x10c   :  { %9355 = vst [vmem:[#allocation59_spill] sm:$0xff] %v7008_v17  ;;  %v7010_v22 = vadd.f32 %v1283_v55, %v792_v20  ;;  %v795_v61 = vpop.f32.mrf.mxu0  ;;  %v7012_v30 = vpop.f32.mrf.mxu1  ;;  %v5977_v17 = vld [vmem:[#allocation2 + $0x184] sm:$0xf]  ;;  %v515_v20 = vrot.slane %v514_v25, 4 }
 0x10d   :  { %v5392_v16 = vor.u32 %v5977_v17, %v5389_v29  ;;  %v530_v48 = vsel %vm6394_vm2, %v525_v7, %v529_v3 }
 0x10e   :  { %v520_v29 = vsel %vm6394_vm2, %v515_v20, %v519_v52  ;;  %v595_v42 = vunpack.c.l.b16 %v530_v48  ;;  %v1535_v52 = vrot.slane %v6113_v49, 5  ;;  %v7047_v20 = vld [vmem:[%s9136_s0 + $0x8] sm:$0x3]  ;;  %vm4520_vm2 = vcmask 1047559  }
 0x10f   :  { %834 = vmatmul.bf16.gmra.mxu0 %v610_v58  ;;  %923 = vmatmul.bf16.gmra.mxu1 %v610_v58  ;;  %v594_v9 = vunpack.c.l.b16 %v520_v29  ;;  %v1538_v7 = vrot.slane %v7047_v20, 5 }
 0x110   :  { %1012 = vmatmul.bf16.gmra.mxu2 %v610_v58  ;;  %1325 = vmatmul.bf16.gmra.mxu3 %v5927_v27  ;;  %v6114_v27 = vld [vmem:[%s9136_s0] sm:$0xf] }
 0x111   :  { %1966 = vmatpush.bf16.msrb.mxu3 %v5392_v16  ;;  %v611_v58 = vpack.c.b16 %v595_v42, %v594_v9  ;;  %v5369_v23 = vrot.slane %v6114_v27, 9  ;;  %v1537_v16 = vrot.slane %v1535_v52, 4 }
 0x113   :  { %v7019_v19 = vpop.f32.mrf.mxu2  ;;  %v1286_v62 = vpop.f32.mrf.mxu3  ;;  %v1536_v9 = vsel %vm7050_vm5, %v5369_v23, %v1535_v52  ;;  %v1539_v42 = vsel %vm7050_vm5, %v1537_v16, %v1538_v7  ;;  %v6117_v23 = vld [vmem:[%s9136_s0] sm:$0xff]  ;;  %v6118_v16 = vld [vmem:[%s9136_s0 + $0xc] sm:$0xf] }
 0x114   :  { %9357 = vst [vmem:[#allocation60_spill] sm:$0xff] %v7019_v19  ;;  %v7021_v8 = vadd.f32 %v1286_v62, %v795_v61  ;;  %v797_v50 = vpop.f32.mrf.mxu0  ;;  %v7023_v14 = vpop.f32.mrf.mxu1  ;;  %v5370_v7 = vrot.slane %v6118_v16, 9  ;;  %v6000_v19 = vld [vmem:[#allocation2 + $0x238] sm:$0xf0] }
 0x11b   :  { %v7029_v17 = vpop.f32.mrf.mxu2  ;;  %v1288_v55 = vpop.f32.mrf.mxu3 }
 0x11c   :  { %9358 = vst [vmem:[#allocation61_spill] sm:$0xff] %v7029_v17  ;;  %v7031_v25 = vadd.f32 %v1288_v55, %v797_v50  ;;  %v800_v34 = vpop.f32.mrf.mxu0  ;;  %v7033_v61 = vpop.f32.mrf.mxu1  ;;  %v1678_v55 = vunpack.c.l.b16 %v1536_v9  ;;  %v6119_v9 = vld [vmem:[%s9136_s0 + $0x14] sm:$0x3] }
 0x11f   :  { %839 = vmatmul.bf16.gmra.mxu0 %v611_v58  ;;  %928 = vmatmul.bf16.gmra.mxu1 %v611_v58 }
 0x120   :  { %1017 = vmatmul.bf16.gmra.mxu2 %v611_v58  ;;  %1330 = vmatmul.bf16.gmra.mxu3 %v5928_v54  ;;  %v1679_v58 = vunpack.c.l.b16 %v1539_v42  ;;  %v1545_v42 = vrot.slane %v6119_v9, 5 }
 0x123   :  { %v7054_v3 = vpop.f32.mrf.mxu2  ;;  %v1291_v62 = vpop.f32.mrf.mxu3 }
 0x124   :  { %9361 = vst [vmem:[#allocation62_spill] sm:$0xff] %v7054_v3  ;;  %v7056_v50 = vadd.f32 %v1291_v62, %v800_v34  ;;  %v802_v29 = vpop.f32.mrf.mxu0  ;;  %v7058_v48 = vpop.f32.mrf.mxu1  ;;  %v7070_v34 = vpack.c.b16 %v1679_v58, %v1678_v55  ;;  %v6116_v62 = vld [vmem:[%s9136_s0 + $0x10] sm:$0xf] }
 0x125   :  { %v1542_v52 = vrot.slane %v6116_v62, 5 }
 0x127   :  { %v1543_v46 = vsel %vm7050_vm5, %v5370_v7, %v1542_v52 }
 0x128   :  { %v1680_v6 = vunpack.c.l.b16 %v1543_v46 }
 0x12b   :  { %v7064_v54 = vpop.f32.mrf.mxu2  ;;  %v1293_v49 = vpop.f32.mrf.mxu3 }
 0x12c   :  { %9362 = vst [vmem:[#allocation63_spill] sm:$0xff] %v7064_v54  ;;  %v7066_v27 = vadd.f32 %v1293_v49, %v802_v29  ;;  %v805_v3 = vpop.f32.mrf.mxu0  ;;  %v7068_v17 = vpop.f32.mrf.mxu1  ;;  %v1544_v29 = vrot.slane %v1542_v52, 4  ;;  %v5479_v54 = vld [vmem:[#allocation2 + $0x230] sm:$0xf]  ;;  %v6120_v52 = vld [vmem:[%s9136_s0 + $0x1c] sm:$0xf] }
 0x12d   :  { %v5480_v28 = vor.u32 %v6000_v19, %v5479_v54  ;;  %v1549_v7 = vrot.slane %v6120_v52, 5  ;;  %v6123_v54 = vld [vmem:[%s9136_s0 + $0x20] sm:$0x3]  ;;  %v5567_v52 = vld [vmem:[#allocation2 + $0x2e8] sm:$0xf] }
 0x12e   :  { %v1546_v16 = vsel %vm7050_vm5, %v1544_v29, %v1545_v42  ;;  %v1552_v29 = vrot.slane %v6123_v54, 5 }
 0x12f   :  { %1344 = vmatmul.bf16.vlgmr.msrb.gmra.mxu0 %v6117_v23  ;;  %1433 = vmatmul.bf16.vlgmr.msrb.gmra.mxu1 %v6117_v23  ;;  %v1681_v9 = vunpack.c.l.b16 %v1546_v16  ;;  %v1551_v19 = vrot.slane %v1549_v7, 4 }
 0x130   :  { %1878 = vmatmul.bf16.vlgmr.msrb.gmra.mxu2 %v7070_v34  ;;  %1967 = vmatmul.bf16.vlgmr.msrb.gmra.mxu3 %v7070_v34 }
 0x131   :  { %2048 = vmatpush.bf16.msra.mxu0 %v5480_v28  ;;  %v7102_v35 = vpack.c.b16 %v1681_v9, %v1680_v6  ;;  %v6121_v28 = vld [vmem:[%s9136_s0 + $0xc] sm:$0xff]  ;;  %v6122_v6 = vld [vmem:[%s9136_s0 + $0x18] sm:$0xf] }
 0x132   :  { %v5371_v46 = vrot.slane %v6122_v6, 9  ;;  %v1553_v6 = vsel %vm7050_vm5, %v1551_v19, %v1552_v29  ;;  %v5569_v19 = vld [vmem:[#allocation2 + $0x2f4] sm:$0xf0] }
 0x133   :  { %v7086_v55 = vpop.f32.mrf.mxu2  ;;  %v1296_v58 = vpop.f32.mrf.mxu3  ;;  %9368 = vst [vmem:[#allocation69_spill] sm:$0xff] %v7102_v35  ;;  %v1683_v54 = vunpack.c.l.b16 %v1553_v6 }
 0x134   :  { %9363 = vst [vmem:[#allocation64_spill] sm:$0xff] %v7086_v55  ;;  %v7088_v49 = vadd.f32 %v1296_v58, %v805_v3  ;;  %v807_v62 = vpop.f32.mrf.mxu0  ;;  %v7090_v23 = vpop.f32.mrf.mxu1 }
 0x135   :  { %9364 = vst [vmem:[#allocation65_spill] sm:$0xff] %v7090_v23 }
 0x13b   :  { %v7096_v44 = vpop.f32.mrf.mxu2  ;;  %v1298_v55 = vpop.f32.mrf.mxu3 }
 0x13c   :  { %9365 = vst [vmem:[#allocation66_spill] sm:$0xff] %v7096_v44  ;;  %v7098_v3 = vadd.f32 %v1298_v55, %v807_v62  ;;  %v810_v58 = vpop.f32.mrf.mxu0  ;;  %v7100_v43 = vpop.f32.mrf.mxu1  ;;  %v1550_v44 = vsel %vm7050_vm5, %v5371_v46, %v1549_v7  ;;  %v6124_v7 = vld [vmem:[%s9136_s0 + $0x28] sm:$0xf] }
 0x13d   :  { %9367 = vst [vmem:[#allocation68_spill] sm:$0xff] %v7100_v43  ;;  %v1556_v46 = vrot.slane %v6124_v7, 5 }
 0x13e   :  { %9366 = vst [vmem:[#allocation67_spill] sm:$0xff] %v7098_v3 }
 0x13f   :  { %1349 = vmatmul.bf16.gmra.mxu0 %v6121_v28  ;;  %1438 = vmatmul.bf16.gmra.mxu1 %v6121_v28  ;;  %v6023_v28 = vld [vmem:[#allocation2 + $0x2f0] sm:$0xf0] }
 0x140   :  { %1883 = vmatmul.bf16.gmra.mxu2 %v7102_v35  ;;  %1972 = vmatmul.bf16.gmra.mxu3 %v7102_v35  ;;  %v5568_v43 = vor.u32 %v6023_v28, %v5567_v52  ;;  %v1682_v35 = vunpack.c.l.b16 %v1550_v44  ;;  %v6022_v44 = vld [vmem:[#allocation2 + $0x2ec] sm:$0xf] }
 0x141   :  { %v5572_v28 = vor.u32 %v6022_v44, %v5569_v19 }
 0x142   :  { %2701 = vmatpush.bf16.msra.mxu1 %v5568_v43  ;;  %v6125_v43 = vld [vmem:[%s9136_s0 + $0x18] sm:$0xff] }
 0x143   :  { %v7118_v42 = vpop.f32.mrf.mxu2  ;;  %v1301_v55 = vpop.f32.mrf.mxu3  ;;  %2790 = vmatpush.bf16.msra.mxu2 %v5572_v28 }
 0x144   :  { %9369 = vst [vmem:[#allocation70_spill] sm:$0xff] %v7118_v42  ;;  %v7120_v62 = vadd.f32 %v1301_v55, %v810_v58  ;;  %v812_v16 = vpop.f32.mrf.mxu0  ;;  %v7122_v9 = vpop.f32.mrf.mxu1 }
 0x145   :  { %9371 = vst [vmem:[#allocation72_spill] sm:$0xff] %v7122_v9  ;;  %v7134_v9 = vpack.c.b16 %v1683_v54, %v1682_v35  ;;  %v6126_v35 = vld [vmem:[%s9136_s0 + $0x24] sm:$0xf] }
 0x146   :  { %9370 = vst [vmem:[#allocation71_spill] sm:$0xff] %v7120_v62  ;;  %v5372_v29 = vrot.slane %v6126_v35, 9 }
 0x147   :  { %9375 = vst [vmem:[#allocation76_spill] sm:$0xff] %v7134_v9 }
 0x148   :  { %v1557_v35 = vsel %vm7050_vm5, %v5372_v29, %v1556_v46 }
 0x149   :  { %v1684_v44 = vunpack.c.l.b16 %v1557_v35 }
 0x14b   :  { %v7128_v3 = vpop.f32.mrf.mxu2  ;;  %v1303_v42 = vpop.f32.mrf.mxu3 }
 0x14c   :  { %9372 = vst [vmem:[#allocation73_spill] sm:$0xff] %v7128_v3  ;;  %v7130_v58 = vadd.f32 %v1303_v42, %v812_v16  ;;  %v815_v55 = vpop.f32.mrf.mxu0  ;;  %v7132_v62 = vpop.f32.mrf.mxu1  ;;  %v1558_v42 = vrot.slane %v1556_v46, 4  ;;  %v6127_v16 = vld [vmem:[%s9136_s0 + $0x2c] sm:$0x3]  ;;  %v6128_v46 = vld [vmem:[%s9136_s0 + $0x34] sm:$0xf] }
 0x14d   :  { %9374 = vst [vmem:[#allocation75_spill] sm:$0xff] %v7132_v62  ;;  %v1559_v52 = vrot.slane %v6127_v16, 5  ;;  %v5467_v62 = vld [vmem:[#allocation2 + $0x218] sm:$0xf]  ;;  %v1563_v29 = vrot.slane %v6128_v46, 5 }
 0x14e   :  { %9373 = vst [vmem:[#allocation74_spill] sm:$0xff] %v7130_v58  ;;  %v5555_v46 = vld [vmem:[#allocation2 + $0x2d0] sm:$0xf] }
 0x14f   :  { %1354 = vmatmul.bf16.gmra.mxu0 %v6125_v43  ;;  %1443 = vmatmul.bf16.gmra.mxu1 %v6125_v43  ;;  %v1560_v58 = vsel %vm7050_vm5, %v1558_v42, %v1559_v52  ;;  %v6131_v42 = vld [vmem:[%s9136_s0 + $0x38] sm:$0x3] }
 0x150   :  { %1888 = vmatmul.bf16.gmra.mxu2 %v7134_v9  ;;  %1977 = vmatmul.bf16.gmra.mxu3 %v7134_v9  ;;  %v5997_v9 = vld [vmem:[#allocation2 + $0x220] sm:$0xf0]  ;;  %v1685_v19 = vunpack.c.l.b16 %v1560_v58  ;;  %v1565_v58 = vrot.slane %v1563_v29, 4  ;;  %v1566_v52 = vrot.slane %v6131_v42, 5 }
 0x151   :  { %v5468_v23 = vor.u32 %v5997_v9, %v5467_v62  ;;  %v6130_v62 = vld [vmem:[%s9136_s0 + $0x30] sm:$0xf] }
 0x152   :  { %v5373_v9 = vrot.slane %v6130_v62, 9  ;;  %v1567_v62 = vsel %vm7050_vm5, %v1565_v58, %v1566_v52  ;;  %v5557_v58 = vld [vmem:[#allocation2 + $0x2dc] sm:$0xf0] }
 0x153   :  { %v7150_v6 = vpop.f32.mrf.mxu2  ;;  %v1306_v54 = vpop.f32.mrf.mxu3  ;;  %2049 = vmatpush.bf16.msra.mxu0 %v5468_v23  ;;  %v6129_v23 = vld [vmem:[%s9136_s0 + $0x24] sm:$0xff]  ;;  %v1687_v42 = vunpack.c.l.b16 %v1567_v62 }
 0x154   :  { %9376 = vst [vmem:[#allocation77_spill] sm:$0xff] %v7150_v6  ;;  %v7152_v7 = vadd.f32 %v1306_v54, %v815_v55  ;;  %v817_v43 = vpop.f32.mrf.mxu0  ;;  %v7154_v3 = vpop.f32.mrf.mxu1 }
 0x155   :  { %9378 = vst [vmem:[#allocation79_spill] sm:$0xff] %v7154_v3  ;;  %v7166_v3 = vpack.c.b16 %v1685_v19, %v1684_v44 }
 0x156   :  { %9377 = vst [vmem:[#allocation78_spill] sm:$0xff] %v7152_v7 }
 0x157   :  { %9382 = vst [vmem:[#allocation83_spill] sm:$0xff] %v7166_v3 }
 0x15b   :  { %v7160_v16 = vpop.f32.mrf.mxu2  ;;  %v1308_v28 = vpop.f32.mrf.mxu3 }
 0x15c   :  { %9379 = vst [vmem:[#allocation80_spill] sm:$0xff] %v7160_v16  ;;  %v7162_v55 = vadd.f32 %v1308_v28, %v817_v43  ;;  %v820_v54 = vpop.f32.mrf.mxu0  ;;  %v7164_v6 = vpop.f32.mrf.mxu1  ;;  %v1564_v16 = vsel %vm7050_vm5, %v5373_v9, %v1563_v29  ;;  %v6132_v29 = vld [vmem:[%s9136_s0 + $0x40] sm:$0xf] }
 0x15d   :  { %9381 = vst [vmem:[#allocation82_spill] sm:$0xff] %v7164_v6  ;;  %v1570_v9 = vrot.slane %v6132_v29, 5 }
 0x15e   :  { %9380 = vst [vmem:[#allocation81_spill] sm:$0xff] %v7162_v55 }
 0x15f   :  { %1359 = vmatmul.bf16.gmra.mxu0 %v6129_v23  ;;  %1448 = vmatmul.bf16.gmra.mxu1 %v6129_v23  ;;  %v6020_v23 = vld [vmem:[#allocation2 + $0x2d8] sm:$0xf0] }
 0x160   :  { %1893 = vmatmul.bf16.gmra.mxu2 %v7166_v3  ;;  %1982 = vmatmul.bf16.gmra.mxu3 %v7166_v3  ;;  %v5556_v6 = vor.u32 %v6020_v23, %v5555_v46  ;;  %v1686_v3 = vunpack.c.l.b16 %v1564_v16  ;;  %v6019_v16 = vld [vmem:[#allocation2 + $0x2d4] sm:$0xf] }
 0x161   :  { %v5560_v23 = vor.u32 %v6019_v16, %v5557_v58 }
 0x162   :  { %2702 = vmatpush.bf16.msra.mxu1 %v5556_v6  ;;  %v6133_v6 = vld [vmem:[%s9136_s0 + $0x30] sm:$0xff] }
 0x163   :  { %v7182_v43 = vpop.f32.mrf.mxu2  ;;  %v1311_v35 = vpop.f32.mrf.mxu3  ;;  %2791 = vmatpush.bf16.msra.mxu2 %v5560_v23 }
 0x164   :  { %9383 = vst [vmem:[#allocation84_spill] sm:$0xff] %v7182_v43  ;;  %v7184_v44 = vadd.f32 %v1311_v35, %v820_v54  ;;  %v822_v19 = vpop.f32.mrf.mxu0  ;;  %v7186_v28 = vpop.f32.mrf.mxu1 }
 0x165   :  { %9385 = vst [vmem:[#allocation86_spill] sm:$0xff] %v7186_v28  ;;  %v7198_v28 = vpack.c.b16 %v1687_v42, %v1686_v3  ;;  %v6134_v3 = vld [vmem:[%s9136_s0 + $0x3c] sm:$0xf] }
 0x166   :  { %9384 = vst [vmem:[#allocation85_spill] sm:$0xff] %v7184_v44  ;;  %v5374_v52 = vrot.slane %v6134_v3, 9 }
 0x167   :  { %9389 = vst [vmem:[#allocation90_spill] sm:$0xff] %v7198_v28 }
 0x168   :  { %v1571_v3 = vsel %vm7050_vm5, %v5374_v52, %v1570_v9 }
 0x169   :  { %v1688_v16 = vunpack.c.l.b16 %v1571_v3 }
 0x16b   :  { %v7192_v55 = vpop.f32.mrf.mxu2  ;;  %v1313_v43 = vpop.f32.mrf.mxu3 }
 0x16c   :  { %9386 = vst [vmem:[#allocation87_spill] sm:$0xff] %v7192_v55  ;;  %v7194_v54 = vadd.f32 %v1313_v43, %v822_v19  ;;  %v825_v35 = vpop.f32.mrf.mxu0  ;;  %v7196_v44 = vpop.f32.mrf.mxu1  ;;  %v1572_v43 = vrot.slane %v1570_v9, 4  ;;  %v6135_v19 = vld [vmem:[%s9136_s0 + $0x44] sm:$0x3]  ;;  %v6136_v9 = vld [vmem:[%s9136_s0 + $0x4c] sm:$0xf] }
 0x16d   :  { %9388 = vst [vmem:[#allocation89_spill] sm:$0xff] %v7196_v44  ;;  %v1573_v46 = vrot.slane %v6135_v19, 5  ;;  %v5455_v44 = vld [vmem:[#allocation2 + $0x200] sm:$0xf]  ;;  %v1577_v52 = vrot.slane %v6136_v9, 5 }
 0x16e   :  { %9387 = vst [vmem:[#allocation88_spill] sm:$0xff] %v7194_v54  ;;  %v5543_v9 = vld [vmem:[#allocation2 + $0x2b8] sm:$0xf] }
 0x16f   :  { %1364 = vmatmul.bf16.gmra.mxu0 %v6133_v6  ;;  %1453 = vmatmul.bf16.gmra.mxu1 %v6133_v6  ;;  %v1574_v54 = vsel %vm7050_vm5, %v1572_v43, %v1573_v46  ;;  %v6139_v43 = vld [vmem:[%s9136_s0 + $0x50] sm:$0x3] }
 0x170   :  { %1898 = vmatmul.bf16.gmra.mxu2 %v7198_v28  ;;  %1987 = vmatmul.bf16.gmra.mxu3 %v7198_v28  ;;  %v5994_v28 = vld [vmem:[#allocation2 + $0x208] sm:$0xf0]  ;;  %v1689_v58 = vunpack.c.l.b16 %v1574_v54  ;;  %v1579_v54 = vrot.slane %v1577_v52, 4  ;;  %v1580_v46 = vrot.slane %v6139_v43, 5 }
 0x171   :  { %v5456_v7 = vor.u32 %v5994_v28, %v5455_v44  ;;  %v6138_v44 = vld [vmem:[%s9136_s0 + $0x48] sm:$0xf] }
 0x172   :  { %v5375_v28 = vrot.slane %v6138_v44, 9  ;;  %v1581_v44 = vsel %vm7050_vm5, %v1579_v54, %v1580_v46  ;;  %v5545_v54 = vld [vmem:[#allocation2 + $0x2c4] sm:$0xf0] }
 0x173   :  { %v7214_v62 = vpop.f32.mrf.mxu2  ;;  %v1316_v42 = vpop.f32.mrf.mxu3  ;;  %2050 = vmatpush.bf16.msra.mxu0 %v5456_v7  ;;  %v6137_v7 = vld [vmem:[%s9136_s0 + $0x3c] sm:$0xff]  ;;  %v1691_v43 = vunpack.c.l.b16 %v1581_v44 }
 0x174   :  { %9390 = vst [vmem:[#allocation91_spill] sm:$0xff] %v7214_v62  ;;  %v7216_v29 = vadd.f32 %v1316_v42, %v825_v35  ;;  %v827_v6 = vpop.f32.mrf.mxu0  ;;  %v7218_v55 = vpop.f32.mrf.mxu1 }
 0x175   :  { %9392 = vst [vmem:[#allocation93_spill] sm:$0xff] %v7218_v55  ;;  %v7230_v55 = vpack.c.b16 %v1689_v58, %v1688_v16 }
 0x176   :  { %9391 = vst [vmem:[#allocation92_spill] sm:$0xff] %v7216_v29 }
 0x177   :  { %9396 = vst [vmem:[#allocation97_spill] sm:$0xff] %v7230_v55 }
 0x17b   :  { %v7224_v19 = vpop.f32.mrf.mxu2  ;;  %v1318_v23 = vpop.f32.mrf.mxu3 }
 0x17c   :  { %9393 = vst [vmem:[#allocation94_spill] sm:$0xff] %v7224_v19  ;;  %v7226_v35 = vadd.f32 %v1318_v23, %v827_v6  ;;  %v830_v42 = vpop.f32.mrf.mxu0  ;;  %v7228_v62 = vpop.f32.mrf.mxu1  ;;  %v1578_v19 = vsel %vm7050_vm5, %v5375_v28, %v1577_v52  ;;  %v6140_v52 = vld [vmem:[%s9136_s0 + $0x58] sm:$0xf] }
 0x17d   :  { %9395 = vst [vmem:[#allocation96_spill] sm:$0xff] %v7228_v62  ;;  %v1584_v28 = vrot.slane %v6140_v52, 5 }
 0x17e   :  { %9394 = vst [vmem:[#allocation95_spill] sm:$0xff] %v7226_v35 }
 0x17f   :  { %1369 = vmatmul.bf16.gmra.mxu0 %v6137_v7  ;;  %1458 = vmatmul.bf16.gmra.mxu1 %v6137_v7  ;;  %v6017_v7 = vld [vmem:[#allocation2 + $0x2c0] sm:$0xf0] }
 0x180   :  { %1903 = vmatmul.bf16.gmra.mxu2 %v7230_v55  ;;  %1992 = vmatmul.bf16.gmra.mxu3 %v7230_v55  ;;  %v5544_v62 = vor.u32 %v6017_v7, %v5543_v9  ;;  %v1690_v55 = vunpack.c.l.b16 %v1578_v19  ;;  %v6016_v19 = vld [vmem:[#allocation2 + $0x2bc] sm:$0xf] }
 0x181   :  { %v5548_v7 = vor.u32 %v6016_v19, %v5545_v54 }
 0x182   :  { %2703 = vmatpush.bf16.msra.mxu1 %v5544_v62  ;;  %v6141_v62 = vld [vmem:[%s9136_s0 + $0x48] sm:$0xff] }
 0x183   :  { %v7246_v6 = vpop.f32.mrf.mxu2  ;;  %v1321_v3 = vpop.f32.mrf.mxu3  ;;  %2792 = vmatpush.bf16.msra.mxu2 %v5548_v7 }
 0x184   :  { %9397 = vst [vmem:[#allocation98_spill] sm:$0xff] %v7246_v6  ;;  %v7248_v16 = vadd.f32 %v1321_v3, %v830_v42  ;;  %v832_v58 = vpop.f32.mrf.mxu0  ;;  %v7250_v23 = vpop.f32.mrf.mxu1 }
 0x185   :  { %9399 = vst [vmem:[#allocation100_spill] sm:$0xff] %v7250_v23  ;;  %v7262_v23 = vpack.c.b16 %v1691_v43, %v1690_v55  ;;  %v6142_v55 = vld [vmem:[%s9136_s0 + $0x54] sm:$0xf] }
 0x186   :  { %9398 = vst [vmem:[#allocation99_spill] sm:$0xff] %v7248_v16  ;;  %v5376_v46 = vrot.slane %v6142_v55, 9 }
 0x187   :  { %9403 = vst [vmem:[#allocation104_spill] sm:$0xff] %v7262_v23 }
 0x18b   :  { %v7256_v35 = vpop.f32.mrf.mxu2  ;;  %v1323_v6 = vpop.f32.mrf.mxu3 }
 0x18c   :  { %9400 = vst [vmem:[#allocation101_spill] sm:$0xff] %v7256_v35  ;;  %v7258_v42 = vadd.f32 %v1323_v6, %v832_v58  ;;  %v835_v3 = vpop.f32.mrf.mxu0  ;;  %v7260_v16 = vpop.f32.mrf.mxu1  ;;  %v1586_v6 = vrot.slane %v1584_v28, 4  ;;  %v6143_v58 = vld [vmem:[%s9136_s0 + $0x5c] sm:$0x3] }
 0x18d   :  { %9402 = vst [vmem:[#allocation103_spill] sm:$0xff] %v7260_v16  ;;  %v1587_v9 = vrot.slane %v6143_v58, 5  ;;  %v1585_v16 = vsel %vm7050_vm5, %v5376_v46, %v1584_v28  ;;  %v6144_v28 = vld [vmem:[%s9136_s0 + $0x64] sm:$0xf] }
 0x18e   :  { %9401 = vst [vmem:[#allocation102_spill] sm:$0xff] %v7258_v42  ;;  %v5991_v42 = vld [vmem:[#allocation2 + $0x1f0] sm:$0xf0]  ;;  %v1692_v58 = vunpack.c.l.b16 %v1585_v16  ;;  %v1591_v46 = vrot.slane %v6144_v28, 5 }
 0x18f   :  { %1374 = vmatmul.bf16.gmra.mxu0 %v6141_v62  ;;  %1463 = vmatmul.bf16.gmra.mxu1 %v6141_v62  ;;  %v1588_v55 = vsel %vm7050_vm5, %v1586_v6, %v1587_v9  ;;  %v6145_v16 = vld [vmem:[%s9136_s0 + $0x54] sm:$0xff]  ;;  %v6147_v6 = vld [vmem:[%s9136_s0 + $0x68] sm:$0x3] }
 0x190   :  { %1908 = vmatmul.bf16.gmra.mxu2 %v7262_v23  ;;  %1997 = vmatmul.bf16.gmra.mxu3 %v7262_v23  ;;  %v5443_v23 = vld [vmem:[#allocation2 + $0x1e8] sm:$0xf]  ;;  %v1693_v19 = vunpack.c.l.b16 %v1588_v55  ;;  %v1594_v9 = vrot.slane %v6147_v6, 5 }
 0x191   :  { %v5444_v29 = vor.u32 %v5991_v42, %v5443_v23  ;;  %v1593_v42 = vrot.slane %v1591_v46, 4 }
 0x193   :  { %v7278_v44 = vpop.f32.mrf.mxu2  ;;  %v1326_v43 = vpop.f32.mrf.mxu3  ;;  %2051 = vmatpush.bf16.msra.mxu0 %v5444_v29  ;;  %v6146_v29 = vld [vmem:[%s9136_s0 + $0x60] sm:$0xf] }
 0x194   :  { %9404 = vst [vmem:[#allocation105_spill] sm:$0xff] %v7278_v44  ;;  %v7280_v52 = vadd.f32 %v1326_v43, %v835_v3  ;;  %v837_v62 = vpop.f32.mrf.mxu0  ;;  %v7282_v35 = vpop.f32.mrf.mxu1  ;;  %v5377_v23 = vrot.slane %v6146_v29, 9  ;;  %v5531_v29 = vld [vmem:[#allocation2 + $0x2a0] sm:$0xf] }
 0x195   :  { %9405 = vst [vmem:[#allocation106_spill] sm:$0xff] %v7282_v35  ;;  %v7294_v35 = vpack.c.b16 %v1693_v19, %v1692_v58 }
 0x196   :  { %v1592_v28 = vsel %vm7050_vm5, %v5377_v23, %v1591_v46  ;;  %v6148_v46 = vld [vmem:[%s9136_s0 + $0x70] sm:$0xf] }
 0x197   :  { %9409 = vst [vmem:[#allocation110_spill] sm:$0xff] %v7294_v35  ;;  %v1598_v23 = vrot.slane %v6148_v46, 5 }
 0x19b   :  { %v7288_v54 = vpop.f32.mrf.mxu2  ;;  %v1328_v7 = vpop.f32.mrf.mxu3 }
 0x19c   :  { %9406 = vst [vmem:[#allocation107_spill] sm:$0xff] %v7288_v54  ;;  %v7290_v3 = vadd.f32 %v1328_v7, %v837_v62  ;;  %v840_v43 = vpop.f32.mrf.mxu0  ;;  %v7292_v44 = vpop.f32.mrf.mxu1  ;;  %v6014_v54 = vld [vmem:[#allocation2 + $0x2a8] sm:$0xf0] }
 0x19d   :  { %9408 = vst [vmem:[#allocation109_spill] sm:$0xff] %v7292_v44  ;;  %v5532_v44 = vor.u32 %v6014_v54, %v5531_v29  ;;  %v6149_v54 = vld [vmem:[%s9136_s0 + $0x60] sm:$0xff] }
 0x19e   :  { %9407 = vst [vmem:[#allocation108_spill] sm:$0xff] %v7290_v3 }
 0x19f   :  { %1379 = vmatmul.bf16.gmra.mxu0 %v6145_v16  ;;  %1468 = vmatmul.bf16.gmra.mxu1 %v6145_v16  ;;  %v1595_v16 = vsel %vm7050_vm5, %v1593_v42, %v1594_v9  ;;  %v5533_v42 = vld [vmem:[#allocation2 + $0x2ac] sm:$0xf0]  ;;  %v1600_v9 = vrot.slane %v1598_v23, 4 }
 0x1a0   :  { %1913 = vmatmul.bf16.gmra.mxu2 %v7294_v35  ;;  %2002 = vmatmul.bf16.gmra.mxu3 %v7294_v35  ;;  %v1694_v35 = vunpack.c.l.b16 %v1592_v28  ;;  %v1695_v3 = vunpack.c.l.b16 %v1595_v16 }
 0x1a1   :  { %2704 = vmatpush.bf16.msra.mxu1 %v5532_v44  ;;  %v6013_v44 = vld [vmem:[#allocation2 + $0x2a4] sm:$0xf] }
 0x1a2   :  { %v5536_v28 = vor.u32 %v6013_v44, %v5533_v42  ;;  %v5431_v44 = vld [vmem:[#allocation2 + $0x1d0] sm:$0xf]  ;;  %v5988_v42 = vld [vmem:[#allocation2 + $0x1d8] sm:$0xf0] }
 0x1a3   :  { %v7310_v62 = vpop.f32.mrf.mxu2  ;;  %v1331_v55 = vpop.f32.mrf.mxu3 }
 0x1a4   :  { %9410 = vst [vmem:[#allocation111_spill] sm:$0xff] %v7310_v62  ;;  %v7312_v58 = vadd.f32 %v1331_v55, %v840_v43  ;;  %v842_v19 = vpop.f32.mrf.mxu0  ;;  %v7314_v7 = vpop.f32.mrf.mxu1  ;;  %2793 = vmatpush.bf16.msra.mxu2 %v5536_v28 }
 0x1a5   :  { %9412 = vst [vmem:[#allocation113_spill] sm:$0xff] %v7314_v7  ;;  %v7326_v7 = vpack.c.b16 %v1695_v3, %v1694_v35  ;;  %v6150_v35 = vld [vmem:[%s9136_s0 + $0x6c] sm:$0xf] }
 0x1a6   :  { %9411 = vst [vmem:[#allocation112_spill] sm:$0xff] %v7312_v58  ;;  %v5378_v3 = vrot.slane %v6150_v35, 9 }
 0x1a7   :  { %9416 = vst [vmem:[#allocation117_spill] sm:$0xff] %v7326_v7 }
 0x1a8   :  { %v1599_v35 = vsel %vm7050_vm5, %v5378_v3, %v1598_v23 }
 0x1ab   :  { %v7320_v6 = vpop.f32.mrf.mxu2  ;;  %v1333_v62 = vpop.f32.mrf.mxu3 }
 0x1ac   :  { %9413 = vst [vmem:[#allocation114_spill] sm:$0xff] %v7320_v6  ;;  %v7322_v43 = vadd.f32 %v1333_v62, %v842_v19  ;;  %v1345_v55 = vpop.f32.mrf.mxu0  ;;  %v7324_v58 = vpop.f32.mrf.mxu1  ;;  %v6151_v62 = vld [vmem:[%s9136_s0 + $0x74] sm:$0x3] }
 0x1ad   :  { %9415 = vst [vmem:[#allocation116_spill] sm:$0xff] %v7324_v58  ;;  %v1601_v19 = vrot.slane %v6151_v62, 5  ;;  %v1346_v16 = vadd.f32 %v1345_v55, %v6718_v11  ;;  %v5432_v11 = vor.u32 %v5988_v42, %v5431_v44  ;;  %v1696_v55 = vunpack.c.l.b16 %v1599_v35  ;;  %v6155_v35 = vld [vmem:[%s9136_s0 + $0x80] sm:$0x3] }
 0x1ae   :  { %9414 = vst [vmem:[#allocation115_spill] sm:$0xff] %v7322_v43 }
 0x1af   :  { %1384 = vmatmul.bf16.gmra.mxu0 %v6149_v54  ;;  %1473 = vmatmul.bf16.gmra.mxu1 %v6149_v54  ;;  %v1602_v62 = vsel %vm7050_vm5, %v1600_v9, %v1601_v19  ;;  %v6152_v9 = vld [vmem:[%s9136_s0 + $0x7c] sm:$0xf] }
 0x1b0   :  { %1918 = vmatmul.bf16.gmra.mxu2 %v7326_v7  ;;  %2007 = vmatmul.bf16.gmra.mxu3 %v7326_v7  ;;  %v1697_v58 = vunpack.c.l.b16 %v1602_v62  ;;  %v1605_v19 = vrot.slane %v6152_v9, 5  ;;  %v1608_v62 = vrot.slane %v6155_v35, 5  ;;  %v6011_v35 = vld [vmem:[#allocation2 + $0x290] sm:$0xf0] }
 0x1b1   :  { %2052 = vmatpush.bf16.msra.mxu0 %v5432_v11 }
 0x1b2   :  { %v7362_v3 = vpack.c.b16 %v1697_v58, %v1696_v55 }
 0x1b3   :  { %v1879_v29 = vpop.f32.mrf.mxu2  ;;  %v1968_v46 = vpop.f32.mrf.mxu3 }
 0x1b4   :  { %v7344_v54 = vadd.f32 %v1879_v29, %v6741_v60  ;;  %v7346_v6 = vadd.f32 %v1968_v46, %v1346_v16  ;;  %v1347_v7 = vpop.f32.mrf.mxu0  ;;  %v7348_v43 = vpop.f32.mrf.mxu1  ;;  %9418 = vst [vmem:[#allocation119_spill] sm:$0xff] %v7362_v3 }
 0x1b5   :  { %v1348_v60 = vadd.f32 %v1347_v7, %v6743_v59  ;;  %v6153_v59 = vld [vmem:[%s9136_s0 + $0x6c] sm:$0xff]  ;;  %v1607_v7 = vrot.slane %v1605_v19, 4 }
 0x1b6   :  { %9417 = vst [vmem:[#allocation118_spill] sm:$0xff] %v7346_v6 }
 0x1bb   :  { %v1881_v28 = vpop.f32.mrf.mxu2  ;;  %v1970_v16 = vpop.f32.mrf.mxu3 }
 0x1bc   :  { %v7356_v29 = vadd.f32 %v1881_v28, %v6764_v63  ;;  %v7358_v46 = vadd.f32 %v1970_v16, %v1348_v60  ;;  %v1350_v6 = vpop.f32.mrf.mxu0  ;;  %v7360_v23 = vpop.f32.mrf.mxu1  ;;  %v6154_v63 = vld [vmem:[%s9136_s0 + $0x78] sm:$0xf] }
 0x1bd   :  { %v5379_v58 = vrot.slane %v6154_v63, 9  ;;  %v1351_v44 = vadd.f32 %v1350_v6, %v6766_v37  ;;  %v5519_v63 = vld [vmem:[#allocation2 + $0x288] sm:$0xf] }
 0x1bf   :  { %1389 = vmatmul.bf16.gmra.mxu0 %v6153_v59  ;;  %1478 = vmatmul.bf16.gmra.mxu1 %v6153_v59  ;;  %v1606_v9 = vsel %vm7050_vm5, %v5379_v58, %v1605_v19  ;;  %v1609_v59 = vsel %vm7050_vm5, %v1607_v7, %v1608_v62  ;;  %v6156_v7 = vld [vmem:[%s9136_s0 + $0x88] sm:$0xf] }
 0x1c0   :  { %1923 = vmatmul.bf16.gmra.mxu2 %v7362_v3  ;;  %2012 = vmatmul.bf16.gmra.mxu3 %v7362_v3  ;;  %v5520_v3 = vor.u32 %v6011_v35, %v5519_v63  ;;  %v1698_v37 = vunpack.c.l.b16 %v1606_v9  ;;  %v1699_v6 = vunpack.c.l.b16 %v1609_v59  ;;  %v1612_v62 = vrot.slane %v6156_v7, 5  ;;  %v6159_v63 = vld [vmem:[%s9136_s0 + $0x8c] sm:$0x3] }
 0x1c1   :  { %v1615_v35 = vrot.slane %v6159_v63, 5 }
 0x1c2   :  { %2705 = vmatpush.bf16.msra.mxu1 %v5520_v3  ;;  %v7398_v58 = vpack.c.b16 %v1699_v6, %v1698_v37  ;;  %v5521_v3 = vld [vmem:[#allocation2 + $0x294] sm:$0xf0]  ;;  %v1614_v59 = vrot.slane %v1612_v62, 4 }
 0x1c3   :  { %v1884_v42 = vpop.f32.mrf.mxu2  ;;  %v1973_v11 = vpop.f32.mrf.mxu3 }
 0x1c4   :  { %v7380_v55 = vadd.f32 %v1884_v42, %v6790_v41  ;;  %v7382_v60 = vadd.f32 %v1973_v11, %v1351_v44  ;;  %v1352_v28 = vpop.f32.mrf.mxu0  ;;  %v7384_v16 = vpop.f32.mrf.mxu1  ;;  %9422 = vst [vmem:[#allocation123_spill] sm:$0xff] %v7398_v58  ;;  %v1616_v63 = vsel %vm7050_vm5, %v1614_v59, %v1615_v35  ;;  %v6160_v59 = vld [vmem:[%s9136_s0 + $0x94] sm:$0xf] }
 0x1c5   :  { %9420 = vst [vmem:[#allocation121_spill] sm:$0xff] %v7384_v16  ;;  %v1353_v41 = vadd.f32 %v1352_v28, %v6792_v13  ;;  %v6157_v13 = vld [vmem:[%s9136_s0 + $0x78] sm:$0xff]  ;;  %v6158_v28 = vld [vmem:[%s9136_s0 + $0x84] sm:$0xf]  ;;  %v1619_v35 = vrot.slane %v6160_v59, 5 }
 0x1c6   :  { %9419 = vst [vmem:[#allocation120_spill] sm:$0xff] %v7382_v60  ;;  %v5380_v9 = vrot.slane %v6158_v28, 9 }
 0x1c8   :  { %v1613_v28 = vsel %vm7050_vm5, %v5380_v9, %v1612_v62 }
 0x1cb   :  { %v1886_v42 = vpop.f32.mrf.mxu2  ;;  %v1975_v44 = vpop.f32.mrf.mxu3 }
 0x1cc   :  { %v7392_v11 = vadd.f32 %v1886_v42, %v6813_v47  ;;  %v7394_v60 = vadd.f32 %v1975_v44, %v1353_v41  ;;  %v1355_v16 = vpop.f32.mrf.mxu0  ;;  %v7396_v19 = vpop.f32.mrf.mxu1  ;;  %v6010_v47 = vld [vmem:[#allocation2 + $0x28c] sm:$0xf] }
 0x1cd   :  { %v5524_v37 = vor.u32 %v6010_v47, %v5521_v3  ;;  %v1356_v6 = vadd.f32 %v1355_v16, %v6815_v32  ;;  %v5419_v47 = vld [vmem:[#allocation2 + $0x1b8] sm:$0xf]  ;;  %v5985_v3 = vld [vmem:[#allocation2 + $0x1c0] sm:$0xf0]  ;;  %v1700_v16 = vunpack.c.l.b16 %v1613_v28 }
 0x1ce   :  { %9421 = vst [vmem:[#allocation122_spill] sm:$0xff] %v7394_v60  ;;  %v5420_v32 = vor.u32 %v5985_v3, %v5419_v47  ;;  %v1701_v60 = vunpack.c.l.b16 %v1616_v63  ;;  %v6163_v28 = vld [vmem:[%s9136_s0 + $0x98] sm:$0x3] }
 0x1cf   :  { %1394 = vmatmul.bf16.gmra.mxu0 %v6157_v13  ;;  %1483 = vmatmul.bf16.gmra.mxu1 %v6157_v13  ;;  %v1622_v63 = vrot.slane %v6163_v28, 5  ;;  %v6008_v28 = vld [vmem:[#allocation2 + $0x278] sm:$0xf0] }
 0x1d0   :  { %1928 = vmatmul.bf16.gmra.mxu2 %v7398_v58  ;;  %2017 = vmatmul.bf16.gmra.mxu3 %v7398_v58  ;;  %v7434_v9 = vpack.c.b16 %v1701_v60, %v1700_v16 }
 0x1d1   :  { %2794 = vmatpush.bf16.msra.mxu2 %v5524_v37  ;;  %2053 = vmatpush.bf16.msra.mxu0 %v5420_v32 }
 0x1d2   :  { %9424 = vst [vmem:[#allocation125_spill] sm:$0xff] %v7434_v9 }
 0x1d3   :  { %v1889_v41 = vpop.f32.mrf.mxu2  ;;  %v1978_v42 = vpop.f32.mrf.mxu3 }
 0x1d4   :  { %v7416_v44 = vadd.f32 %v1889_v41, %v6839_v53  ;;  %v7418_v7 = vadd.f32 %v1978_v42, %v1356_v6  ;;  %v1357_v13 = vpop.f32.mrf.mxu0  ;;  %v7420_v58 = vpop.f32.mrf.mxu1 }
 0x1d5   :  { %v1358_v53 = vadd.f32 %v1357_v13, %v6841_v18  ;;  %v6161_v18 = vld [vmem:[%s9136_s0 + $0x84] sm:$0xff]  ;;  %v1621_v13 = vrot.slane %v1619_v35, 4 }
 0x1d6   :  { %9423 = vst [vmem:[#allocation124_spill] sm:$0xff] %v7418_v7 }
 0x1db   :  { %v1891_v37 = vpop.f32.mrf.mxu2  ;;  %v1980_v6 = vpop.f32.mrf.mxu3 }
 0x1dc   :  { %v7428_v41 = vadd.f32 %v1891_v37, %v6863_v45  ;;  %v7430_v42 = vadd.f32 %v1980_v6, %v1358_v53  ;;  %v1360_v7 = vpop.f32.mrf.mxu0  ;;  %v7432_v62 = vpop.f32.mrf.mxu1  ;;  %v6162_v45 = vld [vmem:[%s9136_s0 + $0x90] sm:$0xf] }
 0x1dd   :  { %v5381_v60 = vrot.slane %v6162_v45, 9  ;;  %v1361_v47 = vadd.f32 %v1360_v7, %v6865_v36  ;;  %v5507_v45 = vld [vmem:[#allocation2 + $0x270] sm:$0xf] }
 0x1df   :  { %1399 = vmatmul.bf16.gmra.mxu0 %v6161_v18  ;;  %1488 = vmatmul.bf16.gmra.mxu1 %v6161_v18  ;;  %v1620_v59 = vsel %vm7050_vm5, %v5381_v60, %v1619_v35  ;;  %v1623_v18 = vsel %vm7050_vm5, %v1621_v13, %v1622_v63  ;;  %v6164_v13 = vld [vmem:[%s9136_s0 + $0xa0] sm:$0xf] }
 0x1e0   :  { %1933 = vmatmul.bf16.gmra.mxu2 %v7434_v9  ;;  %2022 = vmatmul.bf16.gmra.mxu3 %v7434_v9  ;;  %v5508_v9 = vor.u32 %v6008_v28, %v5507_v45  ;;  %v1702_v36 = vunpack.c.l.b16 %v1620_v59  ;;  %v1703_v7 = vunpack.c.l.b16 %v1623_v18  ;;  %v1626_v63 = vrot.slane %v6164_v13, 5  ;;  %v6024_v59 = vld [vmem:[#allocation2 + $0x2f8] sm:$0xf0]  ;;  %v5509_v18 = vld [vmem:[#allocation2 + $0x27c] sm:$0xf0] }
 0x1e1   :  { %v6166_v45 = vld [vmem:[%s9136_s0 + $0x9c] sm:$0xf]  ;;  %v5563_v13 = vld [vmem:[#allocation2 + $0x2d8] sm:$0xf] }
 0x1e2   :  { %2706 = vmatpush.bf16.msra.mxu1 %v5508_v9  ;;  %v7470_v60 = vpack.c.b16 %v1703_v7, %v1702_v36  ;;  %v5575_v9 = vld [vmem:[#allocation2 + $0x2f0] sm:$0xf]  ;;  %v5382_v28 = vrot.slane %v6166_v45, 9  ;;  %v1628_v36 = vrot.slane %v1626_v63, 4  ;;  %v6167_v7 = vld [vmem:[%s9136_s0 + $0xa4] sm:$0x3] }
 0x1e3   :  { %v1894_v3 = vpop.f32.mrf.mxu2  ;;  %v1983_v32 = vpop.f32.mrf.mxu3 }
 0x1e4   :  { %v7452_v16 = vadd.f32 %v1894_v3, %v6892_v2  ;;  %v7454_v53 = vadd.f32 %v1983_v32, %v1361_v47  ;;  %v1362_v37 = vpop.f32.mrf.mxu0  ;;  %v7456_v6 = vpop.f32.mrf.mxu1  ;;  %9430 = vst [vmem:[#allocation131_spill] sm:$0xff] %v7470_v60 }
 0x1e5   :  { %9426 = vst [vmem:[#allocation127_spill] sm:$0xff] %v7456_v6  ;;  %v1363_v2 = vadd.f32 %v1362_v37, %v6894_v12  ;;  %v6165_v12 = vld [vmem:[%s9136_s0 + $0x90] sm:$0xff] }
 0x1e6   :  { %9425 = vst [vmem:[#allocation126_spill] sm:$0xff] %v7454_v53  ;;  %v6007_v37 = vld [vmem:[#allocation2 + $0x274] sm:$0xf] }
 0x1eb   :  { %v1896_v3 = vpop.f32.mrf.mxu2  ;;  %v1985_v47 = vpop.f32.mrf.mxu3 }
 0x1ec   :  { %v7464_v32 = vadd.f32 %v1896_v3, %v6912_v5  ;;  %v7466_v53 = vadd.f32 %v1985_v47, %v1363_v2  ;;  %v1365_v6 = vpop.f32.mrf.mxu0  ;;  %v7468_v35 = vpop.f32.mrf.mxu1  ;;  %v5576_v5 = vor.u32 %v6024_v59, %v5575_v9  ;;  %v1629_v2 = vrot.slane %v6167_v7, 5  ;;  %v6021_v9 = vld [vmem:[#allocation2 + $0x2e0] sm:$0xf0] }
 0x1ed   :  { %9429 = vst [vmem:[#allocation130_spill] sm:$0xff] %v7468_v35  ;;  %v5512_v3 = vor.u32 %v6007_v37, %v5509_v18  ;;  %v1366_v47 = vadd.f32 %v1365_v6, %v6914_v40  ;;  %v1627_v37 = vsel %vm7050_vm5, %v5382_v28, %v1626_v63  ;;  %v5407_v6 = vld [vmem:[#allocation2 + $0x1a0] sm:$0xf] }
 0x1ee   :  { %9427 = vst [vmem:[#allocation128_spill] sm:$0xff] %v7464_v32  ;;  %2879 = vmatpush.bf16.msra.mxu3 %v5576_v5  ;;  %v1630_v40 = vsel %vm7050_vm5, %v1628_v36, %v1629_v2  ;;  %v5982_v5 = vld [vmem:[#allocation2 + $0x1a8] sm:$0xf0]  ;;  %v5551_v18 = vld [vmem:[#allocation2 + $0x2c0] sm:$0xf] }
 0x1ef   :  { %9428 = vst [vmem:[#allocation129_spill] sm:$0xff] %v7466_v53  ;;  %1404 = vmatmul.bf16.gmra.mxu0 %v6165_v12  ;;  %1493 = vmatmul.bf16.gmra.mxu1 %v6165_v12  ;;  %v5408_v7 = vor.u32 %v5982_v5, %v5407_v6 }
 0x1f0   :  { %1938 = vmatmul.bf16.gmra.mxu2 %v7470_v60  ;;  %2027 = vmatmul.bf16.gmra.mxu3 %v7470_v60  ;;  %v5564_v60 = vor.u32 %v6021_v9, %v5563_v13  ;;  %v1705_v9 = vunpack.c.l.b16 %v1630_v40  ;;  %v6012_v40 = vld [vmem:[#allocation2 + $0x298] sm:$0xf0] }
 0x1f1   :  { %2795 = vmatpush.bf16.msra.mxu2 %v5512_v3  ;;  %v6018_v3 = vld [vmem:[#allocation2 + $0x2c8] sm:$0xf0]  ;;  %2054 = vmatpush.bf16.msra.mxu0 %v5408_v7 }
 0x1f2   :  { %2880 = vmatpush.bf16.msra.mxu3 %v5564_v60  ;;  %v5552_v13 = vor.u32 %v6018_v3, %v5551_v18  ;;  %v2245_v18 = vshrl.u32 %v7047_v20, 16  ;;  %v6171_v20 = vld [vmem:[%s9136_s0 + $0xb0] sm:$0x3] }
 0x1f3   :  { %v1899_v59 = vpop.f32.mrf.mxu2  ;;  %v1988_v12 = vpop.f32.mrf.mxu3 }
 0x1f4   :  { %v7488_v53 = vadd.f32 %v1899_v59, %v6937_v31  ;;  %v7490_v45 = vadd.f32 %v1988_v12, %v1366_v47  ;;  %v1367_v35 = vpop.f32.mrf.mxu0  ;;  %v7492_v32 = vpop.f32.mrf.mxu1  ;;  %v1704_v31 = vunpack.c.l.b16 %v1627_v37  ;;  %v5539_v59 = vld [vmem:[#allocation2 + $0x2a8] sm:$0xf]  ;;  %v6015_v12 = vld [vmem:[#allocation2 + $0x2b0] sm:$0xf0]  ;;  %v6168_v37 = vld [vmem:[%s9136_s0 + $0xac] sm:$0xf] }
 0x1f5   :  { %v1368_v47 = vadd.f32 %v1367_v35, %v6939_v39  ;;  %v5540_v28 = vor.u32 %v6015_v12, %v5539_v59  ;;  %v1633_v39 = vrot.slane %v6168_v37, 5  ;;  %v5527_v35 = vld [vmem:[#allocation2 + $0x290] sm:$0xf]  ;;  %v5515_v12 = vld [vmem:[#allocation2 + $0x278] sm:$0xf] }
 0x1f6   :  { %9431 = vst [vmem:[#allocation132_spill] sm:$0xff] %v7490_v45  ;;  %2881 = vmatpush.bf16.msra.mxu3 %v5552_v13  ;;  %v7506_v5 = vpack.c.b16 %v1705_v9, %v1704_v31  ;;  %v5528_v3 = vor.u32 %v6012_v40, %v5527_v35  ;;  %v1636_v31 = vrot.slane %v6171_v20, 5  ;;  %v9435_v9 = vshrl.u32 %v6363_v21, 16 }
 0x1f7   :  { %v1635_v13 = vrot.slane %v1633_v39, 4  ;;  %v2247_v35 = vrot.slane %v2245_v18, 5  ;;  %v9437_v20 = vshll.u32 %v6371_v24, 16  ;;  %v5495_v18 = vld [vmem:[#allocation2 + $0x258] sm:$0xf] }
 0x1f8   :  { %9434 = vst [vmem:[#allocation135_spill] sm:$0xff] %v7506_v5  ;;  %v5503_v24 = vld [vmem:[#allocation2 + $0x260] sm:$0xf] }
 0x1fa   :  { %2882 = vmatpush.bf16.msra.mxu3 %v5540_v28  ;;  %v9436_v28 = vshll.u32 %v6363_v21, 16  ;;  %v1637_v21 = vsel %vm7050_vm5, %v1635_v13, %v1636_v31 }
 0x1fb   :  { %v1901_v45 = vpop.f32.mrf.mxu2  ;;  %v1990_v63 = vpop.f32.mrf.mxu3 }
 0x1fc   :  { %v7500_v36 = vadd.f32 %v1901_v45, %v6960_v26  ;;  %v7502_v60 = vadd.f32 %v1990_v63, %v1368_v47  ;;  %v1370_v2 = vpop.f32.mrf.mxu0  ;;  %v7504_v6 = vpop.f32.mrf.mxu1  ;;  %v6169_v26 = vld [vmem:[%s9136_s0 + $0x9c] sm:$0xff]  ;;  %v6170_v45 = vld [vmem:[%s9136_s0 + $0xa8] sm:$0xf]  ;;  %v2236_v47 = vrot.slane %v9435_v9, 5  ;;  %v6009_v63 = vld [vmem:[#allocation2 + $0x280] sm:$0xf0] }
 0x1fd   :  { %9433 = vst [vmem:[#allocation134_spill] sm:$0xff] %v7504_v6  ;;  %v5383_v7 = vrot.slane %v6170_v45, 9  ;;  %v1371_v59 = vadd.f32 %v1370_v2, %v6962_v4  ;;  %v2237_v37 = vrot.slane %v9436_v28, 6  ;;  %v6005_v28 = vld [vmem:[#allocation2 + $0x260] sm:$0xf0] }
 0x1fe   :  { %9432 = vst [vmem:[#allocation133_spill] sm:$0xff] %v7502_v60  ;;  %2883 = vmatpush.bf16.msra.mxu3 %v5528_v3  ;;  %v2248_v3 = vrot.slane %v9437_v20, 6  ;;  %v6004_v6 = vld [vmem:[#allocation2 + $0x25c] sm:$0xf]  ;;  %v1707_v20 = vunpack.c.l.b16 %v1637_v21 }
 0x1ff   :  { %1409 = vmatmul.bf16.gmra.mxu0 %v6169_v26  ;;  %1498 = vmatmul.bf16.gmra.mxu1 %v6169_v26  ;;  %v1634_v45 = vsel %vm7050_vm5, %v5383_v7, %v1633_v39  ;;  %v5496_v7 = vor.u32 %v6005_v28, %v5495_v18  ;;  %v5979_v18 = vld [vmem:[#allocation2 + $0x190] sm:$0xf0]  ;;  %v5483_v28 = vld [vmem:[#allocation2 + $0x240] sm:$0xf] }
 0x200   :  { %1943 = vmatmul.bf16.gmra.mxu2 %v7506_v5  ;;  %2032 = vmatmul.bf16.gmra.mxu3 %v7506_v5  ;;  %v5516_v5 = vor.u32 %v6009_v63, %v5515_v12  ;;  %v1706_v39 = vunpack.c.l.b16 %v1634_v45  ;;  %v5497_v12 = vld [vmem:[#allocation2 + $0x264] sm:$0xf0]  ;;  %v6006_v63 = vld [vmem:[#allocation2 + $0x268] sm:$0xf0]  ;;  %v2249_v13 = vor.u32 %v2248_v3, %v2247_v35 }
 0x201   :  { %2707 = vmatpush.bf16.msra.mxu1 %v5496_v7  ;;  %v5395_v45 = vld [vmem:[#allocation2 + $0x188] sm:$0xf]  ;;  %v5485_v7 = vld [vmem:[#allocation2 + $0x24c] sm:$0xf0] }
 0x202   :  { %2884 = vmatpush.bf16.msra.mxu3 %v5516_v5  ;;  %v2244_v5 = vrot.slane %v6401_v56, 4  ;;  %v7543_v21 = vpack.c.b16 %v1707_v20, %v1706_v39 }
 0x203   :  { %v1904_v40 = vpop.f32.mrf.mxu2  ;;  %v1993_v26 = vpop.f32.mrf.mxu3 }
 0x204   :  { %v7533_v60 = vadd.f32 %v1904_v40, %v6986_v0  ;;  %v7535_v9 = vadd.f32 %v1993_v26, %v1371_v59  ;;  %v1372_v4 = vpop.f32.mrf.mxu0  ;;  %v7537_v2 = vpop.f32.mrf.mxu1  ;;  %v5500_v0 = vor.u32 %v6004_v6, %v5497_v12  ;;  %v5504_v40 = vor.u32 %v6006_v63, %v5503_v24 }
 0x205   :  { %9439 = vst [vmem:[#allocation137_spill] sm:$0xff] %v7537_v2  ;;  %v2238_v59 = vor.u32 %v2237_v37, %v2236_v47  ;;  %v1373_v31 = vadd.f32 %v1372_v4, %v6988_v1  ;;  %v5396_v6 = vor.u32 %v5979_v18, %v5395_v45  ;;  %v6002_v47 = vld [vmem:[#allocation2 + $0x248] sm:$0xf0]  ;;  %v6001_v37 = vld [vmem:[#allocation2 + $0x244] sm:$0xf] }
 0x206   :  { %9438 = vst [vmem:[#allocation136_spill] sm:$0xff] %v7535_v9  ;;  %2796 = vmatpush.bf16.msra.mxu2 %v5500_v0  ;;  %2885 = vmatpush.bf16.msra.mxu3 %v5504_v40  ;;  %v5484_v1 = vor.u32 %v6002_v47, %v5483_v28  ;;  %v5488_v3 = vor.u32 %v6001_v37, %v5485_v7  ;;  %v5491_v4 = vld [vmem:[#allocation2 + $0x248] sm:$0xf]  ;;  %v6003_v0 = vld [vmem:[#allocation2 + $0x250] sm:$0xf0] }
 0x207   :  { %v2239_v26 = vrot.slane %v2238_v59, 4  ;;  %2055 = vmatpush.bf16.msra.mxu0 %v5396_v6  ;;  %v2250_v40 = vsel %vm7554_vm8, %v2244_v5, %v2249_v13  ;;  %v6175_v5 = vld [vmem:[%s9136_s0 + $0xbc] sm:$0x3] }
 0x208   :  { %2708 = vmatpush.bf16.msra.mxu1 %v5484_v1  ;;  %v2510_v45 = vunpack.c.l.b16 %v2250_v40  ;;  %v1643_v13 = vrot.slane %v6175_v5, 5 }
 0x209   :  { %v2243_v20 = vsel %vm7554_vm8, %v2239_v26, %v6401_v56  ;;  %v6174_v56 = vld [vmem:[%s9136_s0 + $0xb4] sm:$0xf] }
 0x20a   :  { %2797 = vmatpush.bf16.msra.mxu2 %v5488_v3  ;;  %v2509_v59 = vunpack.c.l.b16 %v2243_v20  ;;  %v5384_v26 = vrot.slane %v6174_v56, 9 }
 0x20b   :  { %v1906_v9 = vpop.f32.mrf.mxu2  ;;  %v1995_v2 = vpop.f32.mrf.mxu3 }
 0x20c   :  { %v7546_v12 = vadd.f32 %v1906_v9, %v7010_v22  ;;  %v7548_v24 = vadd.f32 %v1995_v2, %v1373_v31  ;;  %v1375_v63 = vpop.f32.mrf.mxu0  ;;  %v7550_v35 = vpop.f32.mrf.mxu1  ;;  %v6172_v22 = vld [vmem:[%s9136_s0 + $0xb8] sm:$0xf]  ;;  %v5492_v2 = vor.u32 %v6003_v0, %v5491_v4  ;;  %v6173_v31 = vld [vmem:[%s9136_s0 + $0xa8] sm:$0xff]  ;;  %v2541_v28 = vpack.c.b16 %v2510_v45, %v2509_v59 }
 0x20d   :  { %v1640_v9 = vrot.slane %v6172_v22, 5  ;;  %v1376_v6 = vadd.f32 %v1375_v63, %v7012_v30 }
 0x20e   :  { %2886 = vmatpush.bf16.msra.mxu3 %v5492_v2 }
 0x20f   :  { %1414 = vmatmul.bf16.gmra.mxu0 %v6173_v31  ;;  %1503 = vmatmul.bf16.gmra.mxu1 %v6173_v31  ;;  %v1642_v18 = vrot.slane %v1640_v9, 4  ;;  %v1641_v0 = vsel %vm7050_vm5, %v5384_v26, %v1640_v9 }
 0x210   :  { %1948 = vmatmul.bf16.gmra.mxu2 %v7543_v21  ;;  %2037 = vmatmul.bf16.gmra.mxu3 %v7543_v21  ;;  %v1708_v2 = vunpack.c.l.b16 %v1641_v0  ;;  %v9444_v0 = vshrl.u32 %v6388_v38, 16 }
 0x211   :  { %v1644_v22 = vsel %vm7050_vm5, %v1642_v18, %v1643_v13 }
 0x212   :  { %v1709_v20 = vunpack.c.l.b16 %v1644_v22  ;;  %v2255_v22 = vrot.slane %v9444_v0, 5 }
 0x213   :  { %v1909_v47 = vpop.f32.mrf.mxu2  ;;  %v1998_v37 = vpop.f32.mrf.mxu3 }
 0x214   :  { %v7579_v7 = vadd.f32 %v1909_v47, %v7021_v8  ;;  %v7581_v1 = vadd.f32 %v1998_v37, %v1376_v6  ;;  %v1377_v3 = vpop.f32.mrf.mxu0  ;;  %v7583_v4 = vpop.f32.mrf.mxu1  ;;  %v7597_v56 = vpack.c.b16 %v1709_v20, %v1708_v2  ;;  %v9442_v6 = vshrl.u32 %v6379_v33, 16 }
 0x215   :  { %v1378_v30 = vadd.f32 %v1377_v3, %v7023_v14  ;;  %v9443_v37 = vshll.u32 %v6379_v33, 16  ;;  %v9446_v33 = vshll.u32 %v6406_v57, 16 }
 0x216   :  { %v2251_v47 = vrot.slane %v9442_v6, 5 }
 0x217   :  { %v2252_v3 = vrot.slane %v9443_v37, 6 }
 0x21b   :  { %v1911_v63 = vpop.f32.mrf.mxu2  ;;  %v2000_v40 = vpop.f32.mrf.mxu3 }
 0x21c   :  { %v7591_v8 = vadd.f32 %v1911_v63, %v7031_v25  ;;  %v7593_v59 = vadd.f32 %v2000_v40, %v1378_v30  ;;  %v1380_v31 = vpop.f32.mrf.mxu0  ;;  %v7595_v45 = vpop.f32.mrf.mxu1 }
 0x21d   :  { %v1381_v14 = vadd.f32 %v1380_v31, %v7033_v61  ;;  %v9445_v61 = vshll.u32 %v6388_v38, 16  ;;  %v2253_v31 = vor.u32 %v2252_v3, %v2251_v47 }
 0x21f   :  { %1419 = vmatmul.bf16.gmra.mxu0 %v6176_v51  ;;  %1508 = vmatmul.bf16.gmra.mxu1 %v6176_v51  ;;  %v2256_v2 = vrot.slane %v9445_v61, 6 }
 0x220   :  { %1953 = vmatmul.bf16.gmra.mxu2 %v7597_v56  ;;  %2042 = vmatmul.bf16.gmra.mxu3 %v7597_v56 }
 0x221   :  { %v2257_v51 = vor.u32 %v2256_v2, %v2255_v22 }
 0x223   :  { %v1914_v25 = vpop.f32.mrf.mxu2  ;;  %v2003_v9 = vpop.f32.mrf.mxu3 }
 0x224   :  { %v7606_v26 = vadd.f32 %v1914_v25, %v7056_v50  ;;  %v7608_v18 = vadd.f32 %v2003_v9, %v1381_v14  ;;  %v1382_v5 = vpop.f32.mrf.mxu0  ;;  %v7610_v13 = vpop.f32.mrf.mxu1  ;;  %v6177_v50 = vld [vmem:[%s9136_s0 + $0x14] sm:$0x3]  ;;  %v2263_v25 = vrot.slane %v9446_v33, 6  ;;  %v9452_v33 = vshrl.u32 %v6435_v15, 16 }
 0x225   :  { %v2260_v20 = vshrl.u32 %v6177_v50, 16  ;;  %v1383_v30 = vadd.f32 %v1382_v5, %v7058_v48  ;;  %v2254_v48 = vrot.slane %v2253_v31, 4  ;;  %v2259_v5 = vrot.slane %v2257_v51, 4 }
 0x227   :  { %v2262_v14 = vrot.slane %v2260_v20, 5  ;;  %v5679_v20 = vld [vmem:[#allocation2 + $0x3a8] sm:$0xf] }
 0x229   :  { %v2264_v0 = vor.u32 %v2263_v25, %v2262_v14  ;;  %v9453_v25 = vshll.u32 %v6435_v15, 16 }
 0x22b   :  { %v1916_v63 = vpop.f32.mrf.mxu2  ;;  %v2005_v40 = vpop.f32.mrf.mxu3  ;;  %v2265_v22 = vsel %vm7554_vm8, %v2259_v5, %v2264_v0  ;;  %v9454_v0 = vld [vmem:[#allocation65_spill] sm:$0xff] }
 0x22c   :  { %v7627_v9 = vadd.f32 %v1916_v63, %v7066_v27  ;;  %v7629_v38 = vadd.f32 %v2005_v40, %v1383_v30  ;;  %v1385_v6 = vpop.f32.mrf.mxu0  ;;  %v7631_v37 = vpop.f32.mrf.mxu1  ;;  %v2258_v27 = vsel %vm7554_vm8, %v2254_v48, %v2257_v51  ;;  %v9450_v63 = vshrl.u32 %v6430_v10, 16  ;;  %v6178_v48 = vld [vmem:[%s9136_s0 + $0x20] sm:$0x3] }
 0x22d   :  { %v1386_v47 = vadd.f32 %v1385_v6, %v7068_v17  ;;  %v2511_v30 = vunpack.c.l.b16 %v2258_v27  ;;  %v2512_v17 = vunpack.c.l.b16 %v2265_v22  ;;  %v9451_v51 = vshll.u32 %v6430_v10, 16 }
 0x22e   :  { %v2266_v40 = vrot.slane %v9450_v63, 5  ;;  %v2271_v6 = vrot.slane %v9453_v25, 6  ;;  %v2275_v5 = vshrl.u32 %v6178_v48, 16 }
 0x22f   :  { %2056 = vmatmul.bf16.vlgmr.msra.gmra.mxu0 %v7070_v34  ;;  %2709 = vmatmul.bf16.vlgmr.msra.gmra.mxu1 %v2541_v28  ;;  %v2267_v14 = vrot.slane %v9451_v51, 6 }
 0x230   :  { %2798 = vmatmul.bf16.vlgmr.msra.gmra.mxu2 %v2541_v28  ;;  %2887 = vmatmul.bf16.vlgmr.msra.gmra.mxu3 %v2541_v28  ;;  %v6047_v28 = vld [vmem:[#allocation2 + $0x3b0] sm:$0xf0] }
 0x231   :  { %v5680_v31 = vor.u32 %v6047_v28, %v5679_v20  ;;  %v2268_v22 = vor.u32 %v2267_v14, %v2266_v40  ;;  %v2277_v20 = vrot.slane %v2275_v5, 5  ;;  %v9455_v28 = vld [vmem:[#allocation8_spill] sm:$0xff] }
 0x232   :  { %v9456_v63 = vshll.u32 %v9455_v28, 16  ;;  %v9462_v40 = vld [vmem:[#allocation68_spill] sm:$0xff] }
 0x233   :  { %v1919_v57 = vpop.f32.mrf.mxu2  ;;  %v2008_v3 = vpop.f32.mrf.mxu3  ;;  %3404 = vmatpush.bf16.msrb.mxu0 %v5680_v31  ;;  %v9461_v31 = vld [vmem:[#allocation69_spill] sm:$0xff] }
 0x234   :  { %v7640_v61 = vadd.f32 %v1919_v57, %v7088_v49  ;;  %v7642_v34 = vadd.f32 %v2008_v3, %v1386_v47  ;;  %v1387_v2 = vpop.f32.mrf.mxu0  ;;  %v7644_v50 = vpop.f32.mrf.mxu1  ;;  %v2270_v49 = vrot.slane %v9452_v33, 5  ;;  %v2542_v57 = vpack.c.b16 %v2512_v17, %v2511_v30  ;;  %v9457_v33 = vld [vmem:[#allocation67_spill] sm:$0xff] }
 0x235   :  { %9449 = vst [vmem:[#allocation140_spill] sm:$0xff] %v7644_v50  ;;  %v1388_v47 = vadd.f32 %v1387_v2, %v9454_v0  ;;  %v2278_v51 = vrot.slane %v9456_v63, 6  ;;  %v2269_v2 = vrot.slane %v2268_v22, 4  ;;  %v9463_v0 = vld [vmem:[#allocation71_spill] sm:$0xff]  ;;  %v9467_v63 = vld [vmem:[#allocation9_spill] sm:$0xff] }
 0x236   :  { %9447 = vst [vmem:[#allocation138_spill] sm:$0xff] %v7640_v61  ;;  %v2272_v10 = vor.u32 %v2271_v6, %v2270_v49 }
 0x237   :  { %9448 = vst [vmem:[#allocation139_spill] sm:$0xff] %v7642_v34  ;;  %v2279_v17 = vor.u32 %v2278_v51, %v2277_v20  ;;  %v6046_v20 = vld [vmem:[#allocation2 + $0x3ac] sm:$0xf]  ;;  %v9468_v51 = vshrl.u32 %v9467_v63, 16 }
 0x238   :  { %v2274_v30 = vrot.slane %v2272_v10, 4  ;;  %v2273_v48 = vsel %vm7554_vm8, %v2269_v2, %v2272_v10  ;;  %v9469_v10 = vshll.u32 %v9467_v63, 16 }
 0x239   :  { %v2513_v28 = vunpack.c.l.b16 %v2273_v48  ;;  %v9473_v48 = vld [vmem:[#allocation72_spill] sm:$0xff] }
 0x23a   :  { %v2280_v5 = vsel %vm7554_vm8, %v2274_v30, %v2279_v17  ;;  %v2282_v2 = vrot.slane %v9469_v10, 6  ;;  %v9470_v30 = vld [vmem:[#allocation10_spill] sm:$0xff] }
 0x23b   :  { %v1921_v3 = vpop.f32.mrf.mxu2  ;;  %v2010_v27 = vpop.f32.mrf.mxu3  ;;  %v9471_v17 = vshrl.u32 %v9470_v30, 16 }
 0x23c   :  { %v7661_v15 = vadd.f32 %v1921_v3, %v9457_v33  ;;  %v7663_v25 = vadd.f32 %v2010_v27, %v1388_v47  ;;  %v1390_v34 = vpop.f32.mrf.mxu0  ;;  %v7665_v50 = vpop.f32.mrf.mxu1  ;;  %v2281_v33 = vrot.slane %v9468_v51, 5 }
 0x23d   :  { %9460 = vst [vmem:[#allocation67_spill] sm:$0xff] %v7665_v50  ;;  %v1391_v14 = vadd.f32 %v1390_v34, %v9462_v40  ;;  %v2514_v34 = vunpack.c.l.b16 %v2280_v5  ;;  %v2285_v40 = vrot.slane %v9471_v17, 5 }
 0x23e   :  { %9458 = vst [vmem:[#allocation65_spill] sm:$0xff] %v7661_v15 }
 0x23f   :  { %9459 = vst [vmem:[#allocation8_spill] sm:$0xff] %v7663_v25  ;;  %2061 = vmatmul.bf16.gmra.mxu0 %v9461_v31  ;;  %2714 = vmatmul.bf16.gmra.mxu1 %v2542_v57  ;;  %v9476_v25 = vld [vmem:[#allocation74_spill] sm:$0xff] }
 0x240   :  { %2803 = vmatmul.bf16.gmra.mxu2 %v2542_v57  ;;  %2892 = vmatmul.bf16.gmra.mxu3 %v2542_v57  ;;  %v5681_v57 = vld [vmem:[#allocation2 + $0x3b4] sm:$0xf0] }
 0x241   :  { %v5684_v31 = vor.u32 %v6046_v20, %v5681_v57  ;;  %v2283_v57 = vor.u32 %v2282_v2, %v2281_v33  ;;  %v5687_v33 = vld [vmem:[#allocation2 + $0x3b0] sm:$0xf]  ;;  %v6048_v2 = vld [vmem:[#allocation2 + $0x3b8] sm:$0xf0] }
 0x243   :  { %v1924_v49 = vpop.f32.mrf.mxu2  ;;  %v2013_v6 = vpop.f32.mrf.mxu3  ;;  %3493 = vmatpush.bf16.msrb.mxu1 %v5684_v31  ;;  %v9480_v31 = vld [vmem:[#allocation76_spill] sm:$0xff] }
 0x244   :  { %v7674_v47 = vadd.f32 %v1924_v49, %v9463_v0  ;;  %v7676_v3 = vadd.f32 %v2013_v6, %v1391_v14  ;;  %v1392_v27 = vpop.f32.mrf.mxu0  ;;  %v7678_v22 = vpop.f32.mrf.mxu1  ;;  %v9472_v14 = vshll.u32 %v9470_v30, 16  ;;  %v6179_v6 = vld [vmem:[%s9136_s0 + $0x2c] sm:$0x3] }
 0x245   :  { %9466 = vst [vmem:[#allocation71_spill] sm:$0xff] %v7678_v22  ;;  %v2290_v0 = vshrl.u32 %v6179_v6, 16  ;;  %v1393_v5 = vadd.f32 %v1392_v27, %v9473_v48  ;;  %v9474_v22 = vld [vmem:[#allocation11_spill] sm:$0xff]  ;;  %v2284_v27 = vrot.slane %v2283_v57, 4  ;;  %v9482_v48 = vld [vmem:[#allocation78_spill] sm:$0xff] }
 0x246   :  { %9464 = vst [vmem:[#allocation69_spill] sm:$0xff] %v7674_v47  ;;  %v2286_v49 = vrot.slane %v9472_v14, 6  ;;  %v9475_v47 = vshll.u32 %v9474_v22, 16  ;;  %v5688_v22 = vor.u32 %v6048_v2, %v5687_v33  ;;  %v5667_v57 = vld [vmem:[#allocation2 + $0x390] sm:$0xf] }
 0x247   :  { %9465 = vst [vmem:[#allocation68_spill] sm:$0xff] %v7676_v3  ;;  %v2543_v3 = vpack.c.b16 %v2514_v34, %v2513_v28  ;;  %v2292_v10 = vrot.slane %v2290_v0, 5 }
 0x248   :  { %v2287_v63 = vor.u32 %v2286_v49, %v2285_v40  ;;  %v2293_v17 = vrot.slane %v9475_v47, 6  ;;  %v9481_v47 = vld [vmem:[#allocation75_spill] sm:$0xff]  ;;  %3582 = vmatpush.bf16.msrb.mxu2 %v5688_v22 }
 0x24a   :  { %v2289_v28 = vrot.slane %v2287_v63, 4  ;;  %v2294_v34 = vor.u32 %v2293_v17, %v2292_v10  ;;  %v2288_v6 = vsel %vm7554_vm8, %v2284_v27, %v2287_v63  ;;  %v6044_v10 = vld [vmem:[#allocation2 + $0x398] sm:$0xf0] }
 0x24b   :  { %v1926_v51 = vpop.f32.mrf.mxu2  ;;  %v2015_v20 = vpop.f32.mrf.mxu3  ;;  %v5668_v63 = vor.u32 %v6044_v10, %v5667_v57 }
 0x24c   :  { %v7695_v30 = vadd.f32 %v1926_v51, %v9476_v25  ;;  %v7697_v14 = vadd.f32 %v2015_v20, %v1393_v5  ;;  %v1395_v50 = vpop.f32.mrf.mxu0  ;;  %v7699_v15 = vpop.f32.mrf.mxu1  ;;  %v2295_v0 = vsel %vm7554_vm8, %v2289_v28, %v2294_v34  ;;  %v9489_v34 = vld [vmem:[#allocation13_spill] sm:$0xff] }
 0x24d   :  { %9479 = vst [vmem:[#allocation72_spill] sm:$0xff] %v7699_v15  ;;  %v1396_v40 = vadd.f32 %v1395_v50, %v9481_v47  ;;  %v2515_v50 = vunpack.c.l.b16 %v2288_v6  ;;  %v2516_v17 = vunpack.c.l.b16 %v2295_v0  ;;  %v9490_v22 = vshrl.u32 %v9489_v34, 16  ;;  %3405 = vmatpush.bf16.msrb.mxu0 %v5668_v63  ;;  %v9492_v6 = vld [vmem:[#allocation79_spill] sm:$0xff] }
 0x24e   :  { %9477 = vst [vmem:[#allocation9_spill] sm:$0xff] %v7695_v30  ;;  %v9499_v63 = vld [vmem:[#allocation83_spill] sm:$0xff] }
 0x24f   :  { %9478 = vst [vmem:[#allocation10_spill] sm:$0xff] %v7697_v14  ;;  %2066 = vmatmul.bf16.gmra.mxu0 %v9480_v31  ;;  %2719 = vmatmul.bf16.gmra.mxu1 %v2543_v3  ;;  %v9486_v31 = vld [vmem:[#allocation12_spill] sm:$0xff]  ;;  %v2300_v47 = vrot.slane %v9490_v22, 5  ;;  %v9495_v14 = vld [vmem:[#allocation81_spill] sm:$0xff] }
 0x250   :  { %2808 = vmatmul.bf16.gmra.mxu2 %v2543_v3  ;;  %2897 = vmatmul.bf16.gmra.mxu3 %v2543_v3  ;;  %v9487_v33 = vshrl.u32 %v9486_v31, 16  ;;  %v9488_v27 = vshll.u32 %v9486_v31, 16 }
 0x252   :  { %v2296_v2 = vrot.slane %v9487_v33, 5  ;;  %v2297_v28 = vrot.slane %v9488_v27, 6 }
 0x253   :  { %v1929_v25 = vpop.f32.mrf.mxu2  ;;  %v2018_v49 = vpop.f32.mrf.mxu3 }
 0x254   :  { %v7708_v5 = vadd.f32 %v1929_v25, %v9482_v48  ;;  %v7710_v51 = vadd.f32 %v2018_v49, %v1396_v40  ;;  %v1397_v3 = vpop.f32.mrf.mxu0  ;;  %v7712_v20 = vpop.f32.mrf.mxu1  ;;  %v9491_v40 = vshll.u32 %v9489_v34, 16  ;;  %v6180_v49 = vld [vmem:[%s9136_s0 + $0x38] sm:$0x3]  ;;  %v2298_v10 = vor.u32 %v2297_v28, %v2296_v2  ;;  %v9500_v2 = vld [vmem:[#allocation82_spill] sm:$0xff] }
 0x255   :  { %9485 = vst [vmem:[#allocation76_spill] sm:$0xff] %v7712_v20  ;;  %v2305_v48 = vshrl.u32 %v6180_v49, 16  ;;  %v1398_v0 = vadd.f32 %v1397_v3, %v9492_v6  ;;  %v9493_v20 = vld [vmem:[#allocation14_spill] sm:$0xff] }
 0x256   :  { %9483 = vst [vmem:[#allocation11_spill] sm:$0xff] %v7708_v5  ;;  %v2301_v25 = vrot.slane %v9491_v40, 6  ;;  %v9494_v5 = vshll.u32 %v9493_v20, 16  ;;  %v2299_v3 = vrot.slane %v2298_v10, 4  ;;  %v9505_v10 = vld [vmem:[#allocation15_spill] sm:$0xff] }
 0x257   :  { %9484 = vst [vmem:[#allocation74_spill] sm:$0xff] %v7710_v51  ;;  %v2544_v51 = vpack.c.b16 %v2516_v17, %v2515_v50  ;;  %v2307_v27 = vrot.slane %v2305_v48, 5 }
 0x258   :  { %v2302_v31 = vor.u32 %v2301_v25, %v2300_v47  ;;  %v2308_v22 = vrot.slane %v9494_v5, 6  ;;  %v9501_v25 = vld [vmem:[#allocation85_spill] sm:$0xff] }
 0x25a   :  { %v2304_v50 = vrot.slane %v2302_v31, 4  ;;  %v2309_v17 = vor.u32 %v2308_v22, %v2307_v27  ;;  %v9506_v27 = vshrl.u32 %v9505_v10, 16 }
 0x25b   :  { %v1931_v33 = vpop.f32.mrf.mxu2  ;;  %v2020_v57 = vpop.f32.mrf.mxu3 }
 0x25c   :  { %v7729_v34 = vadd.f32 %v1931_v33, %v9495_v14  ;;  %v7731_v40 = vadd.f32 %v2020_v57, %v1398_v0  ;;  %v1400_v15 = vpop.f32.mrf.mxu0  ;;  %v7733_v30 = vpop.f32.mrf.mxu1  ;;  %v2303_v14 = vsel %vm7554_vm8, %v2299_v3, %v2302_v31  ;;  %v2310_v47 = vsel %vm7554_vm8, %v2304_v50, %v2309_v17  ;;  %v6043_v33 = vld [vmem:[#allocation2 + $0x394] sm:$0xf]  ;;  %v9508_v50 = vld [vmem:[#allocation16_spill] sm:$0xff] }
 0x25d   :  { %9498 = vst [vmem:[#allocation12_spill] sm:$0xff] %v7733_v30  ;;  %v1401_v28 = vadd.f32 %v1400_v15, %v9500_v2  ;;  %v2517_v57 = vunpack.c.l.b16 %v2303_v14  ;;  %v2518_v15 = vunpack.c.l.b16 %v2310_v47  ;;  %v2311_v22 = vrot.slane %v9506_v27, 5  ;;  %v9511_v14 = vld [vmem:[#allocation86_spill] sm:$0xff] }
 0x25e   :  { %9496 = vst [vmem:[#allocation75_spill] sm:$0xff] %v7729_v34  ;;  %v9507_v31 = vshll.u32 %v9505_v10, 16  ;;  %v9509_v17 = vshrl.u32 %v9508_v50, 16 }
 0x25f   :  { %9497 = vst [vmem:[#allocation78_spill] sm:$0xff] %v7731_v40  ;;  %2071 = vmatmul.bf16.gmra.mxu0 %v9499_v63  ;;  %2724 = vmatmul.bf16.gmra.mxu1 %v2544_v51  ;;  %v9514_v40 = vld [vmem:[#allocation88_spill] sm:$0xff] }
 0x260   :  { %2813 = vmatmul.bf16.gmra.mxu2 %v2544_v51  ;;  %2902 = vmatmul.bf16.gmra.mxu3 %v2544_v51  ;;  %v5669_v51 = vld [vmem:[#allocation2 + $0x39c] sm:$0xf0]  ;;  %v2312_v3 = vrot.slane %v9507_v31, 6  ;;  %v2315_v2 = vrot.slane %v9509_v17, 5 }
 0x261   :  { %v5672_v63 = vor.u32 %v6043_v33, %v5669_v51 }
 0x262   :  { %v2313_v51 = vor.u32 %v2312_v3, %v2311_v22  ;;  %v5675_v22 = vld [vmem:[#allocation2 + $0x398] sm:$0xf]  ;;  %v6045_v3 = vld [vmem:[#allocation2 + $0x3a0] sm:$0xf0] }
 0x263   :  { %v1934_v20 = vpop.f32.mrf.mxu2  ;;  %v2023_v5 = vpop.f32.mrf.mxu3  ;;  %3494 = vmatpush.bf16.msrb.mxu1 %v5672_v63  ;;  %v9518_v63 = vld [vmem:[#allocation90_spill] sm:$0xff] }
 0x264   :  { %v7742_v49 = vadd.f32 %v1934_v20, %v9501_v25  ;;  %v7744_v48 = vadd.f32 %v2023_v5, %v1401_v28  ;;  %v1402_v6 = vpop.f32.mrf.mxu0  ;;  %v7746_v0 = vpop.f32.mrf.mxu1  ;;  %v9510_v28 = vshll.u32 %v9508_v50, 16  ;;  %v6181_v5 = vld [vmem:[%s9136_s0 + $0x44] sm:$0x3] }
 0x265   :  { %9504 = vst [vmem:[#allocation14_spill] sm:$0xff] %v7746_v0  ;;  %v2320_v25 = vshrl.u32 %v6181_v5, 16  ;;  %v1403_v47 = vadd.f32 %v1402_v6, %v9511_v14  ;;  %v9512_v0 = vld [vmem:[#allocation17_spill] sm:$0xff]  ;;  %v2314_v6 = vrot.slane %v2313_v51, 4  ;;  %v9520_v14 = vld [vmem:[#allocation92_spill] sm:$0xff] }
 0x266   :  { %9502 = vst [vmem:[#allocation13_spill] sm:$0xff] %v7742_v49  ;;  %v2316_v20 = vrot.slane %v9510_v28, 6  ;;  %v9513_v49 = vshll.u32 %v9512_v0, 16  ;;  %v5676_v0 = vor.u32 %v6045_v3, %v5675_v22  ;;  %v5655_v51 = vld [vmem:[#allocation2 + $0x378] sm:$0xf] }
 0x267   :  { %9503 = vst [vmem:[#allocation79_spill] sm:$0xff] %v7744_v48  ;;  %v2545_v48 = vpack.c.b16 %v2518_v15, %v2517_v57  ;;  %v2322_v31 = vrot.slane %v2320_v25, 5 }
 0x268   :  { %v2317_v10 = vor.u32 %v2316_v20, %v2315_v2  ;;  %v2323_v17 = vrot.slane %v9513_v49, 6  ;;  %v9519_v49 = vld [vmem:[#allocation89_spill] sm:$0xff]  ;;  %3583 = vmatpush.bf16.msrb.mxu2 %v5676_v0 }
 0x26a   :  { %v2319_v57 = vrot.slane %v2317_v10, 4  ;;  %v2324_v15 = vor.u32 %v2323_v17, %v2322_v31  ;;  %v2318_v5 = vsel %vm7554_vm8, %v2314_v6, %v2317_v10  ;;  %v6041_v31 = vld [vmem:[#allocation2 + $0x380] sm:$0xf0] }
 0x26b   :  { %v1936_v27 = vpop.f32.mrf.mxu2  ;;  %v2025_v33 = vpop.f32.mrf.mxu3  ;;  %v5656_v10 = vor.u32 %v6041_v31, %v5655_v51 }
 0x26c   :  { %v7763_v50 = vadd.f32 %v1936_v27, %v9514_v40  ;;  %v7765_v28 = vadd.f32 %v2025_v33, %v1403_v47  ;;  %v1405_v30 = vpop.f32.mrf.mxu0  ;;  %v7767_v34 = vpop.f32.mrf.mxu1  ;;  %v2325_v25 = vsel %vm7554_vm8, %v2319_v57, %v2324_v15  ;;  %v9527_v15 = vld [vmem:[#allocation19_spill] sm:$0xff] }
 0x26d   :  { %9517 = vst [vmem:[#allocation82_spill] sm:$0xff] %v7767_v34  ;;  %v1406_v2 = vadd.f32 %v1405_v30, %v9519_v49  ;;  %v2519_v30 = vunpack.c.l.b16 %v2318_v5  ;;  %v2520_v17 = vunpack.c.l.b16 %v2325_v25  ;;  %v9528_v0 = vshrl.u32 %v9527_v15, 16  ;;  %3406 = vmatpush.bf16.msrb.mxu0 %v5656_v10  ;;  %v9530_v5 = vld [vmem:[#allocation93_spill] sm:$0xff] }
 0x26e   :  { %9515 = vst [vmem:[#allocation81_spill] sm:$0xff] %v7763_v50  ;;  %v9537_v10 = vld [vmem:[#allocation97_spill] sm:$0xff] }
 0x26f   :  { %9516 = vst [vmem:[#allocation83_spill] sm:$0xff] %v7765_v28  ;;  %2076 = vmatmul.bf16.gmra.mxu0 %v9518_v63  ;;  %2729 = vmatmul.bf16.gmra.mxu1 %v2545_v48  ;;  %v9524_v63 = vld [vmem:[#allocation18_spill] sm:$0xff]  ;;  %v2330_v49 = vrot.slane %v9528_v0, 5  ;;  %v9533_v28 = vld [vmem:[#allocation95_spill] sm:$0xff] }
 0x270   :  { %2818 = vmatmul.bf16.gmra.mxu2 %v2545_v48  ;;  %2907 = vmatmul.bf16.gmra.mxu3 %v2545_v48  ;;  %v9525_v22 = vshrl.u32 %v9524_v63, 16  ;;  %v9526_v6 = vshll.u32 %v9524_v63, 16 }
 0x272   :  { %v2326_v3 = vrot.slane %v9525_v22, 5  ;;  %v2327_v57 = vrot.slane %v9526_v6, 6 }
 0x273   :  { %v1939_v40 = vpop.f32.mrf.mxu2  ;;  %v2028_v20 = vpop.f32.mrf.mxu3 }
 0x274   :  { %v7776_v47 = vadd.f32 %v1939_v40, %v9520_v14  ;;  %v7778_v27 = vadd.f32 %v2028_v20, %v1406_v2  ;;  %v1407_v48 = vpop.f32.mrf.mxu0  ;;  %v7780_v33 = vpop.f32.mrf.mxu1  ;;  %v9529_v2 = vshll.u32 %v9527_v15, 16  ;;  %v6182_v20 = vld [vmem:[%s9136_s0 + $0x50] sm:$0x3]  ;;  %v2328_v31 = vor.u32 %v2327_v57, %v2326_v3  ;;  %v9538_v3 = vld [vmem:[#allocation96_spill] sm:$0xff] }
 0x275   :  { %9523 = vst [vmem:[#allocation16_spill] sm:$0xff] %v7780_v33  ;;  %v2335_v14 = vshrl.u32 %v6182_v20, 16  ;;  %v1408_v25 = vadd.f32 %v1407_v48, %v9530_v5  ;;  %v9531_v33 = vld [vmem:[#allocation20_spill] sm:$0xff] }
 0x276   :  { %9521 = vst [vmem:[#allocation85_spill] sm:$0xff] %v7776_v47  ;;  %v2331_v40 = vrot.slane %v9529_v2, 6  ;;  %v9532_v47 = vshll.u32 %v9531_v33, 16  ;;  %v2329_v48 = vrot.slane %v2328_v31, 4  ;;  %v9543_v31 = vld [vmem:[#allocation21_spill] sm:$0xff] }
 0x277   :  { %9522 = vst [vmem:[#allocation15_spill] sm:$0xff] %v7778_v27  ;;  %v2546_v27 = vpack.c.b16 %v2520_v17, %v2519_v30  ;;  %v2337_v6 = vrot.slane %v2335_v14, 5 }
 0x278   :  { %v2332_v63 = vor.u32 %v2331_v40, %v2330_v49  ;;  %v2338_v0 = vrot.slane %v9532_v47, 6  ;;  %v9539_v40 = vld [vmem:[#allocation99_spill] sm:$0xff] }
 0x27a   :  { %v2334_v30 = vrot.slane %v2332_v63, 4  ;;  %v2339_v17 = vor.u32 %v2338_v0, %v2337_v6  ;;  %v9544_v6 = vshrl.u32 %v9543_v31, 16 }
 0x27b   :  { %v1941_v22 = vpop.f32.mrf.mxu2  ;;  %v2030_v51 = vpop.f32.mrf.mxu3 }
 0x27c   :  { %v7797_v15 = vadd.f32 %v1941_v22, %v9533_v28  ;;  %v7799_v2 = vadd.f32 %v2030_v51, %v1408_v25  ;;  %v1410_v34 = vpop.f32.mrf.mxu0  ;;  %v7801_v50 = vpop.f32.mrf.mxu1  ;;  %v2333_v28 = vsel %vm7554_vm8, %v2329_v48, %v2332_v63  ;;  %v2340_v49 = vsel %vm7554_vm8, %v2334_v30, %v2339_v17  ;;  %v6040_v22 = vld [vmem:[#allocation2 + $0x37c] sm:$0xf]  ;;  %v9546_v30 = vld [vmem:[#allocation22_spill] sm:$0xff] }
 0x27d   :  { %9536 = vst [vmem:[#allocation88_spill] sm:$0xff] %v7801_v50  ;;  %v1411_v57 = vadd.f32 %v1410_v34, %v9538_v3  ;;  %v2521_v51 = vunpack.c.l.b16 %v2333_v28  ;;  %v2522_v34 = vunpack.c.l.b16 %v2340_v49  ;;  %v2341_v0 = vrot.slane %v9544_v6, 5  ;;  %v9549_v28 = vld [vmem:[#allocation100_spill] sm:$0xff] }
 0x27e   :  { %9534 = vst [vmem:[#allocation86_spill] sm:$0xff] %v7797_v15  ;;  %v9545_v63 = vshll.u32 %v9543_v31, 16  ;;  %v9547_v17 = vshrl.u32 %v9546_v30, 16 }
 0x27f   :  { %9535 = vst [vmem:[#allocation17_spill] sm:$0xff] %v7799_v2  ;;  %2081 = vmatmul.bf16.gmra.mxu0 %v9537_v10  ;;  %2734 = vmatmul.bf16.gmra.mxu1 %v2546_v27  ;;  %v9552_v2 = vld [vmem:[#allocation102_spill] sm:$0xff] }
 0x280   :  { %2823 = vmatmul.bf16.gmra.mxu2 %v2546_v27  ;;  %2912 = vmatmul.bf16.gmra.mxu3 %v2546_v27  ;;  %v5657_v27 = vld [vmem:[#allocation2 + $0x384] sm:$0xf0]  ;;  %v2342_v48 = vrot.slane %v9545_v63, 6  ;;  %v2345_v3 = vrot.slane %v9547_v17, 5 }
 0x281   :  { %v5660_v10 = vor.u32 %v6040_v22, %v5657_v27 }
 0x282   :  { %v2343_v27 = vor.u32 %v2342_v48, %v2341_v0  ;;  %v5663_v0 = vld [vmem:[#allocation2 + $0x380] sm:$0xf]  ;;  %v6042_v48 = vld [vmem:[#allocation2 + $0x388] sm:$0xf0] }
 0x283   :  { %v1944_v33 = vpop.f32.mrf.mxu2  ;;  %v2033_v47 = vpop.f32.mrf.mxu3  ;;  %3495 = vmatpush.bf16.msrb.mxu1 %v5660_v10  ;;  %v9556_v10 = vld [vmem:[#allocation104_spill] sm:$0xff] }
 0x284   :  { %v7810_v20 = vadd.f32 %v1944_v33, %v9539_v40  ;;  %v7812_v14 = vadd.f32 %v2033_v47, %v1411_v57  ;;  %v1412_v5 = vpop.f32.mrf.mxu0  ;;  %v7814_v25 = vpop.f32.mrf.mxu1  ;;  %v9548_v57 = vshll.u32 %v9546_v30, 16  ;;  %v6183_v47 = vld [vmem:[%s9136_s0 + $0x5c] sm:$0x3] }
 0x285   :  { %9542 = vst [vmem:[#allocation92_spill] sm:$0xff] %v7814_v25  ;;  %v2350_v40 = vshrl.u32 %v6183_v47, 16  ;;  %v1413_v49 = vadd.f32 %v1412_v5, %v9549_v28  ;;  %v9550_v25 = vld [vmem:[#allocation23_spill] sm:$0xff]  ;;  %v2344_v5 = vrot.slane %v2343_v27, 4  ;;  %v6038_v27 = vld [vmem:[#allocation2 + $0x368] sm:$0xf0] }
 0x286   :  { %9540 = vst [vmem:[#allocation90_spill] sm:$0xff] %v7810_v20  ;;  %v2346_v33 = vrot.slane %v9548_v57, 6  ;;  %v9551_v20 = vshll.u32 %v9550_v25, 16  ;;  %v5664_v25 = vor.u32 %v6042_v48, %v5663_v0 }
 0x287   :  { %9541 = vst [vmem:[#allocation89_spill] sm:$0xff] %v7812_v14  ;;  %v2547_v14 = vpack.c.b16 %v2522_v34, %v2521_v51  ;;  %v2352_v63 = vrot.slane %v2350_v40, 5 }
 0x288   :  { %v2347_v31 = vor.u32 %v2346_v33, %v2345_v3  ;;  %v2353_v17 = vrot.slane %v9551_v20, 6  ;;  %v9557_v20 = vld [vmem:[#allocation103_spill] sm:$0xff]  ;;  %3584 = vmatpush.bf16.msrb.mxu2 %v5664_v25 }
 0x28a   :  { %v2349_v51 = vrot.slane %v2347_v31, 4  ;;  %v2354_v34 = vor.u32 %v2353_v17, %v2352_v63  ;;  %v2348_v47 = vsel %vm7554_vm8, %v2344_v5, %v2347_v31  ;;  %v9561_v17 = vld [vmem:[#allocation24_spill] sm:$0xff] }
 0x28b   :  { %v1946_v6 = vpop.f32.mrf.mxu2  ;;  %v2035_v22 = vpop.f32.mrf.mxu3  ;;  %v9563_v5 = vshll.u32 %v9561_v17, 16 }
 0x28c   :  { %v7831_v30 = vadd.f32 %v1946_v6, %v9552_v2  ;;  %v7833_v57 = vadd.f32 %v2035_v22, %v1413_v49  ;;  %v1415_v50 = vpop.f32.mrf.mxu0  ;;  %v7835_v15 = vpop.f32.mrf.mxu1  ;;  %v2355_v40 = vsel %vm7554_vm8, %v2349_v51, %v2354_v34  ;;  %v5643_v22 = vld [vmem:[#allocation2 + $0x360] sm:$0xf]  ;;  %v9564_v34 = vld [vmem:[#allocation25_spill] sm:$0xff] }
 0x28d   :  { %9555 = vst [vmem:[#allocation93_spill] sm:$0xff] %v7835_v15  ;;  %v1416_v3 = vadd.f32 %v1415_v50, %v9557_v20  ;;  %v2523_v50 = vunpack.c.l.b16 %v2348_v47  ;;  %v2524_v63 = vunpack.c.l.b16 %v2355_v40  ;;  %v5644_v31 = vor.u32 %v6038_v27, %v5643_v22 }
 0x28e   :  { %9553 = vst [vmem:[#allocation18_spill] sm:$0xff] %v7831_v30  ;;  %v2357_v51 = vrot.slane %v9563_v5, 6  ;;  %v9565_v48 = vshrl.u32 %v9564_v34, 16  ;;  %v9566_v25 = vshll.u32 %v9564_v34, 16 }
 0x28f   :  { %9554 = vst [vmem:[#allocation19_spill] sm:$0xff] %v7833_v57  ;;  %2086 = vmatmul.bf16.gmra.mxu0 %v9556_v10  ;;  %2739 = vmatmul.bf16.gmra.mxu1 %v2547_v14  ;;  %v9562_v10 = vshrl.u32 %v9561_v17, 16  ;;  %v2548_v40 = vpack.c.b16 %v2524_v63, %v2523_v50 }
 0x290   :  { %2828 = vmatmul.bf16.gmra.mxu2 %v2547_v14  ;;  %2917 = vmatmul.bf16.gmra.mxu3 %v2547_v14  ;;  %v2361_v20 = vrot.slane %v9566_v25, 6 }
 0x291   :  { %v2356_v0 = vrot.slane %v9562_v10, 5  ;;  %3407 = vmatpush.bf16.msrb.mxu0 %v5644_v31  ;;  %v9574_v31 = vld [vmem:[#allocation110_spill] sm:$0xff] }
 0x293   :  { %v1949_v2 = vpop.f32.mrf.mxu2  ;;  %v2038_v33 = vpop.f32.mrf.mxu3  ;;  %v2358_v27 = vor.u32 %v2357_v51, %v2356_v0  ;;  %v9575_v0 = vld [vmem:[#allocation109_spill] sm:$0xff] }
 0x294   :  { %v7844_v28 = vadd.f32 %v1949_v2, %v7280_v52  ;;  %v7846_v49 = vadd.f32 %v2038_v33, %v1416_v3  ;;  %v1417_v14 = vpop.f32.mrf.mxu0  ;;  %v7848_v6 = vpop.f32.mrf.mxu1  ;;  %v2360_v52 = vrot.slane %v9565_v48, 5  ;;  %v6184_v3 = vld [vmem:[%s9136_s0 + $0x68] sm:$0x3]  ;;  %v9567_v33 = vld [vmem:[#allocation106_spill] sm:$0xff] }
 0x295   :  { %9560 = vst [vmem:[#allocation97_spill] sm:$0xff] %v7848_v6  ;;  %v2365_v2 = vshrl.u32 %v6184_v3, 16  ;;  %v1418_v47 = vadd.f32 %v1417_v14, %v9567_v33  ;;  %v2359_v14 = vrot.slane %v2358_v27, 4  ;;  %v9580_v27 = vld [vmem:[#allocation27_spill] sm:$0xff] }
 0x296   :  { %9558 = vst [vmem:[#allocation20_spill] sm:$0xff] %v7844_v28  ;;  %v2362_v17 = vor.u32 %v2361_v20, %v2360_v52  ;;  %v9570_v28 = vld [vmem:[#allocation108_spill] sm:$0xff] }
 0x297   :  { %9559 = vst [vmem:[#allocation95_spill] sm:$0xff] %v7846_v49  ;;  %v2367_v5 = vrot.slane %v2365_v2, 5  ;;  %v9568_v49 = vld [vmem:[#allocation26_spill] sm:$0xff]  ;;  %v9576_v20 = vld [vmem:[#allocation112_spill] sm:$0xff] }
 0x298   :  { %v9569_v6 = vshll.u32 %v9568_v49, 16  ;;  %v2364_v50 = vrot.slane %v2362_v17, 4 }
 0x29a   :  { %v2368_v48 = vrot.slane %v9569_v6, 6 }
 0x29b   :  { %v1951_v10 = vpop.f32.mrf.mxu2  ;;  %v2040_v22 = vpop.f32.mrf.mxu3 }
 0x29c   :  { %v7865_v34 = vadd.f32 %v1951_v10, %v9570_v28  ;;  %v7867_v25 = vadd.f32 %v2040_v22, %v1418_v47  ;;  %v1420_v57 = vpop.f32.mrf.mxu0  ;;  %v7869_v15 = vpop.f32.mrf.mxu1  ;;  %v2369_v63 = vor.u32 %v2368_v48, %v2367_v5  ;;  %v2363_v28 = vsel %vm7554_vm8, %v2359_v14, %v2362_v17  ;;  %v6037_v10 = vld [vmem:[#allocation2 + $0x364] sm:$0xf] }
 0x29d   :  { %9573 = vst [vmem:[#allocation21_spill] sm:$0xff] %v7869_v15  ;;  %v1421_v51 = vadd.f32 %v1420_v57, %v9575_v0  ;;  %v2525_v22 = vunpack.c.l.b16 %v2363_v28  ;;  %v9581_v5 = vshrl.u32 %v9580_v27, 16  ;;  %v9582_v17 = vshll.u32 %v9580_v27, 16  ;;  %v9586_v28 = vld [vmem:[#allocation32_spill] sm:$0xff]  ;;  %v9591_v15 = vld [vmem:[#allocation115_spill] sm:$0xff] }
 0x29e   :  { %9571 = vst [vmem:[#allocation96_spill] sm:$0xff] %v7865_v34  ;;  %v2370_v52 = vsel %vm7554_vm8, %v2364_v50, %v2369_v63  ;;  %v9583_v50 = vld [vmem:[#allocation28_spill] sm:$0xff] }
 0x29f   :  { %9572 = vst [vmem:[#allocation99_spill] sm:$0xff] %v7867_v25  ;;  %2091 = vmatmul.bf16.gmra.mxu0 %v9574_v31  ;;  %2744 = vmatmul.bf16.gmra.mxu1 %v2548_v40  ;;  %v2526_v57 = vunpack.c.l.b16 %v2370_v52  ;;  %v2371_v48 = vrot.slane %v9581_v5, 5  ;;  %v2372_v14 = vrot.slane %v9582_v17, 6  ;;  %v9584_v63 = vshrl.u32 %v9583_v50, 16  ;;  %v9587_v52 = vld [vmem:[#allocation116_spill] sm:$0xff]  ;;  %v9588_v5 = vld [vmem:[#allocation113_spill] sm:$0xff] }
 0x2a0   :  { %2833 = vmatmul.bf16.gmra.mxu2 %v2548_v40  ;;  %2922 = vmatmul.bf16.gmra.mxu3 %v2548_v40  ;;  %v5645_v40 = vld [vmem:[#allocation2 + $0x36c] sm:$0xf0]  ;;  %v9589_v25 = vld [vmem:[#allocation29_spill] sm:$0xff] }
 0x2a1   :  { %v5648_v31 = vor.u32 %v6037_v10, %v5645_v40  ;;  %v2375_v0 = vrot.slane %v9584_v63, 5  ;;  %v2549_v40 = vpack.c.b16 %v2526_v57, %v2525_v22 }
 0x2a3   :  { %v1954_v49 = vpop.f32.mrf.mxu2  ;;  %v2043_v6 = vpop.f32.mrf.mxu3  ;;  %3496 = vmatpush.bf16.msrb.mxu1 %v5648_v31 }
 0x2a4   :  { %v7878_v3 = vadd.f32 %v1954_v49, %v9576_v20  ;;  %v7880_v2 = vadd.f32 %v2043_v6, %v1421_v51  ;;  %v1422_v33 = vpop.f32.mrf.mxu0  ;;  %v7882_v47 = vpop.f32.mrf.mxu1  ;;  %v9585_v51 = vshll.u32 %v9583_v50, 16  ;;  %v6185_v6 = vld [vmem:[%s9136_s0 + $0x74] sm:$0x3]  ;;  %v9590_v50 = vshll.u32 %v9589_v25, 16  ;;  %v5651_v25 = vld [vmem:[#allocation2 + $0x368] sm:$0xf] }
 0x2a5   :  { %9579 = vst [vmem:[#allocation23_spill] sm:$0xff] %v7882_v47  ;;  %v2380_v20 = vshrl.u32 %v6185_v6, 16  ;;  %v1423_v10 = vadd.f32 %v1422_v33, %v9588_v5  ;;  %v2373_v47 = vor.u32 %v2372_v14, %v2371_v48  ;;  %v9592_v33 = vld [vmem:[#allocation117_spill] sm:$0xff]  ;;  %v6039_v14 = vld [vmem:[#allocation2 + $0x370] sm:$0xf0] }
 0x2a6   :  { %9577 = vst [vmem:[#allocation22_spill] sm:$0xff] %v7878_v3  ;;  %v2376_v49 = vrot.slane %v9585_v51, 6  ;;  %v2383_v51 = vrot.slane %v9590_v50, 6  ;;  %v6035_v50 = vld [vmem:[#allocation2 + $0x350] sm:$0xf0] }
 0x2a7   :  { %9578 = vst [vmem:[#allocation100_spill] sm:$0xff] %v7880_v2  ;;  %v1435_v2 = vadd.f32 %v9587_v52, %v9586_v28  ;;  %v2382_v63 = vrot.slane %v2380_v20, 5  ;;  %v2374_v22 = vrot.slane %v2373_v47, 4  ;;  %v9594_v47 = vld [vmem:[#allocation118_spill] sm:$0xff] }
 0x2a8   :  { %v2377_v3 = vor.u32 %v2376_v49, %v2375_v0  ;;  %v9593_v0 = vld [vmem:[#allocation34_spill] sm:$0xff] }
 0x2a9   :  { %v2384_v48 = vor.u32 %v2383_v51, %v2382_v63  ;;  %v1437_v49 = vadd.f32 %v7348_v43, %v9593_v0  ;;  %v5631_v43 = vld [vmem:[#allocation2 + $0x348] sm:$0xf] }
 0x2aa   :  { %v2379_v57 = vrot.slane %v2377_v3, 4 }
 0x2ab   :  { %v1956_v27 = vpop.f32.mrf.mxu2  ;;  %v2045_v17 = vpop.f32.mrf.mxu3 }
 0x2ac   :  { %v7901_v34 = vadd.f32 %v1956_v27, %v9591_v15  ;;  %v7903_v30 = vadd.f32 %v2045_v17, %v1423_v10  ;;  %v2057_v31 = vpop.f32.mrf.mxu0  ;;  %v2710_v6 = vpop.f32.mrf.mxu1  ;;  %v5652_v15 = vor.u32 %v6039_v14, %v5651_v25  ;;  %v9598_v25 = vld [vmem:[#allocation31_spill] sm:$0xff] }
 0x2ad   :  { %v2139_v61 = vadd.f32 %v2057_v31, %v1435_v2  ;;  %v7906_v28 = vadd.f32 %v2710_v6, %v7344_v54  ;;  %v2378_v54 = vsel %vm7554_vm8, %v2374_v22, %v2377_v3  ;;  %v2385_v2 = vsel %vm7554_vm8, %v2379_v57, %v2384_v48  ;;  %v9595_v3 = vld [vmem:[#allocation30_spill] sm:$0xff] }
 0x2ae   :  { %3585 = vmatpush.bf16.msrb.mxu2 %v5652_v15  ;;  %v2527_v51 = vunpack.c.l.b16 %v2378_v54  ;;  %v2528_v31 = vunpack.c.l.b16 %v2385_v2  ;;  %v9596_v6 = vshrl.u32 %v9595_v3, 16  ;;  %v5632_v22 = vor.u32 %v6035_v50, %v5631_v43  ;;  %v9602_v50 = vld [vmem:[#allocation33_spill] sm:$0xff] }
 0x2af   :  { %2096 = vmatmul.bf16.gmra.mxu0 %v9592_v33  ;;  %2749 = vmatmul.bf16.gmra.mxu1 %v2549_v40  ;;  %v9597_v57 = vshll.u32 %v9595_v3, 16  ;;  %v9600_v15 = vshll.u32 %v9598_v25, 16  ;;  %v9603_v3 = vshll.u32 %v9602_v50, 16  ;;  %v6034_v50 = vld [vmem:[#allocation2 + $0x34c] sm:$0xf] }
 0x2b0   :  { %2838 = vmatmul.bf16.gmra.mxu2 %v2549_v40  ;;  %2927 = vmatmul.bf16.gmra.mxu3 %v2549_v40  ;;  %v2386_v33 = vrot.slane %v9596_v6, 5  ;;  %v2550_v54 = vpack.c.b16 %v2528_v31, %v2527_v51 }
 0x2b1   :  { %v2387_v48 = vrot.slane %v9597_v57, 6  ;;  %v2391_v0 = vrot.slane %v9600_v15, 6  ;;  %3408 = vmatpush.bf16.msrb.mxu0 %v5632_v22  ;;  %v2398_v6 = vrot.slane %v9603_v3, 6  ;;  %v5633_v3 = vld [vmem:[#allocation2 + $0x354] sm:$0xf0] }
 0x2b3   :  { %v2799_v20 = vpop.f32.mrf.mxu2  ;;  %v2888_v52 = vpop.f32.mrf.mxu3 }
 0x2b4   :  { %v7916_v5 = vadd.f32 %v2799_v20, %v9594_v47  ;;  %v7918_v10 = vadd.f32 %v2888_v52, %v2139_v61  ;;  %v2059_v40 = vpop.f32.mrf.mxu0  ;;  %v2712_v27 = vpop.f32.mrf.mxu1  ;;  %v9599_v61 = vshrl.u32 %v9598_v25, 16  ;;  %v9601_v20 = vld [vmem:[#allocation37_spill] sm:$0xff] }
 0x2b5   :  { %v2142_v17 = vadd.f32 %v2059_v40, %v1437_v49  ;;  %v7921_v63 = vadd.f32 %v2712_v27, %v7356_v29  ;;  %v6186_v29 = vld [vmem:[%s9136_s0 + $0x80] sm:$0x3]  ;;  %v1440_v52 = vadd.f32 %v7360_v23, %v9601_v20  ;;  %v2388_v40 = vor.u32 %v2387_v48, %v2386_v33  ;;  %v9604_v23 = vld [vmem:[#allocation119_spill] sm:$0xff] }
 0x2b6   :  { %v2390_v14 = vrot.slane %v9599_v61, 5  ;;  %v2395_v49 = vshrl.u32 %v6186_v29, 16  ;;  %v9605_v48 = vld [vmem:[#allocation39_spill] sm:$0xff]  ;;  %v9607_v20 = vld [vmem:[#allocation120_spill] sm:$0xff] }
 0x2b7   :  { %v2389_v51 = vrot.slane %v2388_v40, 4 }
 0x2b8   :  { %v2392_v27 = vor.u32 %v2391_v0, %v2390_v14  ;;  %v2397_v43 = vrot.slane %v2395_v49, 5  ;;  %v9606_v14 = vld [vmem:[#allocation121_spill] sm:$0xff] }
 0x2ba   :  { %v2394_v31 = vrot.slane %v2392_v27, 4  ;;  %v2399_v33 = vor.u32 %v2398_v6, %v2397_v43  ;;  %v2393_v49 = vsel %vm7554_vm8, %v2389_v51, %v2392_v27  ;;  %v5636_v51 = vor.u32 %v6034_v50, %v5633_v3 }
 0x2bb   :  { %v2801_v2 = vpop.f32.mrf.mxu2  ;;  %v2890_v47 = vpop.f32.mrf.mxu3  ;;  %v2529_v6 = vunpack.c.l.b16 %v2393_v49  ;;  %v9617_v49 = vld [vmem:[#allocation42_spill] sm:$0xff] }
 0x2bc   :  { %v7939_v57 = vadd.f32 %v2801_v2, %v7358_v46  ;;  %v7941_v25 = vadd.f32 %v2890_v47, %v2142_v17  ;;  %v2062_v61 = vpop.f32.mrf.mxu0  ;;  %v2715_v15 = vpop.f32.mrf.mxu1  ;;  %v1442_v46 = vadd.f32 %v9606_v14, %v9605_v48  ;;  %v9614_v48 = vld [vmem:[#allocation36_spill] sm:$0xff]  ;;  %3497 = vmatpush.bf16.msrb.mxu1 %v5636_v51 }
 0x2bd   :  { %v2145_v22 = vadd.f32 %v2062_v61, %v1440_v52  ;;  %v7944_v29 = vadd.f32 %v2715_v15, %v7380_v55  ;;  %v2400_v55 = vsel %vm7554_vm8, %v2394_v31, %v2399_v33  ;;  %v9611_v15 = vld [vmem:[#allocation35_spill] sm:$0xff] }
 0x2be   :  { %v2530_v61 = vunpack.c.l.b16 %v2400_v55  ;;  %v9612_v27 = vshrl.u32 %v9611_v15, 16  ;;  %v9613_v31 = vshll.u32 %v9611_v15, 16  ;;  %v1445_v55 = vadd.f32 %v7396_v19, %v9617_v49  ;;  %v9621_v19 = vld [vmem:[#allocation123_spill] sm:$0xff] }
 0x2bf   :  { %2101 = vmatmul.bf16.gmra.mxu0 %v9604_v23  ;;  %2754 = vmatmul.bf16.gmra.mxu1 %v2550_v54 }
 0x2c0   :  { %2843 = vmatmul.bf16.gmra.mxu2 %v2550_v54  ;;  %2932 = vmatmul.bf16.gmra.mxu3 %v2550_v54  ;;  %v2401_v23 = vrot.slane %v9612_v27, 5  ;;  %v2402_v33 = vrot.slane %v9613_v31, 6  ;;  %v9618_v27 = vld [vmem:[#allocation38_spill] sm:$0xff] }
 0x2c1   :  { %v9619_v31 = vshll.u32 %v9618_v27, 16 }
 0x2c2   :  { %v2403_v50 = vor.u32 %v2402_v33, %v2401_v23  ;;  %v5639_v33 = vld [vmem:[#allocation2 + $0x350] sm:$0xf] }
 0x2c3   :  { %v2804_v0 = vpop.f32.mrf.mxu2  ;;  %v2893_v17 = vpop.f32.mrf.mxu3 }
 0x2c4   :  { %v7954_v52 = vadd.f32 %v2804_v0, %v9607_v20  ;;  %v7956_v2 = vadd.f32 %v2893_v17, %v2145_v22  ;;  %v2064_v47 = vpop.f32.mrf.mxu0  ;;  %v2717_v40 = vpop.f32.mrf.mxu1  ;;  %v9615_v22 = vshrl.u32 %v9614_v48, 16  ;;  %v9616_v0 = vshll.u32 %v9614_v48, 16  ;;  %v9620_v48 = vld [vmem:[#allocation122_spill] sm:$0xff] }
 0x2c5   :  { %v2148_v43 = vadd.f32 %v2064_v47, %v1442_v46  ;;  %v7959_v54 = vadd.f32 %v2717_v40, %v7392_v11  ;;  %v6187_v11 = vld [vmem:[%s9136_s0 + $0x8c] sm:$0x3]  ;;  %v2551_v20 = vpack.c.b16 %v2530_v61, %v2529_v6  ;;  %v2404_v6 = vrot.slane %v2403_v50, 4 }
 0x2c6   :  { %9608 = vst [vmem:[#allocation102_spill] sm:$0xff] %v7954_v52  ;;  %v2405_v14 = vrot.slane %v9615_v22, 5  ;;  %v2406_v46 = vrot.slane %v9616_v0, 6  ;;  %v2410_v17 = vshrl.u32 %v6187_v11, 16  ;;  %v2413_v22 = vrot.slane %v9619_v31, 6 }
 0x2c7   :  { %9609 = vst [vmem:[#allocation104_spill] sm:$0xff] %v7956_v2 }
 0x2c8   :  { %9610 = vst [vmem:[#allocation103_spill] sm:$0xff] %v7959_v54  ;;  %v2407_v3 = vor.u32 %v2406_v46, %v2405_v14  ;;  %v2412_v15 = vrot.slane %v2410_v17, 5  ;;  %v6036_v14 = vld [vmem:[#allocation2 + $0x358] sm:$0xf0]  ;;  %v9622_v17 = vld [vmem:[#allocation44_spill] sm:$0xff] }
 0x2c9   :  { %v5640_v46 = vor.u32 %v6036_v14, %v5639_v33  ;;  %v9628_v14 = vld [vmem:[#allocation41_spill] sm:$0xff] }
 0x2ca   :  { %v2409_v61 = vrot.slane %v2407_v3, 4  ;;  %v2414_v23 = vor.u32 %v2413_v22, %v2412_v15  ;;  %v6032_v22 = vld [vmem:[#allocation2 + $0x338] sm:$0xf0] }
 0x2cb   :  { %v2806_v47 = vpop.f32.mrf.mxu2  ;;  %v2895_v40 = vpop.f32.mrf.mxu3  ;;  %3586 = vmatpush.bf16.msrb.mxu2 %v5640_v46 }
 0x2cc   :  { %v7977_v0 = vadd.f32 %v2806_v47, %v9620_v48  ;;  %v7979_v54 = vadd.f32 %v2895_v40, %v2148_v43  ;;  %v2067_v2 = vpop.f32.mrf.mxu0  ;;  %v2720_v11 = vpop.f32.mrf.mxu1  ;;  %v1447_v43 = vadd.f32 %v7420_v58, %v9622_v17  ;;  %v5619_v58 = vld [vmem:[#allocation2 + $0x330] sm:$0xf]  ;;  %v9630_v17 = vshll.u32 %v9628_v14, 16 }
 0x2cd   :  { %v2151_v51 = vadd.f32 %v2067_v2, %v1445_v55  ;;  %v7982_v52 = vadd.f32 %v2720_v11, %v7416_v44  ;;  %v2408_v44 = vsel %vm7554_vm8, %v2404_v6, %v2407_v3  ;;  %v2415_v2 = vsel %vm7554_vm8, %v2409_v61, %v2414_v23  ;;  %v9623_v55 = vld [vmem:[#allocation124_spill] sm:$0xff] }
 0x2ce   :  { %v2531_v48 = vunpack.c.l.b16 %v2408_v44  ;;  %v2532_v11 = vunpack.c.l.b16 %v2415_v2  ;;  %v9625_v3 = vld [vmem:[#allocation40_spill] sm:$0xff]  ;;  %v5620_v61 = vor.u32 %v6032_v22, %v5619_v58 }
 0x2cf   :  { %2106 = vmatmul.bf16.gmra.mxu0 %v9621_v19  ;;  %2759 = vmatmul.bf16.gmra.mxu1 %v2551_v20  ;;  %v9626_v19 = vshrl.u32 %v9625_v3, 16  ;;  %v9627_v23 = vshll.u32 %v9625_v3, 16  ;;  %v9632_v3 = vld [vmem:[#allocation43_spill] sm:$0xff] }
 0x2d0   :  { %2848 = vmatmul.bf16.gmra.mxu2 %v2551_v20  ;;  %2937 = vmatmul.bf16.gmra.mxu3 %v2551_v20  ;;  %v2552_v2 = vpack.c.b16 %v2532_v11, %v2531_v48 }
 0x2d1   :  { %v2416_v6 = vrot.slane %v9626_v19, 5  ;;  %v2417_v33 = vrot.slane %v9627_v23, 6  ;;  %3409 = vmatpush.bf16.msrb.mxu0 %v5620_v61  ;;  %v9633_v19 = vshll.u32 %v9632_v3, 16 }
 0x2d3   :  { %v2809_v49 = vpop.f32.mrf.mxu2  ;;  %v2898_v47 = vpop.f32.mrf.mxu3  ;;  %v2428_v23 = vrot.slane %v9633_v19, 6  ;;  %v6031_v19 = vld [vmem:[#allocation2 + $0x334] sm:$0xf] }
 0x2d4   :  { %v7992_v40 = vadd.f32 %v2809_v49, %v9623_v55  ;;  %v7994_v50 = vadd.f32 %v2898_v47, %v2151_v51  ;;  %v2069_v20 = vpop.f32.mrf.mxu0  ;;  %v2722_v15 = vpop.f32.mrf.mxu1  ;;  %v9629_v51 = vshrl.u32 %v9628_v14, 16  ;;  %v9631_v47 = vld [vmem:[#allocation47_spill] sm:$0xff] }
 0x2d5   :  { %v2154_v27 = vadd.f32 %v2069_v20, %v1447_v43  ;;  %v7997_v31 = vadd.f32 %v2722_v15, %v7428_v41  ;;  %v2421_v43 = vrot.slane %v9630_v17, 6  ;;  %v6188_v41 = vld [vmem:[%s9136_s0 + $0x98] sm:$0x3]  ;;  %v1450_v44 = vadd.f32 %v7432_v62, %v9631_v47  ;;  %v9636_v62 = vld [vmem:[#allocation125_spill] sm:$0xff]  ;;  %v9639_v47 = vld [vmem:[#allocation126_spill] sm:$0xff] }
 0x2d6   :  { %v2420_v46 = vrot.slane %v9629_v51, 5  ;;  %v2425_v49 = vshrl.u32 %v6188_v41, 16  ;;  %v2418_v15 = vor.u32 %v2417_v33, %v2416_v6  ;;  %v9637_v33 = vld [vmem:[#allocation49_spill] sm:$0xff] }
 0x2d7   :  { %9624 = vst [vmem:[#allocation24_spill] sm:$0xff] %v7997_v31 }
 0x2d8   :  { %v2422_v58 = vor.u32 %v2421_v43, %v2420_v46  ;;  %v2427_v22 = vrot.slane %v2425_v49, 5  ;;  %v2419_v48 = vrot.slane %v2418_v15, 4  ;;  %v9638_v46 = vld [vmem:[#allocation127_spill] sm:$0xff] }
 0x2da   :  { %v2424_v11 = vrot.slane %v2422_v58, 4  ;;  %v2429_v6 = vor.u32 %v2428_v23, %v2427_v22  ;;  %v2423_v49 = vsel %vm7554_vm8, %v2419_v48, %v2422_v58  ;;  %v5621_v23 = vld [vmem:[#allocation2 + $0x33c] sm:$0xf0] }
 0x2db   :  { %v2811_v55 = vpop.f32.mrf.mxu2  ;;  %v2900_v20 = vpop.f32.mrf.mxu3 }
 0x2dc   :  { %v8015_v14 = vadd.f32 %v2811_v55, %v7430_v42  ;;  %v8017_v51 = vadd.f32 %v2900_v20, %v2154_v27  ;;  %v2072_v17 = vpop.f32.mrf.mxu0  ;;  %v2725_v41 = vpop.f32.mrf.mxu1  ;;  %v1452_v42 = vadd.f32 %v9638_v46, %v9637_v33  ;;  %v5624_v33 = vor.u32 %v6031_v19, %v5621_v23  ;;  %v9647_v46 = vld [vmem:[#allocation46_spill] sm:$0xff] }
 0x2dd   :  { %v2157_v61 = vadd.f32 %v2072_v17, %v1450_v44  ;;  %v8020_v31 = vadd.f32 %v2725_v41, %v7452_v16  ;;  %v2430_v16 = vsel %vm7554_vm8, %v2424_v11, %v2429_v6  ;;  %v2533_v17 = vunpack.c.l.b16 %v2423_v49  ;;  %v9650_v49 = vld [vmem:[#allocation52_spill] sm:$0xff] }
 0x2de   :  { %9634 = vst [vmem:[#allocation25_spill] sm:$0xff] %v8017_v51  ;;  %v2534_v41 = vunpack.c.l.b16 %v2430_v16  ;;  %3498 = vmatpush.bf16.msrb.mxu1 %v5624_v33  ;;  %v9651_v16 = vld [vmem:[#allocation130_spill] sm:$0xff] }
 0x2df   :  { %9635 = vst [vmem:[#allocation106_spill] sm:$0xff] %v8020_v31  ;;  %2111 = vmatmul.bf16.gmra.mxu0 %v9636_v62  ;;  %2764 = vmatmul.bf16.gmra.mxu1 %v2552_v2  ;;  %v9644_v62 = vld [vmem:[#allocation45_spill] sm:$0xff] }
 0x2e0   :  { %2853 = vmatmul.bf16.gmra.mxu2 %v2552_v2  ;;  %2942 = vmatmul.bf16.gmra.mxu3 %v2552_v2  ;;  %v9642_v2 = vld [vmem:[#allocation128_spill] sm:$0xff]  ;;  %v9645_v58 = vshrl.u32 %v9644_v62, 16  ;;  %v9646_v11 = vshll.u32 %v9644_v62, 16 }
 0x2e2   :  { %v2431_v48 = vrot.slane %v9645_v58, 5  ;;  %v2432_v6 = vrot.slane %v9646_v11, 6 }
 0x2e3   :  { %v2814_v43 = vpop.f32.mrf.mxu2  ;;  %v2903_v27 = vpop.f32.mrf.mxu3 }
 0x2e4   :  { %v8030_v44 = vadd.f32 %v2814_v43, %v9639_v47  ;;  %v8032_v55 = vadd.f32 %v2903_v27, %v2157_v61  ;;  %v2074_v20 = vpop.f32.mrf.mxu0  ;;  %v2727_v15 = vpop.f32.mrf.mxu1  ;;  %v9648_v61 = vshrl.u32 %v9647_v46, 16  ;;  %v9649_v27 = vshll.u32 %v9647_v46, 16  ;;  %v6189_v47 = vld [vmem:[%s9136_s0 + $0xa4] sm:$0x3]  ;;  %v9654_v46 = vld [vmem:[#allocation129_spill] sm:$0xff] }
 0x2e5   :  { %v2160_v22 = vadd.f32 %v2074_v20, %v1452_v42  ;;  %v8035_v3 = vadd.f32 %v2727_v15, %v9642_v2  ;;  %v2440_v20 = vshrl.u32 %v6189_v47, 16  ;;  %v1455_v15 = vadd.f32 %v9651_v16, %v9650_v49 }
 0x2e6   :  { %9640 = vst [vmem:[#allocation26_spill] sm:$0xff] %v8030_v44  ;;  %v2435_v43 = vrot.slane %v9648_v61, 5  ;;  %v2436_v42 = vrot.slane %v9649_v27, 6  ;;  %v2553_v2 = vpack.c.b16 %v2534_v41, %v2533_v17  ;;  %v2433_v62 = vor.u32 %v2432_v6, %v2431_v48  ;;  %v9655_v17 = vld [vmem:[#allocation131_spill] sm:$0xff] }
 0x2e7   :  { %9641 = vst [vmem:[#allocation108_spill] sm:$0xff] %v8032_v55  ;;  %v2442_v11 = vrot.slane %v2440_v20, 5  ;;  %v9656_v20 = vld [vmem:[#allocation54_spill] sm:$0xff] }
 0x2e8   :  { %9643 = vst [vmem:[#allocation110_spill] sm:$0xff] %v8035_v3  ;;  %v2437_v58 = vor.u32 %v2436_v42, %v2435_v43  ;;  %v9652_v3 = vld [vmem:[#allocation48_spill] sm:$0xff]  ;;  %v2434_v41 = vrot.slane %v2433_v62, 4 }
 0x2e9   :  { %v9653_v61 = vshll.u32 %v9652_v3, 16  ;;  %v5627_v3 = vld [vmem:[#allocation2 + $0x338] sm:$0xf]  ;;  %v6033_v43 = vld [vmem:[#allocation2 + $0x340] sm:$0xf0] }
 0x2ea   :  { %v2439_v48 = vrot.slane %v2437_v58, 4  ;;  %v5628_v42 = vor.u32 %v6033_v43, %v5627_v3 }
 0x2eb   :  { %v2816_v19 = vpop.f32.mrf.mxu2  ;;  %v2905_v23 = vpop.f32.mrf.mxu3  ;;  %v2443_v55 = vrot.slane %v9653_v61, 6  ;;  %v6029_v61 = vld [vmem:[#allocation2 + $0x320] sm:$0xf0] }
 0x2ec   :  { %v8053_v27 = vadd.f32 %v2816_v19, %v9654_v46  ;;  %v8055_v44 = vadd.f32 %v2905_v23, %v2160_v22  ;;  %v2077_v31 = vpop.f32.mrf.mxu0  ;;  %v2730_v47 = vpop.f32.mrf.mxu1  ;;  %v1457_v22 = vadd.f32 %v7492_v32, %v9656_v20  ;;  %3587 = vmatpush.bf16.msrb.mxu2 %v5628_v42 }
 0x2ed   :  { %v2163_v33 = vadd.f32 %v2077_v31, %v1455_v15  ;;  %v8058_v51 = vadd.f32 %v2730_v47, %v7488_v53  ;;  %v2444_v6 = vor.u32 %v2443_v55, %v2442_v11  ;;  %v2438_v53 = vsel %vm7554_vm8, %v2434_v41, %v2437_v58  ;;  %v9657_v15 = vld [vmem:[#allocation132_spill] sm:$0xff]  ;;  %v5607_v11 = vld [vmem:[#allocation2 + $0x318] sm:$0xf]  ;;  %v9661_v47 = vld [vmem:[#allocation50_spill] sm:$0xff] }
 0x2ee   :  { %v2535_v46 = vunpack.c.l.b16 %v2438_v53  ;;  %v9668_v53 = vld [vmem:[#allocation134_spill] sm:$0xff] }
 0x2ef   :  { %2116 = vmatmul.bf16.gmra.mxu0 %v9655_v17  ;;  %2769 = vmatmul.bf16.gmra.mxu1 %v2553_v2  ;;  %v2445_v31 = vsel %vm7554_vm8, %v2439_v48, %v2444_v6  ;;  %v9662_v17 = vshrl.u32 %v9661_v47, 16  ;;  %v5608_v48 = vor.u32 %v6029_v61, %v5607_v11  ;;  %v9663_v6 = vshll.u32 %v9661_v47, 16 }
 0x2f0   :  { %2858 = vmatmul.bf16.gmra.mxu2 %v2553_v2  ;;  %2947 = vmatmul.bf16.gmra.mxu3 %v2553_v2  ;;  %v2536_v58 = vunpack.c.l.b16 %v2445_v31 }
 0x2f1   :  { %v2446_v41 = vrot.slane %v9662_v17, 5  ;;  %v2447_v3 = vrot.slane %v9663_v6, 6  ;;  %3410 = vmatpush.bf16.msrb.mxu0 %v5608_v48  ;;  %v9670_v17 = vld [vmem:[#allocation53_spill] sm:$0xff] }
 0x2f2   :  { %v9671_v6 = vshll.u32 %v9670_v17, 16 }
 0x2f3   :  { %v2819_v49 = vpop.f32.mrf.mxu2  ;;  %v2908_v16 = vpop.f32.mrf.mxu3  ;;  %v2448_v11 = vor.u32 %v2447_v3, %v2446_v41  ;;  %v9676_v3 = vld [vmem:[#allocation59_spill] sm:$0xff] }
 0x2f4   :  { %v8068_v19 = vadd.f32 %v2819_v49, %v9657_v15  ;;  %v8070_v55 = vadd.f32 %v2908_v16, %v2163_v33  ;;  %v2079_v2 = vpop.f32.mrf.mxu0  ;;  %v2732_v23 = vpop.f32.mrf.mxu1  ;;  %v9664_v33 = vld [vmem:[#allocation51_spill] sm:$0xff]  ;;  %v9667_v16 = vld [vmem:[#allocation57_spill] sm:$0xff]  ;;  %v2554_v15 = vpack.c.b16 %v2536_v58, %v2535_v46 }
 0x2f5   :  { %v8072_v62 = vadd.f32 %v2079_v2, %v1457_v22  ;;  %v8075_v32 = vadd.f32 %v2732_v23, %v7500_v36  ;;  %v9665_v43 = vshrl.u32 %v9664_v33, 16  ;;  %v9666_v20 = vshll.u32 %v9664_v33, 16  ;;  %v6190_v36 = vld [vmem:[%s9136_s0 + $0xb0] sm:$0x3] }
 0x2f6   :  { %9658 = vst [vmem:[#allocation109_spill] sm:$0xff] %v8070_v55  ;;  %v2455_v49 = vshrl.u32 %v6190_v36, 16  ;;  %v1460_v31 = vadd.f32 %v9668_v53, %v9667_v16  ;;  %v2458_v33 = vrot.slane %v9671_v6, 6  ;;  %v9675_v16 = vld [vmem:[#allocation135_spill] sm:$0xff]  ;;  %v2449_v46 = vrot.slane %v2448_v11, 4 }
 0x2f7   :  { %9659 = vst [vmem:[#allocation112_spill] sm:$0xff] %v8072_v62  ;;  %v2450_v42 = vrot.slane %v9665_v43, 5  ;;  %v2451_v22 = vrot.slane %v9666_v20, 6  ;;  %v9672_v43 = vld [vmem:[#allocation133_spill] sm:$0xff]  ;;  %v6028_v6 = vld [vmem:[#allocation2 + $0x31c] sm:$0xf] }
 0x2f8   :  { %9660 = vst [vmem:[#allocation27_spill] sm:$0xff] %v8075_v32  ;;  %v2457_v47 = vrot.slane %v2455_v49, 5 }
 0x2f9   :  { %v2452_v61 = vor.u32 %v2451_v22, %v2450_v42  ;;  %v9677_v42 = vld [vmem:[#allocation137_spill] sm:$0xff] }
 0x2fa   :  { %v2459_v41 = vor.u32 %v2458_v33, %v2457_v47  ;;  %v1462_v22 = vadd.f32 %v9677_v42, %v9676_v3  ;;  %v5609_v33 = vld [vmem:[#allocation2 + $0x324] sm:$0xf0]  ;;  %v6030_v42 = vld [vmem:[#allocation2 + $0x328] sm:$0xf0] }
 0x2fb   :  { %v2821_v2 = vpop.f32.mrf.mxu2  ;;  %v8090_v23 = vpop.f32.mrf.mxu3  ;;  %v2454_v58 = vrot.slane %v2452_v61, 4 }
 0x2fc   :  { %9669 = vst [vmem:[#allocation28_spill] sm:$0xff] %v8090_v23  ;;  %v8095_v20 = vadd.f32 %v2821_v2, %v9672_v43  ;;  %v2082_v62 = vpop.f32.mrf.mxu0  ;;  %v2735_v32 = vpop.f32.mrf.mxu1  ;;  %v2453_v2 = vsel %vm7554_vm8, %v2449_v46, %v2452_v61  ;;  %v5615_v43 = vld [vmem:[#allocation2 + $0x320] sm:$0xf]  ;;  %v9683_v46 = vld [vmem:[#allocation55_spill] sm:$0xff] }
 0x2fd   :  { %v2169_v36 = vadd.f32 %v2082_v62, %v1460_v31  ;;  %v8098_v48 = vadd.f32 %v2735_v32, %v7533_v60  ;;  %v2460_v60 = vsel %vm7554_vm8, %v2454_v58, %v2459_v41  ;;  %v9678_v62 = vld [vmem:[#allocation136_spill] sm:$0xff]  ;;  %v9684_v3 = vshrl.u32 %v9683_v46, 16 }
 0x2fe   :  { %9673 = vst [vmem:[#allocation32_spill] sm:$0xff] %v8095_v20  ;;  %v2538_v61 = vunpack.c.l.b16 %v2460_v60  ;;  %v5612_v41 = vor.u32 %v6028_v6, %v5609_v33  ;;  %v9691_v33 = vld [vmem:[#allocation60_spill] sm:$0xff] }
 0x2ff   :  { %9674 = vst [vmem:[#allocation116_spill] sm:$0xff] %v8098_v48  ;;  %2121 = vmatmul.bf16.gmra.mxu0 %v9675_v16  ;;  %2774 = vmatmul.bf16.gmra.mxu1 %v2554_v15  ;;  %v2537_v16 = vunpack.c.l.b16 %v2453_v2  ;;  %v2461_v58 = vrot.slane %v9684_v3, 5  ;;  %v6191_v2 = vld [vmem:[%s9136_s0 + $0xbc] sm:$0x3]  ;;  %v5597_v48 = vld [vmem:[#allocation2 + $0x30c] sm:$0xf0] }
 0x300   :  { %2863 = vmatmul.bf16.gmra.mxu2 %v2554_v15  ;;  %2952 = vmatmul.bf16.gmra.mxu3 %v2554_v15  ;;  %v2470_v60 = vshrl.u32 %v6191_v2, 16  ;;  %v5603_v2 = vld [vmem:[#allocation2 + $0x308] sm:$0xf] }
 0x301   :  { %3499 = vmatpush.bf16.msrb.mxu1 %v5612_v41  ;;  %v6027_v41 = vld [vmem:[#allocation2 + $0x310] sm:$0xf0] }
 0x302   :  { %v2472_v23 = vrot.slane %v2470_v60, 5 }
 0x303   :  { %v2824_v49 = vpop.f32.mrf.mxu2  ;;  %v2913_v53 = vpop.f32.mrf.mxu3 }
 0x304   :  { %v8108_v32 = vadd.f32 %v2824_v49, %v9678_v62  ;;  %v8110_v31 = vadd.f32 %v2913_v53, %v2169_v36  ;;  %v2084_v11 = vpop.f32.mrf.mxu0  ;;  %v2737_v47 = vpop.f32.mrf.mxu1  ;;  %v9685_v36 = vshll.u32 %v9683_v46, 16  ;;  %v9686_v53 = vld [vmem:[#allocation56_spill] sm:$0xff]  ;;  %v1465_v46 = vadd.f32 %v7550_v35, %v9691_v33 }
 0x305   :  { %v8112_v17 = vadd.f32 %v2084_v11, %v1462_v22  ;;  %v8115_v15 = vadd.f32 %v2737_v47, %v7546_v12  ;;  %v9687_v62 = vshrl.u32 %v9686_v53, 16  ;;  %v9688_v11 = vshll.u32 %v9686_v53, 16 }
 0x306   :  { %9679 = vst [vmem:[#allocation113_spill] sm:$0xff] %v8108_v32  ;;  %v2462_v49 = vrot.slane %v9685_v36, 6  ;;  %v5616_v47 = vor.u32 %v6030_v42, %v5615_v43  ;;  %v5595_v36 = vld [vmem:[#allocation2 + $0x300] sm:$0xf]  ;;  %v2555_v43 = vpack.c.b16 %v2538_v61, %v2537_v16  ;;  %v5604_v33 = vor.u32 %v6027_v41, %v5603_v2  ;;  %v9692_v16 = vld [vmem:[#allocation61_spill] sm:$0xff] }
 0x307   :  { %9680 = vst [vmem:[#allocation29_spill] sm:$0xff] %v8110_v31  ;;  %v2465_v22 = vrot.slane %v9687_v62, 5  ;;  %v2466_v12 = vrot.slane %v9688_v11, 6  ;;  %v6025_v62 = vld [vmem:[#allocation2 + $0x304] sm:$0xf]  ;;  %v1467_v61 = vadd.f32 %v7583_v4, %v9692_v16 }
 0x308   :  { %9681 = vst [vmem:[#allocation115_spill] sm:$0xff] %v8112_v17  ;;  %v9689_v17 = vld [vmem:[#allocation58_spill] sm:$0xff]  ;;  %3588 = vmatpush.bf16.msrb.mxu2 %v5616_v47  ;;  %v2463_v42 = vor.u32 %v2462_v49, %v2461_v58  ;;  %v5600_v35 = vor.u32 %v6025_v62, %v5597_v48 }
 0x309   :  { %9682 = vst [vmem:[#allocation117_spill] sm:$0xff] %v8115_v15  ;;  %v9690_v3 = vshll.u32 %v9689_v17, 16  ;;  %v6026_v15 = vld [vmem:[#allocation2 + $0x308] sm:$0xf0]  ;;  %v2467_v11 = vor.u32 %v2466_v12, %v2465_v22 }
 0x30a   :  { %v5596_v32 = vor.u32 %v6026_v15, %v5595_v36  ;;  %3500 = vmatpush.bf16.msrb.mxu1 %v5600_v35  ;;  %v2464_v15 = vrot.slane %v2463_v42, 4 }
 0x30b   :  { %v2473_v6 = vrot.slane %v9690_v3, 6  ;;  %v2826_v31 = vpop.f32.mrf.mxu2  ;;  %v8132_v53 = vpop.f32.mrf.mxu3 }
 0x30c   :  { %v8135_v17 = vadd.f32 %v2826_v31, %v7548_v24  ;;  %v2087_v47 = vpop.f32.mrf.mxu0  ;;  %v2740_v3 = vpop.f32.mrf.mxu1  ;;  %3411 = vmatpush.bf16.msrb.mxu0 %v5596_v32  ;;  %3589 = vmatpush.bf16.msrb.mxu2 %v5604_v33  ;;  %v2469_v24 = vrot.slane %v2467_v11, 4  ;;  %v9696_v33 = vld [vmem:[#allocation63_spill] sm:$0xff] }
 0x30d   :  { %v2175_v20 = vadd.f32 %v2087_v47, %v1465_v46  ;;  %v8138_v55 = vadd.f32 %v2740_v3, %v7579_v7  ;;  %v2474_v31 = vor.u32 %v2473_v6, %v2472_v23  ;;  %v9693_v46 = vld [vmem:[#allocation62_spill] sm:$0xff]  ;;  %v6194_v3 = vld [vmem:[%s9136_s0 + $0x8] sm:$0x3] }
 0x30e   :  { %v3072_v35 = vrot.slane %v6194_v3, 6  ;;  %v9700_v3 = vld [vmem:[#allocation66_spill] sm:$0xff] }
 0x30f   :  { %2126 = vmatmul.bf16.gmra.mxu0 %v7543_v21  ;;  %2779 = vmatmul.bf16.gmra.mxu1 %v2555_v43  ;;  %v2468_v21 = vsel %vm7554_vm8, %v2464_v15, %v2467_v11  ;;  %v2475_v12 = vsel %vm7554_vm8, %v2469_v24, %v2474_v31  ;;  %v6192_v11 = vld [vmem:[%s9136_s0 + $0x4] sm:$0xf] }
 0x310   :  { %2868 = vmatmul.bf16.gmra.mxu2 %v2555_v43  ;;  %2957 = vmatmul.bf16.gmra.mxu3 %v2555_v43  ;;  %v2539_v4 = vunpack.c.l.b16 %v2468_v21  ;;  %v2540_v6 = vunpack.c.l.b16 %v2475_v12 }
 0x312   :  { %v2556_v62 = vpack.c.b16 %v2540_v6, %v2539_v4  ;;  %v9697_v4 = vld [vmem:[#allocation64_spill] sm:$0xff] }
 0x313   :  { %v2829_v48 = vpop.f32.mrf.mxu2  ;;  %v2918_v58 = vpop.f32.mrf.mxu3 }
 0x314   :  { %v8144_v49 = vadd.f32 %v2829_v48, %v7581_v1  ;;  %v8146_v7 = vadd.f32 %v2918_v58, %v2175_v20  ;;  %v2089_v32 = vpop.f32.mrf.mxu0  ;;  %v2742_v22 = vpop.f32.mrf.mxu1  ;;  %v1470_v1 = vadd.f32 %v7595_v45, %v9693_v46 }
 0x315   :  { %v8152_v60 = vadd.f32 %v2089_v32, %v1467_v61  ;;  %v8155_v23 = vadd.f32 %v2742_v22, %v7591_v8  ;;  %v3069_v8 = vrot.slane %v6192_v11, 6 }
 0x317   :  { %v3071_v47 = vrot.slane %v3069_v8, 4 }
 0x319   :  { %v3073_v32 = vsel %vm8177_vm11, %v3071_v47, %v3072_v35  ;;  %v9701_v35 = vld [vmem:[#allocation140_spill] sm:$0xff] }
 0x31a   :  { %v3213_v12 = vunpack.c.l.b16 %v3073_v32 }
 0x31b   :  { %v2831_v20 = vpop.f32.mrf.mxu2  ;;  %v8159_v36 = vpop.f32.mrf.mxu3 }
 0x31c   :  { %v8162_v43 = vadd.f32 %v2831_v20, %v7593_v59  ;;  %v2092_v42 = vpop.f32.mrf.mxu0  ;;  %v2745_v39 = vpop.f32.mrf.mxu1  ;;  %v6193_v59 = vld [vmem:[%s9136_s0] sm:$0xf] }
 0x31d   :  { %v2181_v2 = vadd.f32 %v2092_v42, %v1470_v1  ;;  %v8168_v41 = vadd.f32 %v2745_v39, %v7606_v26  ;;  %v5577_v45 = vrot.slane %v6193_v59, 10  ;;  %v6195_v39 = vld [vmem:[%s9136_s0 + $0x10] sm:$0xf] }
 0x31f   :  { %2131 = vmatmul.bf16.gmra.mxu0 %v7597_v56  ;;  %2784 = vmatmul.bf16.gmra.mxu1 %v2556_v62  ;;  %v1472_v56 = vadd.f32 %v7610_v13, %v9696_v33  ;;  %v3070_v58 = vsel %vm8177_vm11, %v5577_v45, %v3069_v8  ;;  %v9698_v8 = vld [vmem:[#allocation138_spill] sm:$0xff]  ;;  %v1477_v33 = vadd.f32 %v9701_v35, %v9700_v3  ;;  %v9711_v3 = vld [vmem:[#allocation8_spill] sm:$0xff] }
 0x320   :  { %2873 = vmatmul.bf16.gmra.mxu2 %v2556_v62  ;;  %2962 = vmatmul.bf16.gmra.mxu3 %v2556_v62  ;;  %v3212_v13 = vunpack.c.l.b16 %v3070_v58  ;;  %v6197_v45 = vld [vmem:[%s9136_s0 + $0x14] sm:$0x3] }
 0x321   :  { %v3079_v47 = vrot.slane %v6197_v45, 6 }
 0x322   :  { %v3244_v1 = vpack.c.b16 %v3213_v12, %v3212_v13 }
 0x323   :  { %v2834_v15 = vpop.f32.mrf.mxu2  ;;  %v2923_v24 = vpop.f32.mrf.mxu3 }
 0x324   :  { %v8184_v31 = vadd.f32 %v2834_v15, %v7608_v18  ;;  %v8186_v16 = vadd.f32 %v2923_v24, %v2181_v2  ;;  %v2094_v61 = vpop.f32.mrf.mxu0  ;;  %v2747_v48 = vpop.f32.mrf.mxu1  ;;  %v1475_v18 = vadd.f32 %v7631_v37, %v9697_v4  ;;  %v6196_v37 = vld [vmem:[%s9136_s0 + $0xc] sm:$0xf]  ;;  %v9702_v24 = vld [vmem:[#allocation139_spill] sm:$0xff] }
 0x325   :  { %v8192_v22 = vadd.f32 %v2094_v61, %v1472_v56  ;;  %v8195_v21 = vadd.f32 %v2747_v48, %v7627_v9  ;;  %v3076_v9 = vrot.slane %v6195_v39, 6  ;;  %v9709_v39 = vld [vmem:[#allocation67_spill] sm:$0xff] }
 0x327   :  { %v3078_v59 = vrot.slane %v3076_v9, 4 }
 0x329   :  { %v3080_v12 = vsel %vm8177_vm11, %v3078_v59, %v3079_v47  ;;  %v6198_v59 = vld [vmem:[%s9136_s0 + $0x1c] sm:$0xf] }
 0x32a   :  { %v3083_v47 = vrot.slane %v6198_v59, 6 }
 0x32b   :  { %v2836_v6 = vpop.f32.mrf.mxu2  ;;  %v8199_v46 = vpop.f32.mrf.mxu3 }
 0x32c   :  { %v8202_v20 = vadd.f32 %v2836_v6, %v7629_v38  ;;  %v2097_v62 = vpop.f32.mrf.mxu0  ;;  %v2750_v42 = vpop.f32.mrf.mxu1  ;;  %v5578_v38 = vrot.slane %v6196_v37, 10 }
 0x32d   :  { %v2187_v11 = vadd.f32 %v2097_v62, %v1475_v18  ;;  %v8208_v2 = vadd.f32 %v2750_v42, %v9698_v8  ;;  %v9706_v18 = vld [vmem:[#allocation65_spill] sm:$0xff]  ;;  %v3215_v62 = vunpack.c.l.b16 %v3080_v12  ;;  %v9708_v42 = vld [vmem:[#allocation70_spill] sm:$0xff] }
 0x32e   :  { %v3077_v13 = vsel %vm8177_vm11, %v5578_v38, %v3076_v9  ;;  %v1480_v8 = vadd.f32 %v9709_v39, %v9708_v42 }
 0x32f   :  { %9699 = vst [vmem:[#allocation34_spill] sm:$0xff] %v8208_v2  ;;  %3412 = vmatmul.bf16.vlgmr.msrb.gmra.mxu0 %v3244_v1  ;;  %3501 = vmatmul.bf16.vlgmr.msrb.gmra.mxu1 %v3244_v1 }
 0x330   :  { %3590 = vmatmul.bf16.vlgmr.msrb.gmra.mxu2 %v3244_v1  ;;  %v3214_v1 = vunpack.c.l.b16 %v3077_v13  ;;  %v6200_v13 = vld [vmem:[%s9136_s0 + $0x20] sm:$0x3] }
 0x331   :  { %v3086_v12 = vrot.slane %v6200_v13, 6 }
 0x332   :  { %v3245_v45 = vpack.c.b16 %v3215_v62, %v3214_v1  ;;  %v9716_v1 = vld [vmem:[#allocation71_spill] sm:$0xff] }
 0x333   :  { %v2839_v56 = vpop.f32.mrf.mxu2  ;;  %v2928_v15 = vpop.f32.mrf.mxu3 }
 0x334   :  { %v8219_v61 = vadd.f32 %v2839_v56, %v9702_v24  ;;  %v8221_v48 = vadd.f32 %v2928_v15, %v2187_v11  ;;  %v2099_v58 = vpop.f32.mrf.mxu0  ;;  %v2752_v32 = vpop.f32.mrf.mxu1  ;;  %v9713_v56 = vld [vmem:[#allocation69_spill] sm:$0xff]  ;;  %v6199_v24 = vld [vmem:[%s9136_s0 + $0x18] sm:$0xf] }
 0x335   :  { %v8227_v4 = vadd.f32 %v2099_v58, %v1477_v33  ;;  %v8230_v6 = vadd.f32 %v2752_v32, %v9706_v18  ;;  %v5579_v58 = vrot.slane %v6199_v24, 10  ;;  %v3085_v32 = vrot.slane %v3083_v47, 4  ;;  %v9715_v18 = vld [vmem:[#allocation73_spill] sm:$0xff] }
 0x336   :  { %9703 = vst [vmem:[#allocation118_spill] sm:$0xff] %v8219_v61  ;;  %v1482_v62 = vadd.f32 %v9716_v1, %v9715_v18  ;;  %v9721_v24 = vld [vmem:[#allocation9_spill] sm:$0xff] }
 0x337   :  { %9704 = vst [vmem:[#allocation30_spill] sm:$0xff] %v8221_v48  ;;  %v3087_v59 = vsel %vm8177_vm11, %v3085_v32, %v3086_v12  ;;  %v6201_v32 = vld [vmem:[%s9136_s0 + $0x28] sm:$0xf] }
 0x338   :  { %9705 = vst [vmem:[#allocation31_spill] sm:$0xff] %v8227_v4  ;;  %v3217_v1 = vunpack.c.l.b16 %v3087_v59  ;;  %v3090_v12 = vrot.slane %v6201_v32, 6  ;;  %v6203_v59 = vld [vmem:[%s9136_s0 + $0x2c] sm:$0x3] }
 0x339   :  { %9707 = vst [vmem:[#allocation37_spill] sm:$0xff] %v8230_v6 }
 0x33b   :  { %v2841_v11 = vpop.f32.mrf.mxu2  ;;  %v8234_v37 = vpop.f32.mrf.mxu3 }
 0x33c   :  { %9710 = vst [vmem:[#allocation33_spill] sm:$0xff] %v8234_v37  ;;  %v8237_v35 = vadd.f32 %v2841_v11, %v9711_v3  ;;  %v2102_v9 = vpop.f32.mrf.mxu0  ;;  %v2755_v38 = vpop.f32.mrf.mxu1 }
 0x33d   :  { %v2193_v33 = vadd.f32 %v2102_v9, %v1480_v8  ;;  %v8243_v15 = vadd.f32 %v2755_v38, %v9713_v56  ;;  %v9717_v8 = vld [vmem:[#allocation68_spill] sm:$0xff]  ;;  %v3084_v38 = vsel %vm8177_vm11, %v5579_v58, %v3083_v47 }
 0x33e   :  { %9712 = vst [vmem:[#allocation119_spill] sm:$0xff] %v8237_v35  ;;  %v3216_v18 = vunpack.c.l.b16 %v3084_v38  ;;  %v3092_v38 = vrot.slane %v3090_v12, 4 }
 0x33f   :  { %9714 = vst [vmem:[#allocation39_spill] sm:$0xff] %v8243_v15  ;;  %3417 = vmatmul.bf16.gmra.mxu0 %v3245_v45  ;;  %3506 = vmatmul.bf16.gmra.mxu1 %v3245_v45  ;;  %v9723_v15 = vld [vmem:[#allocation77_spill] sm:$0xff] }
 0x340   :  { %3595 = vmatmul.bf16.gmra.mxu2 %v3245_v45 }
 0x343   :  { %v2844_v42 = vpop.f32.mrf.mxu2  ;;  %v2933_v39 = vpop.f32.mrf.mxu3 }
 0x344   :  { %v8254_v11 = vadd.f32 %v2844_v42, %v9717_v8  ;;  %v8256_v45 = vadd.f32 %v2933_v39, %v2193_v33  ;;  %v2104_v3 = vpop.f32.mrf.mxu0  ;;  %v2757_v9 = vpop.f32.mrf.mxu1  ;;  %v9724_v42 = vld [vmem:[#allocation72_spill] sm:$0xff] }
 0x345   :  { %v8262_v56 = vadd.f32 %v2104_v3, %v1482_v62  ;;  %v8265_v13 = vadd.f32 %v2757_v9, %v9721_v24  ;;  %v1485_v8 = vadd.f32 %v9724_v42, %v9723_v15  ;;  %v9728_v3 = vld [vmem:[#allocation11_spill] sm:$0xff]  ;;  %v6202_v15 = vld [vmem:[%s9136_s0 + $0x24] sm:$0xf]  ;;  %v3093_v24 = vrot.slane %v6203_v59, 6 }
 0x346   :  { %9718 = vst [vmem:[#allocation121_spill] sm:$0xff] %v8254_v11  ;;  %v9726_v11 = vld [vmem:[#allocation10_spill] sm:$0xff]  ;;  %v9736_v59 = vld [vmem:[#allocation75_spill] sm:$0xff] }
 0x347   :  { %9719 = vst [vmem:[#allocation120_spill] sm:$0xff] %v8256_v45  ;;  %v3246_v45 = vpack.c.b16 %v3217_v1, %v3216_v18  ;;  %v9730_v18 = vld [vmem:[#allocation80_spill] sm:$0xff] }
 0x348   :  { %9720 = vst [vmem:[#allocation35_spill] sm:$0xff] %v8262_v56  ;;  %v9731_v1 = vld [vmem:[#allocation76_spill] sm:$0xff] }
 0x349   :  { %9722 = vst [vmem:[#allocation36_spill] sm:$0xff] %v8265_v13  ;;  %v1487_v42 = vadd.f32 %v9731_v1, %v9730_v18 }
 0x34b   :  { %v2846_v33 = vpop.f32.mrf.mxu2  ;;  %v8269_v39 = vpop.f32.mrf.mxu3 }
 0x34c   :  { %9725 = vst [vmem:[#allocation42_spill] sm:$0xff] %v8269_v39  ;;  %v8272_v37 = vadd.f32 %v2846_v33, %v9726_v11  ;;  %v2107_v47 = vpop.f32.mrf.mxu0  ;;  %v2760_v58 = vpop.f32.mrf.mxu1  ;;  %v5580_v11 = vrot.slane %v6202_v15, 10 }
 0x34d   :  { %v2199_v62 = vadd.f32 %v2107_v47, %v1485_v8  ;;  %v8278_v9 = vadd.f32 %v2760_v58, %v9728_v3  ;;  %v9732_v47 = vld [vmem:[#allocation74_spill] sm:$0xff] }
 0x34e   :  { %9727 = vst [vmem:[#allocation38_spill] sm:$0xff] %v8272_v37  ;;  %v3091_v15 = vsel %vm8177_vm11, %v5580_v11, %v3090_v12  ;;  %v9738_v37 = vld [vmem:[#allocation84_spill] sm:$0xff] }
 0x34f   :  { %9729 = vst [vmem:[#allocation122_spill] sm:$0xff] %v8278_v9  ;;  %3422 = vmatmul.bf16.gmra.mxu0 %v3246_v45  ;;  %3511 = vmatmul.bf16.gmra.mxu1 %v3246_v45  ;;  %v3094_v9 = vsel %vm8177_vm11, %v3092_v38, %v3093_v24  ;;  %v3218_v18 = vunpack.c.l.b16 %v3091_v15  ;;  %v6204_v38 = vld [vmem:[%s9136_s0 + $0x34] sm:$0xf]  ;;  %v6206_v15 = vld [vmem:[%s9136_s0 + $0x38] sm:$0x3] }
 0x350   :  { %3600 = vmatmul.bf16.gmra.mxu2 %v3246_v45  ;;  %v3219_v1 = vunpack.c.l.b16 %v3094_v9  ;;  %v3097_v24 = vrot.slane %v6204_v38, 6 }
 0x353   :  { %v2849_v8 = vpop.f32.mrf.mxu2  ;;  %v2938_v33 = vpop.f32.mrf.mxu3 }
 0x354   :  { %v8289_v58 = vadd.f32 %v2849_v8, %v9732_v47  ;;  %v8291_v45 = vadd.f32 %v2938_v33, %v2199_v62  ;;  %v2109_v32 = vpop.f32.mrf.mxu0  ;;  %v2762_v3 = vpop.f32.mrf.mxu1  ;;  %v9739_v8 = vld [vmem:[#allocation12_spill] sm:$0xff] }
 0x355   :  { %v8297_v39 = vadd.f32 %v2109_v32, %v1487_v42  ;;  %v8300_v56 = vadd.f32 %v2762_v3, %v9736_v59  ;;  %v1490_v47 = vadd.f32 %v9739_v8, %v9738_v37  ;;  %v9743_v32 = vld [vmem:[#allocation13_spill] sm:$0xff]  ;;  %v6205_v37 = vld [vmem:[%s9136_s0 + $0x30] sm:$0xf]  ;;  %v3099_v3 = vrot.slane %v3097_v24, 4 }
 0x356   :  { %9733 = vst [vmem:[#allocation123_spill] sm:$0xff] %v8289_v58  ;;  %v9741_v58 = vld [vmem:[#allocation78_spill] sm:$0xff]  ;;  %v3100_v59 = vrot.slane %v6206_v15, 6  ;;  %v9751_v15 = vld [vmem:[#allocation81_spill] sm:$0xff] }
 0x357   :  { %9734 = vst [vmem:[#allocation44_spill] sm:$0xff] %v8291_v45  ;;  %v3247_v45 = vpack.c.b16 %v3219_v1, %v3218_v18  ;;  %v9745_v18 = vld [vmem:[#allocation87_spill] sm:$0xff]  ;;  %v9746_v1 = vld [vmem:[#allocation14_spill] sm:$0xff] }
 0x358   :  { %9735 = vst [vmem:[#allocation124_spill] sm:$0xff] %v8297_v39  ;;  %v1492_v8 = vadd.f32 %v9746_v1, %v9745_v18 }
 0x359   :  { %9737 = vst [vmem:[#allocation40_spill] sm:$0xff] %v8300_v56 }
 0x35b   :  { %v2851_v62 = vpop.f32.mrf.mxu2  ;;  %v8304_v33 = vpop.f32.mrf.mxu3 }
 0x35c   :  { %9740 = vst [vmem:[#allocation41_spill] sm:$0xff] %v8304_v33  ;;  %v8307_v13 = vadd.f32 %v2851_v62, %v9741_v58  ;;  %v2112_v12 = vpop.f32.mrf.mxu0  ;;  %v2765_v11 = vpop.f32.mrf.mxu1  ;;  %v5581_v58 = vrot.slane %v6205_v37, 10 }
 0x35d   :  { %v2205_v42 = vadd.f32 %v2112_v12, %v1490_v47  ;;  %v8313_v9 = vadd.f32 %v2765_v11, %v9743_v32  ;;  %v9747_v12 = vld [vmem:[#allocation79_spill] sm:$0xff] }
 0x35e   :  { %9742 = vst [vmem:[#allocation47_spill] sm:$0xff] %v8307_v13  ;;  %v3098_v37 = vsel %vm8177_vm11, %v5581_v58, %v3097_v24  ;;  %v9753_v13 = vld [vmem:[#allocation91_spill] sm:$0xff]  ;;  %v6207_v58 = vld [vmem:[%s9136_s0 + $0x40] sm:$0xf] }
 0x35f   :  { %9744 = vst [vmem:[#allocation43_spill] sm:$0xff] %v8313_v9  ;;  %3427 = vmatmul.bf16.gmra.mxu0 %v3247_v45  ;;  %3516 = vmatmul.bf16.gmra.mxu1 %v3247_v45  ;;  %v3101_v9 = vsel %vm8177_vm11, %v3099_v3, %v3100_v59  ;;  %v3220_v18 = vunpack.c.l.b16 %v3098_v37  ;;  %v3104_v3 = vrot.slane %v6207_v58, 6 }
 0x360   :  { %3605 = vmatmul.bf16.gmra.mxu2 %v3247_v45  ;;  %v3221_v1 = vunpack.c.l.b16 %v3101_v9 }
 0x363   :  { %v2854_v47 = vpop.f32.mrf.mxu2  ;;  %v2943_v62 = vpop.f32.mrf.mxu3 }
 0x364   :  { %v8324_v11 = vadd.f32 %v2854_v47, %v9747_v12  ;;  %v8326_v45 = vadd.f32 %v2943_v62, %v2205_v42  ;;  %v2114_v38 = vpop.f32.mrf.mxu0  ;;  %v2767_v32 = vpop.f32.mrf.mxu1  ;;  %v9754_v47 = vld [vmem:[#allocation82_spill] sm:$0xff]  ;;  %v3248_v62 = vpack.c.b16 %v3221_v1, %v3220_v18 }
 0x365   :  { %v8332_v33 = vadd.f32 %v2114_v38, %v1492_v8  ;;  %v8335_v39 = vadd.f32 %v2767_v32, %v9751_v15  ;;  %v1495_v12 = vadd.f32 %v9754_v47, %v9753_v13  ;;  %v9758_v8 = vld [vmem:[#allocation85_spill] sm:$0xff]  ;;  %v6208_v13 = vld [vmem:[%s9136_s0 + $0x3c] sm:$0xf]  ;;  %v6209_v32 = vld [vmem:[%s9136_s0 + $0x44] sm:$0x3] }
 0x366   :  { %9748 = vst [vmem:[#allocation125_spill] sm:$0xff] %v8324_v11  ;;  %v5582_v9 = vrot.slane %v6208_v13, 10  ;;  %v3107_v37 = vrot.slane %v6209_v32, 6  ;;  %v9760_v15 = vld [vmem:[#allocation94_spill] sm:$0xff]  ;;  %v9762_v47 = vld [vmem:[#allocation15_spill] sm:$0xff] }
 0x367   :  { %9749 = vst [vmem:[#allocation49_spill] sm:$0xff] %v8326_v45  ;;  %v9755_v45 = vld [vmem:[#allocation83_spill] sm:$0xff]  ;;  %v9765_v13 = vld [vmem:[#allocation86_spill] sm:$0xff] }
 0x368   :  { %9750 = vst [vmem:[#allocation127_spill] sm:$0xff] %v8332_v33 }
 0x369   :  { %9752 = vst [vmem:[#allocation126_spill] sm:$0xff] %v8335_v39 }
 0x36b   :  { %v2856_v42 = vpop.f32.mrf.mxu2 }
 0x36c   :  { %v8340_v11 = vadd.f32 %v2856_v42, %v9755_v45  ;;  %v2117_v56 = vpop.f32.mrf.mxu0  ;;  %v2770_v24 = vpop.f32.mrf.mxu1  ;;  %v3106_v45 = vrot.slane %v3104_v3, 4 }
 0x36d   :  { %v8345_v59 = vadd.f32 %v2117_v56, %v1495_v12  ;;  %v8348_v38 = vadd.f32 %v2770_v24, %v9758_v8  ;;  %v9761_v56 = vld [vmem:[#allocation16_spill] sm:$0xff]  ;;  %v3105_v24 = vsel %vm8177_vm11, %v5582_v9, %v3104_v3  ;;  %v6210_v9 = vld [vmem:[%s9136_s0 + $0x4c] sm:$0xf] }
 0x36e   :  { %9756 = vst [vmem:[#allocation128_spill] sm:$0xff] %v8340_v11  ;;  %v1497_v18 = vadd.f32 %v9761_v56, %v9760_v15  ;;  %v3108_v58 = vsel %vm8177_vm11, %v3106_v45, %v3107_v37  ;;  %v3222_v32 = vunpack.c.l.b16 %v3105_v24  ;;  %v9767_v15 = vld [vmem:[#allocation98_spill] sm:$0xff]  ;;  %v9768_v56 = vld [vmem:[#allocation88_spill] sm:$0xff]  ;;  %v3111_v45 = vrot.slane %v6210_v9, 6 }
 0x36f   :  { %9757 = vst [vmem:[#allocation45_spill] sm:$0xff] %v8345_v59  ;;  %3432 = vmatmul.bf16.gmra.mxu0 %v3248_v62  ;;  %3521 = vmatmul.bf16.gmra.mxu1 %v3248_v62  ;;  %v1500_v33 = vadd.f32 %v9768_v56, %v9767_v15  ;;  %v6212_v24 = vld [vmem:[%s9136_s0 + $0x50] sm:$0x3]  ;;  %v9776_v15 = vld [vmem:[#allocation89_spill] sm:$0xff] }
 0x370   :  { %9759 = vst [vmem:[#allocation46_spill] sm:$0xff] %v8348_v38  ;;  %3610 = vmatmul.bf16.gmra.mxu2 %v3248_v62  ;;  %v3223_v38 = vunpack.c.l.b16 %v3108_v58  ;;  %v3114_v58 = vrot.slane %v6212_v24, 6 }
 0x373   :  { %v2859_v1 = vpop.f32.mrf.mxu2 }
 0x374   :  { %v8359_v12 = vadd.f32 %v2859_v1, %v9762_v47  ;;  %v2119_v42 = vpop.f32.mrf.mxu0  ;;  %v2772_v62 = vpop.f32.mrf.mxu1  ;;  %v3249_v47 = vpack.c.b16 %v3223_v38, %v3222_v32  ;;  %v6211_v38 = vld [vmem:[%s9136_s0 + $0x48] sm:$0xf] }
 0x375   :  { %v8365_v8 = vadd.f32 %v2119_v42, %v1497_v18  ;;  %v8368_v59 = vadd.f32 %v2772_v62, %v9765_v13  ;;  %v9772_v18 = vld [vmem:[#allocation90_spill] sm:$0xff]  ;;  %v3113_v62 = vrot.slane %v3111_v45, 4  ;;  %v9774_v13 = vld [vmem:[#allocation101_spill] sm:$0xff] }
 0x376   :  { %9763 = vst [vmem:[#allocation52_spill] sm:$0xff] %v8359_v12  ;;  %v9769_v12 = vld [vmem:[#allocation17_spill] sm:$0xff] }
 0x377   :  { %9764 = vst [vmem:[#allocation130_spill] sm:$0xff] %v8365_v8  ;;  %v3115_v9 = vsel %vm8177_vm11, %v3113_v62, %v3114_v58 }
 0x378   :  { %9766 = vst [vmem:[#allocation48_spill] sm:$0xff] %v8368_v59 }
 0x37b   :  { %v2861_v1 = vpop.f32.mrf.mxu2 }
 0x37c   :  { %v8373_v11 = vadd.f32 %v2861_v1, %v9769_v12  ;;  %v2122_v39 = vpop.f32.mrf.mxu0  ;;  %v2775_v3 = vpop.f32.mrf.mxu1  ;;  %v5583_v12 = vrot.slane %v6211_v38, 10  ;;  %v9779_v38 = vld [vmem:[#allocation18_spill] sm:$0xff] }
 0x37d   :  { %v8378_v37 = vadd.f32 %v2122_v39, %v1500_v33  ;;  %v8381_v42 = vadd.f32 %v2775_v3, %v9772_v18  ;;  %v9775_v39 = vld [vmem:[#allocation92_spill] sm:$0xff] }
 0x37e   :  { %9770 = vst [vmem:[#allocation129_spill] sm:$0xff] %v8373_v11  ;;  %v1502_v33 = vadd.f32 %v9775_v39, %v9774_v13  ;;  %v3112_v3 = vsel %vm8177_vm11, %v5583_v12, %v3111_v45  ;;  %v9781_v13 = vld [vmem:[#allocation105_spill] sm:$0xff]  ;;  %v6213_v12 = vld [vmem:[%s9136_s0 + $0x58] sm:$0xf] }
 0x37f   :  { %9771 = vst [vmem:[#allocation131_spill] sm:$0xff] %v8378_v37  ;;  %3437 = vmatmul.bf16.gmra.mxu0 %v3249_v47  ;;  %3526 = vmatmul.bf16.gmra.mxu1 %v3249_v47  ;;  %v3224_v24 = vunpack.c.l.b16 %v3112_v3  ;;  %v9782_v39 = vld [vmem:[#allocation93_spill] sm:$0xff]  ;;  %v3118_v62 = vrot.slane %v6213_v12, 6  ;;  %v6215_v3 = vld [vmem:[%s9136_s0 + $0x5c] sm:$0x3] }
 0x380   :  { %9773 = vst [vmem:[#allocation54_spill] sm:$0xff] %v8381_v42  ;;  %3615 = vmatmul.bf16.gmra.mxu2 %v3249_v47  ;;  %v3225_v42 = vunpack.c.l.b16 %v3115_v9  ;;  %v1505_v8 = vadd.f32 %v9782_v39, %v9781_v13  ;;  %v3121_v9 = vrot.slane %v6215_v3, 6  ;;  %v9790_v13 = vld [vmem:[#allocation95_spill] sm:$0xff] }
 0x383   :  { %v2864_v32 = vpop.f32.mrf.mxu2 }
 0x384   :  { %v8392_v56 = vadd.f32 %v2864_v32, %v9776_v15  ;;  %v2124_v1 = vpop.f32.mrf.mxu0  ;;  %v2777_v47 = vpop.f32.mrf.mxu1  ;;  %v3250_v15 = vpack.c.b16 %v3225_v42, %v3224_v24  ;;  %v6214_v42 = vld [vmem:[%s9136_s0 + $0x54] sm:$0xf] }
 0x385   :  { %v8398_v18 = vadd.f32 %v2124_v1, %v1502_v33  ;;  %v8401_v37 = vadd.f32 %v2777_v47, %v9779_v38  ;;  %v9786_v33 = vld [vmem:[#allocation20_spill] sm:$0xff]  ;;  %v3120_v47 = vrot.slane %v3118_v62, 4  ;;  %v9788_v38 = vld [vmem:[#allocation107_spill] sm:$0xff] }
 0x386   :  { %9777 = vst [vmem:[#allocation132_spill] sm:$0xff] %v8392_v56  ;;  %v9783_v56 = vld [vmem:[#allocation19_spill] sm:$0xff] }
 0x387   :  { %9778 = vst [vmem:[#allocation50_spill] sm:$0xff] %v8398_v18  ;;  %v3122_v12 = vsel %vm8177_vm11, %v3120_v47, %v3121_v9 }
 0x388   :  { %9780 = vst [vmem:[#allocation51_spill] sm:$0xff] %v8401_v37 }
 0x38b   :  { %v2866_v32 = vpop.f32.mrf.mxu2 }
 0x38c   :  { %v8406_v11 = vadd.f32 %v2866_v32, %v9783_v56  ;;  %v2127_v59 = vpop.f32.mrf.mxu0  ;;  %v2780_v45 = vpop.f32.mrf.mxu1  ;;  %v5584_v56 = vrot.slane %v6214_v42, 10  ;;  %v9793_v42 = vld [vmem:[#allocation96_spill] sm:$0xff] }
 0x38d   :  { %v8411_v58 = vadd.f32 %v2127_v59, %v1505_v8  ;;  %v8414_v1 = vadd.f32 %v2780_v45, %v9786_v33  ;;  %v9789_v59 = vld [vmem:[#allocation97_spill] sm:$0xff] }
 0x38e   :  { %9784 = vst [vmem:[#allocation57_spill] sm:$0xff] %v8406_v11  ;;  %v1507_v8 = vadd.f32 %v9789_v59, %v9788_v38  ;;  %v3119_v45 = vsel %vm8177_vm11, %v5584_v56, %v3118_v62  ;;  %v9795_v38 = vld [vmem:[#allocation111_spill] sm:$0xff]  ;;  %v9796_v59 = vld [vmem:[#allocation21_spill] sm:$0xff]  ;;  %v6216_v56 = vld [vmem:[%s9136_s0 + $0x64] sm:$0xf] }
 0x38f   :  { %9785 = vst [vmem:[#allocation134_spill] sm:$0xff] %v8411_v58  ;;  %3442 = vmatmul.bf16.gmra.mxu0 %v3250_v15  ;;  %3531 = vmatmul.bf16.gmra.mxu1 %v3250_v15  ;;  %v3226_v3 = vunpack.c.l.b16 %v3119_v45  ;;  %v1510_v18 = vadd.f32 %v9796_v59, %v9795_v38  ;;  %v3125_v47 = vrot.slane %v6216_v56, 6  ;;  %v6218_v45 = vld [vmem:[%s9136_s0 + $0x68] sm:$0x3]  ;;  %v9804_v38 = vld [vmem:[#allocation100_spill] sm:$0xff] }
 0x390   :  { %9787 = vst [vmem:[#allocation53_spill] sm:$0xff] %v8414_v1  ;;  %3620 = vmatmul.bf16.gmra.mxu2 %v3250_v15  ;;  %v3227_v1 = vunpack.c.l.b16 %v3122_v12  ;;  %v3128_v12 = vrot.slane %v6218_v45, 6 }
 0x393   :  { %v2869_v24 = vpop.f32.mrf.mxu2 }
 0x394   :  { %v8425_v39 = vadd.f32 %v2869_v24, %v9790_v13  ;;  %v2129_v32 = vpop.f32.mrf.mxu0  ;;  %v2782_v15 = vpop.f32.mrf.mxu1  ;;  %v3251_v13 = vpack.c.b16 %v3227_v1, %v3226_v3  ;;  %v6217_v1 = vld [vmem:[%s9136_s0 + $0x60] sm:$0xf] }
 0x395   :  { %v8431_v33 = vadd.f32 %v2129_v32, %v1507_v8  ;;  %v8434_v58 = vadd.f32 %v2782_v15, %v9793_v42  ;;  %v9800_v8 = vld [vmem:[#allocation22_spill] sm:$0xff]  ;;  %v3127_v15 = vrot.slane %v3125_v47, 4 }
 0x396   :  { %9791 = vst [vmem:[#allocation133_spill] sm:$0xff] %v8425_v39  ;;  %v9797_v39 = vld [vmem:[#allocation99_spill] sm:$0xff]  ;;  %v9802_v42 = vld [vmem:[#allocation114_spill] sm:$0xff] }
 0x397   :  { %9792 = vst [vmem:[#allocation135_spill] sm:$0xff] %v8431_v33  ;;  %v3129_v56 = vsel %vm8177_vm11, %v3127_v15, %v3128_v12 }
 0x398   :  { %9794 = vst [vmem:[#allocation59_spill] sm:$0xff] %v8434_v58 }
 0x39b   :  { %v2871_v24 = vpop.f32.mrf.mxu2 }
 0x39c   :  { %v8439_v11 = vadd.f32 %v2871_v24, %v9797_v39  ;;  %v2132_v37 = vpop.f32.mrf.mxu0  ;;  %v2785_v62 = vpop.f32.mrf.mxu1  ;;  %v5585_v39 = vrot.slane %v6217_v1, 10 }
 0x39d   :  { %v8444_v9 = vadd.f32 %v2132_v37, %v1510_v18  ;;  %v8447_v32 = vadd.f32 %v2785_v62, %v9800_v8  ;;  %v9803_v37 = vld [vmem:[#allocation23_spill] sm:$0xff] }
 0x39e   :  { %9798 = vst [vmem:[#allocation137_spill] sm:$0xff] %v8439_v11  ;;  %v1512_v18 = vadd.f32 %v9803_v37, %v9802_v42  ;;  %v3126_v62 = vsel %vm8177_vm11, %v5585_v39, %v3125_v47 }
 0x39f   :  { %9799 = vst [vmem:[#allocation136_spill] sm:$0xff] %v8444_v9  ;;  %3447 = vmatmul.bf16.gmra.mxu0 %v3251_v13  ;;  %3536 = vmatmul.bf16.gmra.mxu1 %v3251_v13  ;;  %v3228_v45 = vunpack.c.l.b16 %v3126_v62  ;;  %v3229_v9 = vunpack.c.l.b16 %v3129_v56  ;;  %v8495_v56 = vld [vmem:[%s9138_s2 + $0x8] sm:$0xff] }
 0x3a0   :  { %9801 = vst [vmem:[#allocation55_spill] sm:$0xff] %v8447_v32  ;;  %3625 = vmatmul.bf16.gmra.mxu2 %v3251_v13 }
 0x3a1   :  { %v3252_v37 = vpack.c.b16 %v3229_v9, %v3228_v45 }
 0x3a3   :  { %v2874_v3 = vpop.f32.mrf.mxu2 }
 0x3a4   :  { %v8458_v59 = vadd.f32 %v2874_v3, %v9804_v38  ;;  %v2134_v24 = vpop.f32.mrf.mxu0  ;;  %v2787_v13 = vpop.f32.mrf.mxu1  ;;  %v6219_v3 = vld [vmem:[%s9136_s0 + $0x70] sm:$0xf] }
 0x3a5   :  { %v8464_v8 = vadd.f32 %v2134_v24, %v1512_v18  ;;  %v8467_v1 = vadd.f32 %v2787_v13, %v7901_v34  ;;  %v3132_v38 = vrot.slane %v6219_v3, 6  ;;  %v6220_v34 = vld [vmem:[%s9136_s0 + $0x6c] sm:$0xf]  ;;  %v6221_v24 = vld [vmem:[%s9136_s0 + $0x74] sm:$0x3] }
 0x3a6   :  { %9805 = vst [vmem:[#allocation56_spill] sm:$0xff] %v8458_v59  ;;  %v5586_v9 = vrot.slane %v6220_v34, 10 }
 0x3a7   :  { %9806 = vst [vmem:[#allocation58_spill] sm:$0xff] %v8464_v8  ;;  %v3134_v18 = vrot.slane %v3132_v38, 4 }
 0x3a8   :  { %9807 = vst [vmem:[#allocation60_spill] sm:$0xff] %v8467_v1  ;;  %v3133_v13 = vsel %vm8177_vm11, %v5586_v9, %v3132_v38  ;;  %v8506_v38 = vld [vmem:[%s9138_s2 + $0x20] sm:$0xff] }
 0x3a9   :  { %v3230_v34 = vunpack.c.l.b16 %v3133_v13 }
 0x3ab   :  { %v2876_v42 = vpop.f32.mrf.mxu2 }
 0x3ac   :  { %v8473_v59 = vadd.f32 %v2876_v42, %v7903_v30  ;;  %v3413_v47 = vpop.f32.mrf.mxu0  ;;  %v3502_v39 = vpop.f32.mrf.mxu1  ;;  %v3135_v30 = vrot.slane %v6221_v24, 6 }
 0x3ad   :  { %v3671_v15 = vadd.f32 %v3413_v47, %v7906_v28  ;;  %v3672_v12 = vadd.f32 %v3502_v39, %v7916_v5  ;;  %v8486_v28 = vld [vmem:[%s9138_s2] sm:$0xff] }
 0x3ae   :  { %9808 = vst [vmem:[#allocation61_spill] sm:$0xff] %v8473_v59  ;;  %v3136_v62 = vsel %vm8177_vm11, %v3134_v18, %v3135_v30  ;;  %v6222_v59 = vld [vmem:[%s9136_s0 + $0x7c] sm:$0xf] }
 0x3af   :  { %3452 = vmatmul.bf16.gmra.mxu0 %v3252_v37  ;;  %3541 = vmatmul.bf16.gmra.mxu1 %v3252_v37  ;;  %v3231_v9 = vunpack.c.l.b16 %v3136_v62  ;;  %v3774_v18 = vadd.f32 %v8495_v56, %v3672_v12  ;;  %v3139_v1 = vrot.slane %v6222_v59, 6  ;;  %v8525_v12 = vld [vmem:[%s9138_s2 + $0x28] sm:$0xff]  ;;  %v6223_v59 = vld [vmem:[%s9136_s0 + $0x78] sm:$0xf] }
 0x3b0   :  { %3630 = vmatmul.bf16.gmra.mxu2 %v3252_v37  ;;  %v8501_v37 = vld [vmem:[%s9138_s2 + $0x18] sm:$0xff] }
 0x3b1   :  { %v3253_v62 = vpack.c.b16 %v3231_v9, %v3230_v34  ;;  %v3141_v34 = vrot.slane %v3139_v1, 4 }
 0x3b3   :  { %v3591_v5 = vpop.f32.mrf.mxu2 }
 0x3b4   :  { %v3673_v45 = vadd.f32 %v3591_v5, %v7918_v10  ;;  %v3415_v42 = vpop.f32.mrf.mxu0  ;;  %v3504_v3 = vpop.f32.mrf.mxu1  ;;  %v3773_v10 = vadd.f32 %v8486_v28, %v3671_v15 }
 0x3b5   :  { %v3674_v47 = vadd.f32 %v3415_v42, %v7921_v63  ;;  %v3675_v39 = vadd.f32 %v3504_v3, %v7939_v57  ;;  %v8520_v63 = vld [vmem:[%s9138_s2 + $0x10] sm:$0xff] }
 0x3b6   :  { %v3775_v33 = vadd.f32 %v8520_v63, %v3673_v45 }
 0x3b7   :  { %v3776_v24 = vadd.f32 %v8501_v37, %v3674_v47  ;;  %v3777_v30 = vadd.f32 %v8506_v38, %v3675_v39  ;;  %v5587_v39 = vrot.slane %v6223_v59, 10 }
 0x3b9   :  { %v3869_v5 = vmax.f32 %v3773_v10, %v3776_v24  ;;  %v3876_v8 = vmax.f32 %v3774_v18, %v3777_v30  ;;  %v9809_v30 = vld [vmem:[#allocation102_spill] sm:$0xff] }
 0x3bb   :  { %v3870_v57 = vrot.slane %v3869_v5, 4  ;;  %v3877_v15 = vrot.slane %v3876_v8, 4  ;;  %v3593_v13 = vpop.f32.mrf.mxu2 }
 0x3bc   :  { %v3676_v42 = vadd.f32 %v3593_v13, %v7941_v25  ;;  %v3418_v3 = vpop.f32.mrf.mxu0  ;;  %v3507_v47 = vpop.f32.mrf.mxu1  ;;  %v6224_v25 = vld [vmem:[%s9136_s0 + $0x80] sm:$0x3] }
 0x3bd   :  { %v3871_v10 = vmax.f32 %v3869_v5, %v3870_v57  ;;  %v3878_v18 = vmax.f32 %v3876_v8, %v3877_v15  ;;  %v3677_v24 = vadd.f32 %v3418_v3, %v7944_v29  ;;  %v3678_v32 = vadd.f32 %v3507_v47, %v9809_v30 }
 0x3be   :  { %v3778_v11 = vadd.f32 %v8525_v12, %v3676_v42  ;;  %v3142_v9 = vrot.slane %v6224_v25, 6  ;;  %v3140_v29 = vsel %vm8177_vm11, %v5587_v39, %v3139_v1  ;;  %v6225_v42 = vld [vmem:[%s9136_s0 + $0x88] sm:$0xf]  ;;  %v9810_v25 = vld [vmem:[#allocation104_spill] sm:$0xff]  ;;  %v9811_v1 = vld [vmem:[#allocation103_spill] sm:$0xff] }
 0x3bf   :  { %v3872_v13 = vrot.slane %v3871_v10, 2  ;;  %v3879_v58 = vrot.slane %v3878_v18, 2  ;;  %3457 = vmatmul.bf16.gmra.mxu0 %v3253_v62  ;;  %3546 = vmatmul.bf16.gmra.mxu1 %v3253_v62  ;;  %v3146_v3 = vrot.slane %v6225_v42, 6 }
 0x3c0   :  { %v3883_v5 = vmax.f32 %v3775_v33, %v3778_v11  ;;  %3635 = vmatmul.bf16.gmra.mxu2 %v3253_v62  ;;  %v3143_v15 = vsel %vm8177_vm11, %v3141_v34, %v3142_v9  ;;  %v6226_v9 = vld [vmem:[%s9136_s0 + $0x84] sm:$0xf] }
 0x3c1   :  { %v3873_v8 = vmax.f32 %v3871_v10, %v3872_v13  ;;  %v3880_v57 = vmax.f32 %v3878_v18, %v3879_v58  ;;  %v3232_v10 = vunpack.c.l.b16 %v3140_v29  ;;  %v4205_v58 = vld [vmem:[%s9139_s3] sm:$0x7]  ;;  %v3233_v34 = vunpack.c.l.b16 %v3143_v15  ;;  %v6227_v29 = vld [vmem:[%s9136_s0 + $0x8c] sm:$0x3] }
 0x3c2   :  { %v3884_v45 = vrot.slane %v3883_v5, 4  ;;  %v5588_v13 = vrot.slane %v6226_v9, 10  ;;  %v3148_v42 = vrot.slane %v3146_v3, 4  ;;  %v8565_v61 = vperm.slane %v4205_v58, 1 }
 0x3c3   :  { %v3596_v47 = vpop.f32.mrf.mxu2  ;;  %v3874_v59 = vrot.slane %v3873_v8, 1  ;;  %v3254_v2 = vpack.c.b16 %v3233_v34, %v3232_v10 }
 0x3c4   :  { %v3885_v30 = vmax.f32 %v3883_v5, %v3884_v45  ;;  %v3679_v11 = vadd.f32 %v3596_v47, %v9810_v25  ;;  %v3420_v33 = vpop.f32.mrf.mxu0  ;;  %v3509_v62 = vpop.f32.mrf.mxu1  ;;  %v3881_v5 = vrot.slane %v3880_v57, 1  ;;  %v3149_v47 = vrot.slane %v6227_v29, 6 }
 0x3c5   :  { %v3680_v39 = vadd.f32 %v3420_v33, %v9811_v1  ;;  %v3681_v18 = vadd.f32 %v3509_v62, %v7977_v0  ;;  %v3779_v25 = vadd.f32 %v8486_v28, %v3677_v24  ;;  %v3780_v33 = vadd.f32 %v8495_v56, %v3678_v32 }
 0x3c6   :  { %v3886_v45 = vrot.slane %v3885_v30, 2  ;;  %v3875_v62 = vmax.f32 %v3873_v8, %v3874_v59  ;;  %v8561_v1 = vperm.slane %v4205_v58, 0  ;;  %v3147_v6 = vsel %vm8177_vm11, %v5588_v13, %v3146_v3 }
 0x3c7   :  { %v3782_v0 = vadd.f32 %v8501_v37, %v3680_v39  ;;  %v3783_v15 = vadd.f32 %v8506_v38, %v3681_v18  ;;  %v3882_v48 = vmax.f32 %v3880_v57, %v3881_v5  ;;  %v3150_v24 = vsel %vm8177_vm11, %v3148_v42, %v3149_v47 }
 0x3c8   :  { %v3887_v9 = vmax.f32 %v3885_v30, %v3886_v45  ;;  %v4213_v8 = vadd.f32 %v8561_v1, %v3875_v62  ;;  %v3781_v3 = vadd.f32 %v8520_v63, %v3679_v11  ;;  %v3235_v5 = vunpack.c.l.b16 %v3150_v24 }
 0x3c9   :  { %v3890_v4 = vmax.f32 %v3779_v25, %v3782_v0  ;;  %v3897_v35 = vmax.f32 %v3780_v33, %v3783_v15  ;;  %v3234_v25 = vunpack.c.l.b16 %v3147_v6  ;;  %v4214_v33 = vadd.f32 %v8565_v61, %v3882_v48 }
 0x3ca   :  { %v3888_v59 = vrot.slane %v3887_v9, 1  ;;  %v8576_v6 = vperm.slane %v4205_v58, 2  ;;  %v6229_v58 = vld [vmem:[%s9136_s0 + $0x94] sm:$0xf] }
 0x3cb   :  { %v3891_v32 = vrot.slane %v3890_v4, 4  ;;  %v3898_v29 = vrot.slane %v3897_v35, 4  ;;  %v3598_v39 = vpop.f32.mrf.mxu2  ;;  %v4262_v62 = vmax.f32 %v4214_v33, 0.0  ;;  %v8578_v24 = vpack.c.b16 %v3235_v5, %v3234_v25 }
 0x3cc   :  { %v3682_v30 = vadd.f32 %v3598_v39, %v7979_v54  ;;  %v3423_v18 = vpop.f32.mrf.mxu0  ;;  %v3512_v45 = vpop.f32.mrf.mxu1  ;;  %v4261_v54 = vmax.f32 %v4213_v8, 0.0  ;;  %v3889_v15 = vmax.f32 %v3887_v9, %v3888_v59  ;;  %v3153_v9 = vrot.slane %v6229_v58, 6 }
 0x3cd   :  { %v3892_v57 = vmax.f32 %v3890_v4, %v3891_v32  ;;  %v3899_v13 = vmax.f32 %v3897_v35, %v3898_v29  ;;  %v3683_v47 = vadd.f32 %v3423_v18, %v7982_v52  ;;  %v3684_v10 = vadd.f32 %v3512_v45, %v7992_v40  ;;  %v6228_v40 = vld [vmem:[%s9136_s0 + $0x90] sm:$0xf] }
 0x3ce   :  { %v3784_v42 = vadd.f32 %v8525_v12, %v3682_v30  ;;  %v5589_v39 = vrot.slane %v6228_v40, 10  ;;  %v4215_v8 = vadd.f32 %v8576_v6, %v3889_v15  ;;  %v4310_v33 = vpack.c.bf16 %v4262_v62, %v4262_v62 }
 0x3cf   :  { %v3893_v34 = vrot.slane %v3892_v57, 2  ;;  %v3900_v0 = vrot.slane %v3899_v13, 2  ;;  %3462 = vmatmul.bf16.gmra.mxu0 %v3254_v2  ;;  %3551 = vmatmul.bf16.gmra.mxu1 %v3254_v2 }
 0x3d0   :  { %v3904_v11 = vmax.f32 %v3781_v3, %v3784_v42  ;;  %3640 = vmatmul.bf16.gmra.mxu2 %v3254_v2  ;;  %v8586_v2 = vpack.c.bf16 %v4261_v54, %v4261_v54  ;;  %v4764_v40 = vunpack.c.l.b16 %v4310_v33 }
 0x3d1   :  { %v3894_v4 = vmax.f32 %v3892_v57, %v3893_v34  ;;  %v3901_v35 = vmax.f32 %v3899_v13, %v3900_v0  ;;  %v9812_v57 = vld [vmem:[#allocation24_spill] sm:$0xff]  ;;  %v3785_v34 = vadd.f32 %v8486_v28, %v3683_v47  ;;  %v3786_v0 = vadd.f32 %v8495_v56, %v3684_v10 }
 0x3d2   :  { %v3905_v48 = vrot.slane %v3904_v11, 4 }
 0x3d3   :  { %v3895_v32 = vrot.slane %v3894_v4, 1  ;;  %v3902_v52 = vrot.slane %v3901_v35, 1  ;;  %v3601_v29 = vpop.f32.mrf.mxu2 }
 0x3d4   :  { %v3906_v59 = vmax.f32 %v3904_v11, %v3905_v48  ;;  %v3685_v30 = vadd.f32 %v3601_v29, %v7994_v50  ;;  %v3425_v18 = vpop.f32.mrf.mxu0  ;;  %v3514_v45 = vpop.f32.mrf.mxu1  ;;  %v3155_v48 = vrot.slane %v3153_v9, 4  ;;  %v4763_v29 = vunpack.c.l.b16 %v8586_v2 }
 0x3d5   :  { %v3896_v25 = vmax.f32 %v3894_v4, %v3895_v32  ;;  %v3903_v3 = vmax.f32 %v3901_v35, %v3902_v52  ;;  %v3686_v13 = vadd.f32 %v3425_v18, %v9812_v57  ;;  %v3687_v5 = vadd.f32 %v3514_v45, %v8015_v14  ;;  %v6230_v14 = vld [vmem:[%s9136_s0 + $0x98] sm:$0x3] }
 0x3d6   :  { %v3907_v42 = vrot.slane %v3906_v59, 2  ;;  %v4263_v4 = vmax.f32 %v4215_v8, 0.0  ;;  %v3156_v62 = vrot.slane %v6230_v14, 6  ;;  %v8604_v18 = vsel %vm8177_vm11, %v5589_v39, %v3153_v9 }
 0x3d7   :  { %v4216_v54 = vadd.f32 %v8561_v1, %v3896_v25  ;;  %v4217_v15 = vadd.f32 %v8565_v61, %v3903_v3  ;;  %v3788_v50 = vadd.f32 %v8501_v37, %v3686_v13  ;;  %v3789_v11 = vadd.f32 %v8506_v38, %v3687_v5 }
 0x3d8   :  { %v3908_v35 = vmax.f32 %v3906_v59, %v3907_v42  ;;  %v4311_v57 = vpack.c.bf16 %v4263_v4, %v4263_v4  ;;  %v3787_v5 = vadd.f32 %v8520_v63, %v3685_v30  ;;  %v9813_v42 = vld [vmem:[#allocation25_spill] sm:$0xff] }
 0x3d9   :  { %v4264_v32 = vmax.f32 %v4216_v54, 0.0  ;;  %v4265_v47 = vmax.f32 %v4217_v15, 0.0  ;;  %v3911_v52 = vmax.f32 %v3785_v34, %v3788_v50  ;;  %v3918_v10 = vmax.f32 %v3786_v0, %v3789_v11  ;;  %v9814_v11 = vld [vmem:[#allocation106_spill] sm:$0xff] }
 0x3da   :  { %v3909_v58 = vrot.slane %v3908_v35, 1 }
 0x3db   :  { %v4312_v8 = vpack.c.bf16 %v4264_v32, %v4264_v32  ;;  %v4313_v59 = vpack.c.bf16 %v4265_v47, %v4265_v47  ;;  %v3912_v45 = vrot.slane %v3911_v52, 4  ;;  %v3919_v25 = vrot.slane %v3918_v10, 4  ;;  %v3603_v3 = vpop.f32.mrf.mxu2  ;;  %v9815_v32 = vld [vmem:[#allocation26_spill] sm:$0xff] }
 0x3dc   :  { %v3910_v13 = vmax.f32 %v3908_v35, %v3909_v58  ;;  %v3688_v34 = vadd.f32 %v3603_v3, %v9813_v42  ;;  %v3428_v0 = vpop.f32.mrf.mxu0  ;;  %v3517_v54 = vpop.f32.mrf.mxu1 }
 0x3dd   :  { %v4766_v2 = vunpack.c.l.b16 %v4312_v8  ;;  %v4767_v33 = vunpack.c.l.b16 %v4313_v59  ;;  %v3913_v15 = vmax.f32 %v3911_v52, %v3912_v45  ;;  %v3920_v50 = vmax.f32 %v3918_v10, %v3919_v25 }
 0x3de   :  { %v4218_v39 = vadd.f32 %v8576_v6, %v3910_v13  ;;  %v3790_v9 = vadd.f32 %v8525_v12, %v3688_v34  ;;  %v3689_v14 = vadd.f32 %v3428_v0, %v9814_v11  ;;  %v3690_v47 = vadd.f32 %v3517_v54, %v9815_v32  ;;  %v9817_v32 = vld [vmem:[#allocation110_spill] sm:$0xff] }
 0x3df   :  { %v4787_v4 = vrot.slane %v4766_v2, 7  ;;  %v4801_v35 = vrot.slane %v4767_v33, 7  ;;  %v3914_v58 = vrot.slane %v3913_v15, 2  ;;  %v3921_v30 = vrot.slane %v3920_v50, 2  ;;  %3467 = vmatmul.bf16.gmra.mxu0 %v8578_v24  ;;  %3556 = vmatmul.bf16.gmra.mxu1 %v8578_v24 }
 0x3e0   :  { %v4266_v8 = vmax.f32 %v4218_v39, 0.0  ;;  %v3925_v59 = vmax.f32 %v3787_v5, %v3790_v9  ;;  %3645 = vmatmul.bf16.gmra.mxu2 %v8578_v24  ;;  %v3157_v52 = vsel %vm8177_vm11, %v3155_v48, %v3156_v62  ;;  %v3236_v34 = vunpack.c.l.b16 %v8604_v18  ;;  %v9816_v48 = vld [vmem:[#allocation108_spill] sm:$0xff] }
 0x3e1   :  { %v8618_v10 = vsel %vm4502_vm12, %v4787_v4, %v4763_v29  ;;  %v8621_v45 = vsel %vm4502_vm12, %v4801_v35, %v4764_v40  ;;  %v3915_v25 = vmax.f32 %v3913_v15, %v3914_v58  ;;  %v3922_v3 = vmax.f32 %v3920_v50, %v3921_v30  ;;  %v6231_v40 = vld [vmem:[%s9136_s0 + $0xa0] sm:$0xf] }
 0x3e2   :  { %v4314_v13 = vpack.c.bf16 %v4266_v8, %v4266_v8  ;;  %v3926_v42 = vrot.slane %v3925_v59, 4  ;;  %v4765_v0 = vunpack.c.l.b16 %v4311_v57  ;;  %v3237_v24 = vunpack.c.l.b16 %v3157_v52 }
 0x3e3   :  { %v3916_v54 = vrot.slane %v3915_v25, 1  ;;  %v3923_v5 = vrot.slane %v3922_v3, 1  ;;  %v3606_v2 = vpop.f32.mrf.mxu2  ;;  %v3160_v15 = vrot.slane %v6231_v40, 6  ;;  %v3791_v58 = vadd.f32 %v8486_v28, %v3689_v14 }
 0x3e4   :  { %v4768_v33 = vunpack.c.l.b16 %v4314_v13  ;;  %v3927_v39 = vmax.f32 %v3925_v59, %v3926_v42  ;;  %v3691_v62 = vadd.f32 %v3606_v2, %v9816_v48  ;;  %v3430_v29 = vpop.f32.mrf.mxu0  ;;  %v3519_v9 = vpop.f32.mrf.mxu1  ;;  %v3792_v30 = vadd.f32 %v8495_v56, %v3690_v47 }
 0x3e5   :  { %v3917_v50 = vmax.f32 %v3915_v25, %v3916_v54  ;;  %v3924_v11 = vmax.f32 %v3922_v3, %v3923_v5  ;;  %v3692_v18 = vadd.f32 %v3430_v29, %v9817_v32  ;;  %v3693_v57 = vadd.f32 %v3519_v9, %v8053_v27  ;;  %v6080_v27 = vld [vmem:[#allocation4 + $0x38] sm:$0xff] }
 0x3e6   :  { %v4815_v4 = vrot.slane %v4768_v33, 7  ;;  %v3928_v35 = vrot.slane %v3927_v39, 2  ;;  %4700 = vmatpush.bf16.msrb.mxu3 %v6080_v27  ;;  %v3256_v47 = vpack.c.b16 %v3237_v24, %v3236_v34  ;;  %v6232_v33 = vld [vmem:[%s9136_s0 + $0x9c] sm:$0xf]  ;;  %v3162_v29 = vrot.slane %v3160_v15, 4 }
 0x3e7   :  { %v4219_v8 = vadd.f32 %v8561_v1, %v3917_v50  ;;  %v4220_v59 = vadd.f32 %v8565_v61, %v3924_v11  ;;  %v3794_v52 = vadd.f32 %v8501_v37, %v3692_v18  ;;  %v3795_v13 = vadd.f32 %v8506_v38, %v3693_v57  ;;  %v6233_v34 = vld [vmem:[%s9136_s0 + $0xa4] sm:$0x3] }
 0x3e8   :  { %v8637_v25 = vsel %vm4502_vm12, %v4815_v4, %v4765_v0  ;;  %v3929_v3 = vmax.f32 %v3927_v39, %v3928_v35  ;;  %v5590_v48 = vrot.slane %v6232_v33, 10  ;;  %v3793_v32 = vadd.f32 %v8520_v63, %v3691_v62 }
 0x3e9   :  { %v4267_v42 = vmax.f32 %v4219_v8, 0.0  ;;  %v4268_v54 = vmax.f32 %v4220_v59, 0.0  ;;  %v3932_v5 = vmax.f32 %v3791_v58, %v3794_v52  ;;  %v3939_v14 = vmax.f32 %v3792_v30, %v3795_v13 }
 0x3ea   :  { %v3930_v2 = vrot.slane %v3929_v3, 1  ;;  %v3163_v24 = vrot.slane %v6233_v34, 6 }
 0x3eb   :  { %v4315_v9 = vpack.c.bf16 %v4267_v42, %v4267_v42  ;;  %v4316_v40 = vpack.c.bf16 %v4268_v54, %v4268_v54  ;;  %v3933_v0 = vrot.slane %v3932_v5, 4  ;;  %v3940_v50 = vrot.slane %v3939_v14, 4  ;;  %v3608_v11 = vpop.f32.mrf.mxu2 }
 0x3ec   :  { %v3931_v39 = vmax.f32 %v3929_v3, %v3930_v2  ;;  %v3694_v18 = vadd.f32 %v3608_v11, %v8055_v44  ;;  %v3433_v57 = vpop.f32.mrf.mxu0  ;;  %v3522_v4 = vpop.f32.mrf.mxu1 }
 0x3ed   :  { %v4769_v35 = vunpack.c.l.b16 %v4315_v9  ;;  %v4770_v58 = vunpack.c.l.b16 %v4316_v40  ;;  %v3934_v30 = vmax.f32 %v3932_v5, %v3933_v0  ;;  %v3941_v8 = vmax.f32 %v3939_v14, %v3940_v50 }
 0x3ee   :  { %v4221_v59 = vadd.f32 %v8576_v6, %v3931_v39  ;;  %v3796_v52 = vadd.f32 %v8525_v12, %v3694_v18  ;;  %v3695_v13 = vadd.f32 %v3433_v57, %v8058_v51  ;;  %v3696_v62 = vadd.f32 %v3522_v4, %v8068_v19 }
 0x3ef   :  { %v4789_v44 = vrot.slane %v4769_v35, 6  ;;  %v4803_v3 = vrot.slane %v4770_v58, 6  ;;  %v3935_v27 = vrot.slane %v3934_v30, 2  ;;  %v3942_v42 = vrot.slane %v3941_v8, 2  ;;  %3472 = vmatmul.bf16.gmra.mxu0 %v3256_v47  ;;  %3561 = vmatmul.bf16.gmra.mxu1 %v3256_v47  ;;  %v9819_v35 = vld [vmem:[#allocation27_spill] sm:$0xff] }
 0x3f0   :  { %v4269_v54 = vmax.f32 %v4221_v59, 0.0  ;;  %v3946_v2 = vmax.f32 %v3793_v32, %v3796_v52  ;;  %3650 = vmatmul.bf16.gmra.mxu2 %v3256_v47  ;;  %v3161_v5 = vsel %vm8177_vm11, %v5590_v48, %v3160_v15  ;;  %v3164_v14 = vsel %vm8177_vm11, %v3162_v29, %v3163_v24  ;;  %v9818_v29 = vld [vmem:[#allocation109_spill] sm:$0xff] }
 0x3f1   :  { %v8657_v51 = vsel %vm4505_vm13, %v4789_v44, %v8618_v10  ;;  %v8661_v19 = vsel %vm4505_vm13, %v4803_v3, %v8621_v45  ;;  %v3936_v33 = vmax.f32 %v3934_v30, %v3935_v27  ;;  %v3943_v9 = vmax.f32 %v3941_v8, %v3942_v42  ;;  %v6234_v45 = vld [vmem:[%s9136_s0 + $0xac] sm:$0xf]  ;;  %v9820_v30 = vld [vmem:[#allocation32_spill] sm:$0xff] }
 0x3f2   :  { %v4317_v40 = vpack.c.bf16 %v4269_v54, %v4269_v54  ;;  %v3947_v0 = vrot.slane %v3946_v2, 4  ;;  %v3238_v39 = vunpack.c.l.b16 %v3161_v5  ;;  %v3239_v15 = vunpack.c.l.b16 %v3164_v14  ;;  %v9821_v5 = vld [vmem:[#allocation112_spill] sm:$0xff] }
 0x3f3   :  { %v3937_v50 = vrot.slane %v3936_v33, 1  ;;  %v3944_v47 = vrot.slane %v3943_v9, 1  ;;  %v3611_v11 = vpop.f32.mrf.mxu2  ;;  %v3167_v4 = vrot.slane %v6234_v45, 6  ;;  %v3797_v44 = vadd.f32 %v8486_v28, %v3695_v13  ;;  %v9822_v14 = vld [vmem:[#allocation28_spill] sm:$0xff] }
 0x3f4   :  { %v4771_v48 = vunpack.c.l.b16 %v4317_v40  ;;  %v3948_v32 = vmax.f32 %v3946_v2, %v3947_v0  ;;  %v3697_v18 = vadd.f32 %v3611_v11, %v9818_v29  ;;  %v3435_v57 = vpop.f32.mrf.mxu0  ;;  %v3524_v10 = vpop.f32.mrf.mxu1  ;;  %v3798_v3 = vadd.f32 %v8495_v56, %v3696_v62 }
 0x3f5   :  { %v3938_v34 = vmax.f32 %v3936_v33, %v3937_v50  ;;  %v3945_v24 = vmax.f32 %v3943_v9, %v3944_v47  ;;  %v3698_v58 = vadd.f32 %v3435_v57, %v9819_v35  ;;  %v3699_v8 = vadd.f32 %v3524_v10, %v9820_v30 }
 0x3f6   :  { %v4817_v59 = vrot.slane %v4771_v48, 6  ;;  %v3949_v52 = vrot.slane %v3948_v32, 2  ;;  %v2997_v33 = vadd.f32 %v9822_v14, %v9821_v5  ;;  %v3257_v11 = vpack.c.b16 %v3239_v15, %v3238_v39  ;;  %v6235_v48 = vld [vmem:[%s9136_s0 + $0xa8] sm:$0xf]  ;;  %v6236_v39 = vld [vmem:[%s9136_s0 + $0xb0] sm:$0x3] }
 0x3f7   :  { %v4222_v27 = vadd.f32 %v8561_v1, %v3938_v34  ;;  %v4223_v42 = vadd.f32 %v8565_v61, %v3945_v24  ;;  %v3800_v54 = vadd.f32 %v8501_v37, %v3698_v58  ;;  %v3801_v2 = vadd.f32 %v8506_v38, %v3699_v8  ;;  %v9824_v5 = vld [vmem:[#allocation113_spill] sm:$0xff] }
 0x3f8   :  { %v8679_v9 = vsel %vm4505_vm13, %v4817_v59, %v8637_v25  ;;  %v3950_v40 = vmax.f32 %v3948_v32, %v3949_v52  ;;  %v5591_v29 = vrot.slane %v6235_v48, 10  ;;  %v3169_v57 = vrot.slane %v3167_v4, 4 }
 0x3f9   :  { %v4270_v13 = vmax.f32 %v4222_v27, 0.0  ;;  %v4271_v0 = vmax.f32 %v4223_v42, 0.0  ;;  %v3953_v62 = vmax.f32 %v3797_v44, %v3800_v54  ;;  %v3960_v50 = vmax.f32 %v3798_v3, %v3801_v2  ;;  %v9823_v54 = vld [vmem:[#allocation116_spill] sm:$0xff] }
 0x3fa   :  { %v3951_v47 = vrot.slane %v3950_v40, 1  ;;  %v3799_v32 = vadd.f32 %v8520_v63, %v3697_v18  ;;  %v3170_v15 = vrot.slane %v6236_v39, 6 }
 0x3fb   :  { %v4318_v10 = vpack.c.bf16 %v4270_v13, %v4270_v13  ;;  %v4319_v45 = vpack.c.bf16 %v4271_v0, %v4271_v0  ;;  %v3954_v34 = vrot.slane %v3953_v62, 4  ;;  %v3961_v24 = vrot.slane %v3960_v50, 4  ;;  %v3613_v25 = vpop.f32.mrf.mxu2 }
 0x3fc   :  { %v3952_v35 = vmax.f32 %v3950_v40, %v3951_v47  ;;  %v3700_v58 = vadd.f32 %v3613_v25, %v2997_v33  ;;  %v3438_v30 = vpop.f32.mrf.mxu0  ;;  %v3527_v8 = vpop.f32.mrf.mxu1 }
 0x3fd   :  { %v4772_v59 = vunpack.c.l.b16 %v4318_v10  ;;  %v4773_v52 = vunpack.c.l.b16 %v4319_v45  ;;  %v3955_v44 = vmax.f32 %v3953_v62, %v3954_v34  ;;  %v3962_v3 = vmax.f32 %v3960_v50, %v3961_v24 }
 0x3fe   :  { %v4224_v27 = vadd.f32 %v8576_v6, %v3952_v35  ;;  %v3802_v42 = vadd.f32 %v8525_v12, %v3700_v58  ;;  %v3701_v2 = vadd.f32 %v3438_v30, %v9823_v54  ;;  %v3702_v18 = vadd.f32 %v3527_v8, %v9824_v5 }
 0x3ff   :  { %v4791_v14 = vrot.slane %v4772_v59, 5  ;;  %v4805_v33 = vrot.slane %v4773_v52, 5  ;;  %v3956_v40 = vrot.slane %v3955_v44, 2  ;;  %v3963_v13 = vrot.slane %v3962_v3, 2  ;;  %3477 = vmatmul.bf16.gmra.mxu0 %v3257_v11  ;;  %3566 = vmatmul.bf16.gmra.mxu1 %v3257_v11 }
 0x400   :  { %v4272_v0 = vmax.f32 %v4224_v27, 0.0  ;;  %v3967_v47 = vmax.f32 %v3799_v32, %v3802_v42  ;;  %3655 = vmatmul.bf16.gmra.mxu2 %v3257_v11  ;;  %v3168_v62 = vsel %vm8177_vm11, %v5591_v29, %v3167_v4  ;;  %v3171_v50 = vsel %vm8177_vm11, %v3169_v57, %v3170_v15  ;;  %v9825_v57 = vld [vmem:[#allocation29_spill] sm:$0xff] }
 0x401   :  { %v8698_v48 = vsel %vm4508_vm14, %v4791_v14, %v8657_v51  ;;  %v8702_v10 = vsel %vm4508_vm14, %v4805_v33, %v8661_v19  ;;  %v3957_v45 = vmax.f32 %v3955_v44, %v3956_v40  ;;  %v3964_v34 = vmax.f32 %v3962_v3, %v3963_v13  ;;  %v6237_v19 = vld [vmem:[%s9136_s0 + $0xb8] sm:$0xf]  ;;  %v9826_v44 = vld [vmem:[#allocation117_spill] sm:$0xff]  ;;  %v6079_v33 = vld [vmem:[#allocation4 + $0x30] sm:$0xff] }
 0x402   :  { %v4320_v24 = vpack.c.bf16 %v4272_v0, %v4272_v0  ;;  %v3968_v25 = vrot.slane %v3967_v47, 4  ;;  %v3240_v58 = vunpack.c.l.b16 %v3168_v62  ;;  %v3241_v4 = vunpack.c.l.b16 %v3171_v50  ;;  %v9827_v62 = vld [vmem:[#allocation115_spill] sm:$0xff]  ;;  %4701 = vmatpush.bf16.msrb.mxu3 %v6079_v33 }
 0x403   :  { %v3958_v35 = vrot.slane %v3957_v45, 1  ;;  %v3965_v11 = vrot.slane %v3964_v34, 1  ;;  %v3616_v32 = vpop.f32.mrf.mxu2  ;;  %v3174_v15 = vrot.slane %v6237_v19, 6  ;;  %v3803_v5 = vadd.f32 %v8486_v28, %v3701_v2 }
 0x404   :  { %v4774_v29 = vunpack.c.l.b16 %v4320_v24  ;;  %v3969_v30 = vmax.f32 %v3967_v47, %v3968_v25  ;;  %v3703_v8 = vadd.f32 %v3616_v32, %v9825_v57  ;;  %v3440_v39 = vpop.f32.mrf.mxu0  ;;  %v3529_v51 = vpop.f32.mrf.mxu1  ;;  %v3804_v14 = vadd.f32 %v8495_v56, %v3702_v18 }
 0x405   :  { %v3959_v59 = vmax.f32 %v3957_v45, %v3958_v35  ;;  %v3966_v52 = vmax.f32 %v3964_v34, %v3965_v11  ;;  %v3704_v3 = vadd.f32 %v3440_v39, %v9826_v44  ;;  %v3705_v27 = vadd.f32 %v3529_v51, %v8135_v17  ;;  %v6238_v11 = vld [vmem:[%s9136_s0 + $0xb4] sm:$0xf] }
 0x406   :  { %v4819_v42 = vrot.slane %v4774_v29, 5  ;;  %v3970_v54 = vrot.slane %v3969_v30, 2  ;;  %v3003_v50 = vadd.f32 %v8132_v53, %v9827_v62  ;;  %v3258_v35 = vpack.c.b16 %v3241_v4, %v3240_v58  ;;  %v6239_v58 = vld [vmem:[%s9136_s0 + $0xbc] sm:$0x3] }
 0x407   :  { %v4225_v40 = vadd.f32 %v8561_v1, %v3959_v59  ;;  %v4226_v13 = vadd.f32 %v8565_v61, %v3966_v52  ;;  %v3806_v0 = vadd.f32 %v8501_v37, %v3704_v3  ;;  %v3807_v47 = vadd.f32 %v8506_v38, %v3705_v27 }
 0x408   :  { %v8720_v17 = vsel %vm4508_vm14, %v4819_v42, %v8679_v9  ;;  %v3971_v45 = vmax.f32 %v3969_v30, %v3970_v54  ;;  %v5592_v32 = vrot.slane %v6238_v11, 10  ;;  %v3176_v29 = vrot.slane %v3174_v15, 4 }
 0x409   :  { %v4273_v2 = vmax.f32 %v4225_v40, 0.0  ;;  %v4274_v18 = vmax.f32 %v4226_v13, 0.0  ;;  %v3974_v34 = vmax.f32 %v3803_v5, %v3806_v0  ;;  %v3981_v24 = vmax.f32 %v3804_v14, %v3807_v47 }
 0x40a   :  { %v3972_v25 = vrot.slane %v3971_v45, 1  ;;  %v3805_v19 = vadd.f32 %v8520_v63, %v3703_v8  ;;  %v3177_v4 = vrot.slane %v6239_v58, 6 }
 0x40b   :  { %v4321_v53 = vpack.c.bf16 %v4273_v2, %v4273_v2  ;;  %v4322_v57 = vpack.c.bf16 %v4274_v18, %v4274_v18  ;;  %v3975_v39 = vrot.slane %v3974_v34, 4  ;;  %v3982_v9 = vrot.slane %v3981_v24, 4  ;;  %v3618_v51 = vpop.f32.mrf.mxu2 }
 0x40c   :  { %v3973_v30 = vmax.f32 %v3971_v45, %v3972_v25  ;;  %v3706_v59 = vadd.f32 %v3618_v51, %v3003_v50  ;;  %v3443_v52 = vpop.f32.mrf.mxu0  ;;  %v3532_v44 = vpop.f32.mrf.mxu1  ;;  %v3175_v45 = vsel %vm8177_vm11, %v5592_v32, %v3174_v15 }
 0x40d   :  { %v4775_v3 = vunpack.c.l.b16 %v4321_v53  ;;  %v4776_v27 = vunpack.c.l.b16 %v4322_v57  ;;  %v3976_v42 = vmax.f32 %v3974_v34, %v3975_v39  ;;  %v3983_v54 = vmax.f32 %v3981_v24, %v3982_v9 }
 0x40e   :  { %v4227_v5 = vadd.f32 %v8576_v6, %v3973_v30  ;;  %v3808_v14 = vadd.f32 %v8525_v12, %v3706_v59  ;;  %v3707_v33 = vadd.f32 %v3443_v52, %v8138_v55  ;;  %v3708_v8 = vadd.f32 %v3532_v44, %v8144_v49 }
 0x40f   :  { %v4793_v40 = vrot.slane %v4775_v3, 4  ;;  %v4807_v13 = vrot.slane %v4776_v27, 4  ;;  %v3977_v0 = vrot.slane %v3976_v42, 2  ;;  %v3984_v47 = vrot.slane %v3983_v54, 2  ;;  %3482 = vmatmul.bf16.gmra.mxu0 %v3258_v35  ;;  %3571 = vmatmul.bf16.gmra.mxu1 %v3258_v35 }
 0x410   :  { %v4275_v62 = vmax.f32 %v4227_v5, 0.0  ;;  %v3988_v50 = vmax.f32 %v3805_v19, %v3808_v14  ;;  %3660 = vmatmul.bf16.gmra.mxu2 %v3258_v35  ;;  %v3178_v34 = vsel %vm8177_vm11, %v3176_v29, %v3177_v4  ;;  %v3242_v57 = vunpack.c.l.b16 %v3175_v45 }
 0x411   :  { %v3978_v2 = vmax.f32 %v3976_v42, %v3977_v0  ;;  %v3985_v18 = vmax.f32 %v3983_v54, %v3984_v47  ;;  %v8739_v55 = vsel %vm4511_vm15, %v4793_v40, %v8698_v48  ;;  %v8743_v25 = vsel %vm4511_vm15, %v4807_v13, %v8702_v10 }
 0x412   :  { %v4323_v49 = vpack.c.bf16 %v4275_v62, %v4275_v62  ;;  %v3989_v24 = vrot.slane %v3988_v50, 4  ;;  %v3243_v9 = vunpack.c.l.b16 %v3178_v34  ;;  %v3809_v52 = vadd.f32 %v8486_v28, %v3707_v33 }
 0x413   :  { %v3979_v11 = vrot.slane %v3978_v2, 1  ;;  %v3986_v35 = vrot.slane %v3985_v18, 1  ;;  %v3621_v53 = vpop.f32.mrf.mxu2  ;;  %v3810_v44 = vadd.f32 %v8495_v56, %v3708_v8  ;;  %v3009_v14 = vadd.f32 %v8159_v36, %v8152_v60 }
 0x414   :  { %v4777_v15 = vunpack.c.l.b16 %v4323_v49  ;;  %v3990_v32 = vmax.f32 %v3988_v50, %v3989_v24  ;;  %v3709_v39 = vadd.f32 %v3621_v53, %v8146_v7  ;;  %v3445_v26 = vpop.f32.mrf.mxu0  ;;  %v3534_v29 = vpop.f32.mrf.mxu1  ;;  %v3259_v8 = vpack.c.b16 %v3243_v9, %v3242_v57 }
 0x415   :  { %v3980_v51 = vmax.f32 %v3978_v2, %v3979_v11  ;;  %v3987_v48 = vmax.f32 %v3985_v18, %v3986_v35  ;;  %v3710_v30 = vadd.f32 %v3445_v26, %v8155_v23  ;;  %v3711_v19 = vadd.f32 %v3534_v29, %v8162_v43 }
 0x416   :  { %v4821_v59 = vrot.slane %v4777_v15, 4  ;;  %v3991_v10 = vrot.slane %v3990_v32, 2  ;;  %v3811_v45 = vadd.f32 %v8520_v63, %v3709_v39 }
 0x417   :  { %v4228_v58 = vadd.f32 %v8561_v1, %v3980_v51  ;;  %v4229_v4 = vadd.f32 %v8565_v61, %v3987_v48  ;;  %v3812_v7 = vadd.f32 %v8501_v37, %v3710_v30  ;;  %v3813_v3 = vadd.f32 %v8506_v38, %v3711_v19 }
 0x418   :  { %v3992_v27 = vmax.f32 %v3990_v32, %v3991_v10  ;;  %v8756_v23 = vsel %vm4511_vm15, %v4821_v59, %v8720_v17 }
 0x419   :  { %v4276_v43 = vmax.f32 %v4228_v58, 0.0  ;;  %v4277_v42 = vmax.f32 %v4229_v4, 0.0  ;;  %v3995_v54 = vmax.f32 %v3809_v52, %v3812_v7  ;;  %v4002_v5 = vmax.f32 %v3810_v44, %v3813_v3 }
 0x41a   :  { %v3993_v33 = vrot.slane %v3992_v27, 1 }
 0x41b   :  { %v4324_v40 = vpack.c.bf16 %v4276_v43, %v4276_v43  ;;  %v4325_v13 = vpack.c.bf16 %v4277_v42, %v4277_v42  ;;  %v3996_v0 = vrot.slane %v3995_v54, 4  ;;  %v4003_v47 = vrot.slane %v4002_v5, 4  ;;  %v3623_v62 = vpop.f32.mrf.mxu2 }
 0x41c   :  { %v3994_v50 = vmax.f32 %v3992_v27, %v3993_v33  ;;  %v3712_v2 = vadd.f32 %v3623_v62, %v3009_v14  ;;  %v3448_v17 = vpop.f32.mrf.mxu0  ;;  %v3537_v18 = vpop.f32.mrf.mxu1  ;;  %v6078_v14 = vld [vmem:[#allocation4 + $0x28] sm:$0xff] }
 0x41d   :  { %v4778_v34 = vunpack.c.l.b16 %v4324_v40  ;;  %v4779_v49 = vunpack.c.l.b16 %v4325_v13  ;;  %v3997_v24 = vmax.f32 %v3995_v54, %v3996_v0  ;;  %v4004_v11 = vmax.f32 %v4002_v5, %v4003_v47  ;;  %4702 = vmatpush.bf16.msrb.mxu3 %v6078_v14 }
 0x41e   :  { %v4230_v60 = vadd.f32 %v8576_v6, %v3994_v50  ;;  %v3814_v36 = vadd.f32 %v8525_v12, %v3712_v2  ;;  %v3713_v35 = vadd.f32 %v3448_v17, %v8168_v41  ;;  %v3714_v53 = vadd.f32 %v3537_v18, %v8184_v31 }
 0x41f   :  { %v4795_v57 = vrot.slane %v4778_v34, 3  ;;  %v4809_v15 = vrot.slane %v4779_v49, 3  ;;  %v3998_v32 = vrot.slane %v3997_v24, 2  ;;  %v4005_v39 = vrot.slane %v4004_v11, 2  ;;  %3487 = vmatmul.bf16.gmra.mxu0 %v3259_v8  ;;  %3576 = vmatmul.bf16.gmra.mxu1 %v3259_v8 }
 0x420   :  { %v4278_v26 = vmax.f32 %v4230_v60, 0.0  ;;  %v4009_v29 = vmax.f32 %v3811_v45, %v3814_v36  ;;  %3665 = vmatmul.bf16.gmra.mxu2 %v3259_v8  ;;  %v3815_v5 = vadd.f32 %v8486_v28, %v3713_v35 }
 0x421   :  { %v3999_v9 = vmax.f32 %v3997_v24, %v3998_v32  ;;  %v4006_v51 = vmax.f32 %v4004_v11, %v4005_v39  ;;  %v4796_v48 = vsel %vm4514_vm0, %v4795_v57, %v8739_v55  ;;  %v4810_v41 = vsel %vm4514_vm0, %v4809_v15, %v8743_v25  ;;  %v9829_v57 = vld [vmem:[#allocation118_spill] sm:$0xff] }
 0x422   :  { %v4326_v30 = vpack.c.bf16 %v4278_v26, %v4278_v26  ;;  %v4010_v19 = vrot.slane %v4009_v29, 4  ;;  %v3816_v25 = vadd.f32 %v8495_v56, %v3714_v53  ;;  %v3015_v56 = vadd.f32 %v8199_v46, %v8192_v22  ;;  %v9828_v46 = vld [vmem:[#allocation34_spill] sm:$0xff] }
 0x423   :  { %v4000_v31 = vrot.slane %v3999_v9, 1  ;;  %v4007_v59 = vrot.slane %v4006_v51, 1  ;;  %v3626_v10 = vpop.f32.mrf.mxu2 }
 0x424   :  { %v4780_v52 = vunpack.c.l.b16 %v4326_v30  ;;  %v4011_v44 = vmax.f32 %v4009_v29, %v4010_v19  ;;  %v3715_v58 = vadd.f32 %v3626_v10, %v8186_v16  ;;  %v3450_v4 = vpop.f32.mrf.mxu0  ;;  %v3539_v7 = vpop.f32.mrf.mxu1 }
 0x425   :  { %v4001_v3 = vmax.f32 %v3999_v9, %v4000_v31  ;;  %v4008_v27 = vmax.f32 %v4006_v51, %v4007_v59  ;;  %v3716_v43 = vadd.f32 %v3450_v4, %v8195_v21  ;;  %v3717_v55 = vadd.f32 %v3539_v7, %v8202_v20  ;;  %v9830_v7 = vld [vmem:[#allocation30_spill] sm:$0xff] }
 0x426   :  { %v4823_v42 = vrot.slane %v4780_v52, 3  ;;  %v4012_v54 = vrot.slane %v4011_v44, 2  ;;  %v3817_v18 = vadd.f32 %v8520_v63, %v3715_v58 }
 0x427   :  { %v4231_v33 = vadd.f32 %v8561_v1, %v4001_v3  ;;  %v4232_v8 = vadd.f32 %v8565_v61, %v4008_v27  ;;  %v3818_v16 = vadd.f32 %v8501_v37, %v3716_v43  ;;  %v3819_v40 = vadd.f32 %v8506_v38, %v3717_v55 }
 0x428   :  { %v4013_v13 = vmax.f32 %v4011_v44, %v4012_v54  ;;  %v8780_v21 = vsel %vm4514_vm0, %v4823_v42, %v8756_v23  ;;  %v9831_v54 = vld [vmem:[#allocation37_spill] sm:$0xff] }
 0x429   :  { %v4279_v20 = vmax.f32 %v4231_v33, 0.0  ;;  %v4280_v0 = vmax.f32 %v4232_v8, 0.0  ;;  %v4016_v28 = vmax.f32 %v3815_v5, %v3818_v16  ;;  %v4023_v47 = vmax.f32 %v3816_v25, %v3819_v40  ;;  %v8801_v33 = vld [vmem:[%s9138_s2] sm:$0xff]  ;;  %v8807_v16 = vld [vmem:[%s9138_s2 + $0x8] sm:$0xff] }
 0x42a   :  { %v4014_v62 = vrot.slane %v4013_v13, 1 }
 0x42b   :  { %v4327_v50 = vpack.c.bf16 %v4279_v20, %v4279_v20  ;;  %v4328_v45 = vpack.c.bf16 %v4280_v0, %v4280_v0  ;;  %v4017_v2 = vrot.slane %v4016_v28, 4  ;;  %v4024_v37 = vrot.slane %v4023_v47, 4  ;;  %v3628_v17 = vpop.f32.mrf.mxu2  ;;  %v8815_v0 = vld [vmem:[%s9138_s2 + $0x18] sm:$0xff] }
 0x42c   :  { %v4015_v38 = vmax.f32 %v4013_v13, %v4014_v62  ;;  %v3718_v34 = vadd.f32 %v3628_v17, %v3015_v56  ;;  %v3453_v49 = vpop.f32.mrf.mxu0  ;;  %v3542_v23 = vpop.f32.mrf.mxu1 }
 0x42d   :  { %v4781_v24 = vunpack.c.l.b16 %v4327_v50  ;;  %v4782_v11 = vunpack.c.l.b16 %v4328_v45  ;;  %v4018_v60 = vmax.f32 %v4016_v28, %v4017_v2  ;;  %v4025_v36 = vmax.f32 %v4023_v47, %v4024_v37  ;;  %v8821_v47 = vld [vmem:[%s9138_s2 + $0x20] sm:$0xff] }
 0x42e   :  { %v4233_v35 = vadd.f32 %v8576_v6, %v4015_v38  ;;  %v3820_v22 = vadd.f32 %v8525_v12, %v3718_v34  ;;  %v3719_v53 = vadd.f32 %v3453_v49, %v9828_v46  ;;  %v3720_v15 = vadd.f32 %v3542_v23, %v9829_v57  ;;  %v9833_v38 = vld [vmem:[#allocation31_spill] sm:$0xff] }
 0x42f   :  { %v4797_v32 = vrot.slane %v4781_v24, 2  ;;  %v4811_v39 = vrot.slane %v4782_v11, 2  ;;  %v4019_v26 = vrot.slane %v4018_v60, 2  ;;  %v4026_v63 = vrot.slane %v4025_v36, 2 }
 0x430   :  { %v4281_v29 = vmax.f32 %v4233_v35, 0.0  ;;  %v4030_v9 = vmax.f32 %v3817_v18, %v3820_v22  ;;  %v3821_v8 = vadd.f32 %v8801_v33, %v3719_v53  ;;  %v3822_v40 = vadd.f32 %v8807_v16, %v3720_v15  ;;  %v9834_v18 = vld [vmem:[#allocation33_spill] sm:$0xff]  ;;  %v8831_v22 = vld [vmem:[%s9138_s2 + $0x10] sm:$0xff] }
 0x431   :  { %v4020_v51 = vmax.f32 %v4018_v60, %v4019_v26  ;;  %v4027_v30 = vmax.f32 %v4025_v36, %v4026_v63  ;;  %v8790_v19 = vsel %vm4517_vm1, %v4797_v32, %v4796_v48  ;;  %v8793_v31 = vsel %vm4517_vm1, %v4811_v39, %v4810_v41  ;;  %v9832_v48 = vld [vmem:[#allocation119_spill] sm:$0xff] }
 0x432   :  { %v4329_v59 = vpack.c.bf16 %v4281_v29, %v4281_v29  ;;  %v4031_v12 = vrot.slane %v4030_v9, 4  ;;  %v3021_v34 = vadd.f32 %v9834_v18, %v9833_v38  ;;  %v8838_v29 = vld [vmem:[%s9138_s2 + $0x28] sm:$0xff] }
 0x433   :  { %v4021_v10 = vrot.slane %v4020_v51, 1  ;;  %v4028_v52 = vrot.slane %v4027_v30, 1  ;;  %v3631_v44 = vpop.f32.mrf.mxu2 }
 0x434   :  { %v4783_v58 = vunpack.c.l.b16 %v4329_v59  ;;  %v4032_v4 = vmax.f32 %v4030_v9, %v4031_v12  ;;  %v3721_v3 = vadd.f32 %v3631_v44, %v9830_v7  ;;  %v3455_v27 = vpop.f32.mrf.mxu0  ;;  %v3544_v43 = vpop.f32.mrf.mxu1  ;;  %v9836_v59 = vld [vmem:[#allocation121_spill] sm:$0xff] }
 0x435   :  { %v4022_v55 = vmax.f32 %v4020_v51, %v4021_v10  ;;  %v4029_v42 = vmax.f32 %v4027_v30, %v4028_v52  ;;  %v3722_v5 = vadd.f32 %v3455_v27, %v9831_v54  ;;  %v3723_v25 = vadd.f32 %v3544_v43, %v9832_v48  ;;  %v9835_v51 = vld [vmem:[#allocation39_spill] sm:$0xff] }
 0x436   :  { %v4825_v14 = vrot.slane %v4783_v58, 2  ;;  %v4033_v41 = vrot.slane %v4032_v4, 2 }
 0x437   :  { %v4234_v13 = vadd.f32 %v8561_v1, %v4022_v55  ;;  %v4235_v20 = vadd.f32 %v8565_v61, %v4029_v42  ;;  %v3824_v28 = vadd.f32 %v8815_v0, %v3722_v5  ;;  %v3825_v56 = vadd.f32 %v8821_v47, %v3723_v25 }
 0x438   :  { %v4034_v62 = vmax.f32 %v4032_v4, %v4033_v41  ;;  %v4826_v50 = vsel %vm4517_vm1, %v4825_v14, %v8780_v21  ;;  %v3823_v21 = vadd.f32 %v8831_v22, %v3721_v3  ;;  %v9837_v41 = vld [vmem:[#allocation120_spill] sm:$0xff] }
 0x439   :  { %v4282_v45 = vmax.f32 %v4234_v13, 0.0  ;;  %v4283_v2 = vmax.f32 %v4235_v20, 0.0  ;;  %v4037_v37 = vmax.f32 %v3821_v8, %v3824_v28  ;;  %v4044_v17 = vmax.f32 %v3822_v40, %v3825_v56  ;;  %v9838_v20 = vld [vmem:[#allocation36_spill] sm:$0xff]  ;;  %v9839_v56 = vld [vmem:[#allocation38_spill] sm:$0xff] }
 0x43a   :  { %v4035_v49 = vrot.slane %v4034_v62, 1 }
 0x43b   :  { %v4330_v23 = vpack.c.bf16 %v4282_v45, %v4282_v45  ;;  %v4331_v24 = vpack.c.bf16 %v4283_v2, %v4283_v2  ;;  %v4038_v11 = vrot.slane %v4037_v37, 4  ;;  %v4045_v60 = vrot.slane %v4044_v17, 4  ;;  %v3633_v36 = vpop.f32.mrf.mxu2 }
 0x43c   :  { %v4036_v35 = vmax.f32 %v4034_v62, %v4035_v49  ;;  %v3724_v46 = vadd.f32 %v3633_v36, %v3021_v34  ;;  %v3458_v53 = vpop.f32.mrf.mxu0  ;;  %v3547_v57 = vpop.f32.mrf.mxu1  ;;  %v6077_v34 = vld [vmem:[#allocation4 + $0x20] sm:$0xff] }
 0x43d   :  { %v4784_v15 = vunpack.c.l.b16 %v4330_v23  ;;  %v4785_v32 = vunpack.c.l.b16 %v4331_v24  ;;  %v4039_v39 = vmax.f32 %v4037_v37, %v4038_v11  ;;  %v4046_v26 = vmax.f32 %v4044_v17, %v4045_v60  ;;  %v9840_v11 = vld [vmem:[#allocation35_spill] sm:$0xff]  ;;  %v9841_v60 = vld [vmem:[#allocation42_spill] sm:$0xff]  ;;  %4703 = vmatpush.bf16.msrb.mxu3 %v6077_v34 }
 0x43e   :  { %v4236_v63 = vadd.f32 %v8576_v6, %v4036_v35  ;;  %v3826_v9 = vadd.f32 %v8838_v29, %v3724_v46  ;;  %v3725_v30 = vadd.f32 %v3458_v53, %v9835_v51  ;;  %v3726_v12 = vadd.f32 %v3547_v57, %v9836_v59  ;;  %v9842_v59 = vld [vmem:[#allocation122_spill] sm:$0xff] }
 0x43f   :  { %v4799_v10 = vrot.slane %v4784_v15, 1  ;;  %v4813_v52 = vrot.slane %v4785_v32, 1  ;;  %v4040_v44 = vrot.slane %v4039_v39, 2  ;;  %v4047_v58 = vrot.slane %v4046_v26, 2 }
 0x440   :  { %v4284_v4 = vmax.f32 %v4236_v63, 0.0  ;;  %v4051_v7 = vmax.f32 %v3823_v21, %v3826_v9  ;;  %v3828_v2 = vadd.f32 %v8807_v16, %v3726_v12  ;;  %v3027_v36 = vadd.f32 %v9841_v60, %v9840_v11 }
 0x441   :  { %v4041_v3 = vmax.f32 %v4039_v39, %v4040_v44  ;;  %v8845_v27 = vsel %vm4520_vm2, %v4799_v10, %v8790_v19  ;;  %v8849_v43 = vsel %vm4520_vm2, %v4813_v52, %v8793_v31  ;;  %v4048_v42 = vmax.f32 %v4046_v26, %v4047_v58  ;;  %v9843_v10 = vld [vmem:[#allocation123_spill] sm:$0xff] }
 0x442   :  { %v4332_v55 = vpack.c.bf16 %v4284_v4, %v4284_v4  ;;  %v4052_v54 = vrot.slane %v4051_v7, 4  ;;  %v3827_v31 = vadd.f32 %v8801_v33, %v3725_v30 }
 0x443   :  { %v3636_v5 = vpop.f32.mrf.mxu2  ;;  %v4042_v25 = vrot.slane %v4041_v3, 1  ;;  %v4049_v45 = vrot.slane %v4048_v42, 1 }
 0x444   :  { %v4786_v48 = vunpack.c.l.b16 %v4332_v55  ;;  %v4053_v14 = vmax.f32 %v4051_v7, %v4052_v54  ;;  %v3727_v8 = vadd.f32 %v3636_v5, %v9837_v41  ;;  %v3460_v40 = vpop.f32.mrf.mxu0  ;;  %v3549_v13 = vpop.f32.mrf.mxu1 }
 0x445   :  { %v3728_v28 = vadd.f32 %v3460_v40, %v9838_v20  ;;  %v3729_v19 = vadd.f32 %v3549_v13, %v9839_v56  ;;  %v4043_v38 = vmax.f32 %v4041_v3, %v4042_v25  ;;  %v4050_v35 = vmax.f32 %v4048_v42, %v4049_v45  ;;  %v9844_v13 = vld [vmem:[#allocation44_spill] sm:$0xff] }
 0x446   :  { %v4827_v62 = vrot.slane %v4786_v48, 1  ;;  %v4054_v18 = vrot.slane %v4053_v14, 2  ;;  %v3829_v63 = vadd.f32 %v8831_v22, %v3727_v8  ;;  %v9845_v45 = vld [vmem:[#allocation40_spill] sm:$0xff] }
 0x447   :  { %v3830_v37 = vadd.f32 %v8815_v0, %v3728_v28  ;;  %v3831_v17 = vadd.f32 %v8821_v47, %v3729_v19  ;;  %v4237_v57 = vadd.f32 %v8561_v1, %v4043_v38  ;;  %v4238_v51 = vadd.f32 %v8565_v61, %v4050_v35 }
 0x448   :  { %v8859_v49 = vsel %vm4520_vm2, %v4827_v62, %v4826_v50  ;;  %v4055_v15 = vmax.f32 %v4053_v14, %v4054_v18 }
 0x449   :  { %v4058_v23 = vmax.f32 %v3827_v31, %v3830_v37  ;;  %v4065_v24 = vmax.f32 %v3828_v2, %v3831_v17  ;;  %v4285_v4 = vmax.f32 %v4237_v57, 0.0  ;;  %v4286_v54 = vmax.f32 %v4238_v51, 0.0  ;;  %v9846_v2 = vld [vmem:[#allocation47_spill] sm:$0xff] }
 0x44a   :  { %v4056_v7 = vrot.slane %v4055_v15, 1 }
 0x44b   :  { %v4059_v21 = vrot.slane %v4058_v23, 4  ;;  %v4066_v46 = vrot.slane %v4065_v24, 4  ;;  %v3638_v53 = vpop.f32.mrf.mxu2  ;;  %v4333_v41 = vpack.c.bf16 %v4285_v4, %v4285_v4  ;;  %v4334_v17 = vpack.c.bf16 %v4286_v54, %v4286_v54 }
 0x44c   :  { %v3730_v32 = vadd.f32 %v3638_v53, %v3027_v36  ;;  %v3463_v39 = vpop.f32.mrf.mxu0  ;;  %v3552_v26 = vpop.f32.mrf.mxu1  ;;  %v4057_v8 = vmax.f32 %v4055_v15, %v4056_v7 }
 0x44d   :  { %v4060_v50 = vmax.f32 %v4058_v23, %v4059_v21  ;;  %v4067_v9 = vmax.f32 %v4065_v24, %v4066_v46  ;;  %v3731_v12 = vadd.f32 %v3463_v39, %v9842_v59  ;;  %v3732_v52 = vadd.f32 %v3552_v26, %v9843_v10  ;;  %v8874_v23 = vpop.f32.mrf.mxu3  ;;  %v9848_v39 = vld [vmem:[#allocation41_spill] sm:$0xff] }
 0x44e   :  { %v3832_v30 = vadd.f32 %v8838_v29, %v3730_v32  ;;  %v4239_v35 = vadd.f32 %v8576_v6, %v4057_v8  ;;  %v9847_v32 = vld [vmem:[#allocation124_spill] sm:$0xff]  ;;  %v9850_v8 = vld [vmem:[#allocation125_spill] sm:$0xff] }
 0x44f   :  { %v4061_v44 = vrot.slane %v4060_v50, 2  ;;  %v4068_v58 = vrot.slane %v4067_v9, 2  ;;  %v3833_v18 = vadd.f32 %v8801_v33, %v3731_v12  ;;  %v3834_v34 = vadd.f32 %v8807_v16, %v3732_v52 }
 0x450   :  { %v4072_v3 = vmax.f32 %v3829_v63, %v3832_v30  ;;  %v3033_v26 = vadd.f32 %v9848_v39, %v9847_v32  ;;  %v4477_v63 = vunpack.c.l.b16 %v4333_v41  ;;  %v4287_v52 = vmax.f32 %v4239_v35, 0.0 }
 0x451   :  { %v4062_v55 = vmax.f32 %v4060_v50, %v4061_v44  ;;  %v4069_v42 = vmax.f32 %v4067_v9, %v4068_v58  ;;  %v4478_v50 = vunpack.c.l.b16 %v4334_v17 }
 0x452   :  { %v4073_v5 = vrot.slane %v4072_v3, 4 }
 0x453   :  { %v4063_v48 = vrot.slane %v4062_v55, 1  ;;  %v4070_v25 = vrot.slane %v4069_v42, 1  ;;  %v3641_v14 = vpop.f32.mrf.mxu2 }
 0x454   :  { %v4074_v40 = vmax.f32 %v4072_v3, %v4073_v5  ;;  %v3733_v20 = vadd.f32 %v3641_v14, %v9844_v13  ;;  %v3465_v28 = vpop.f32.mrf.mxu0  ;;  %v3554_v56 = vpop.f32.mrf.mxu1  ;;  %v9849_v14 = vld [vmem:[#allocation43_spill] sm:$0xff] }
 0x455   :  { %v4064_v19 = vmax.f32 %v4062_v55, %v4063_v48  ;;  %v4071_v62 = vmax.f32 %v4069_v42, %v4070_v25  ;;  %v3734_v31 = vadd.f32 %v3465_v28, %v9845_v45  ;;  %v3735_v37 = vadd.f32 %v3554_v56, %v9846_v2 }
 0x456   :  { %v4075_v38 = vrot.slane %v4074_v40, 2  ;;  %v3835_v58 = vadd.f32 %v8831_v22, %v3733_v20  ;;  %v4335_v20 = vpack.c.bf16 %v4287_v52, %v4287_v52 }
 0x457   :  { %v4240_v24 = vadd.f32 %v8561_v1, %v4064_v19  ;;  %v4241_v11 = vadd.f32 %v8565_v61, %v4071_v62  ;;  %v3836_v60 = vadd.f32 %v8815_v0, %v3734_v31  ;;  %v3837_v36 = vadd.f32 %v8821_v47, %v3735_v37  ;;  %v8888_v31 = vpop.f32.mrf.mxu3 }
 0x458   :  { %v4076_v21 = vmax.f32 %v4074_v40, %v4075_v38 }
 0x459   :  { %v4288_v46 = vmax.f32 %v4240_v24, 0.0  ;;  %v4289_v53 = vmax.f32 %v4241_v11, 0.0  ;;  %v4079_v57 = vmax.f32 %v3833_v18, %v3836_v60  ;;  %v4086_v15 = vmax.f32 %v3834_v34, %v3837_v36 }
 0x45a   :  { %v4077_v9 = vrot.slane %v4076_v21, 1  ;;  %v4479_v36 = vunpack.c.l.b16 %v4335_v20 }
 0x45b   :  { %v4336_v51 = vpack.c.bf16 %v4288_v46, %v4288_v46  ;;  %v4337_v30 = vpack.c.bf16 %v4289_v53, %v4289_v53  ;;  %v4080_v59 = vrot.slane %v4079_v57, 4  ;;  %v4087_v12 = vrot.slane %v4086_v15, 4  ;;  %v3643_v10 = vpop.f32.mrf.mxu2  ;;  %v9851_v46 = vld [vmem:[#allocation49_spill] sm:$0xff] }
 0x45c   :  { %v4078_v44 = vmax.f32 %v4076_v21, %v4077_v9  ;;  %v3736_v4 = vadd.f32 %v3643_v10, %v3033_v26  ;;  %v3468_v7 = vpop.f32.mrf.mxu0  ;;  %v3557_v3 = vpop.f32.mrf.mxu1  ;;  %v9852_v26 = vld [vmem:[#allocation126_spill] sm:$0xff]  ;;  %v9853_v9 = vld [vmem:[#allocation128_spill] sm:$0xff] }
 0x45d   :  { %v4480_v55 = vunpack.c.l.b16 %v4336_v51  ;;  %v4481_v42 = vunpack.c.l.b16 %v4337_v30  ;;  %v4081_v54 = vmax.f32 %v4079_v57, %v4080_v59  ;;  %v4088_v5 = vmax.f32 %v4086_v15, %v4087_v12 }
 0x45e   :  { %v4242_v48 = vadd.f32 %v8576_v6, %v4078_v44  ;;  %v3838_v25 = vadd.f32 %v8838_v29, %v3736_v4  ;;  %v3737_v41 = vadd.f32 %v3468_v7, %v9849_v14  ;;  %v3738_v40 = vadd.f32 %v3557_v3, %v9850_v8  ;;  %v6076_v3 = vld [vmem:[#allocation4 + $0x18] sm:$0xff] }
 0x45f   :  { %v4501_v13 = vrot.slane %v4480_v55, 7  ;;  %v4522_v28 = vrot.slane %v4481_v42, 7  ;;  %v4082_v56 = vrot.slane %v4081_v54, 2  ;;  %v4089_v19 = vrot.slane %v4088_v5, 2  ;;  %4704 = vmatpush.bf16.msrb.mxu3 %v6076_v3 }
 0x460   :  { %v4290_v62 = vmax.f32 %v4242_v48, 0.0  ;;  %v4093_v45 = vmax.f32 %v3835_v58, %v3838_v25  ;;  %v3839_v59 = vadd.f32 %v8801_v33, %v3737_v41  ;;  %v3840_v12 = vadd.f32 %v8807_v16, %v3738_v40  ;;  %v9854_v48 = vld [vmem:[#allocation127_spill] sm:$0xff]  ;;  %v2950_v41 = vpop.f32.mrf.mxu3 }
 0x461   :  { %v4503_v2 = vsel %vm4502_vm12, %v4501_v13, %v4477_v63  ;;  %v4523_v37 = vsel %vm4502_vm12, %v4522_v28, %v4478_v50  ;;  %v4083_v17 = vmax.f32 %v4081_v54, %v4082_v56  ;;  %v4090_v38 = vmax.f32 %v4088_v5, %v4089_v19 }
 0x462   :  { %v4338_v18 = vpack.c.bf16 %v4290_v62, %v4290_v62  ;;  %v4094_v34 = vrot.slane %v4093_v45, 4  ;;  %v3039_v25 = vadd.f32 %v8874_v23, %v9854_v48 }
 0x463   :  { %v4084_v24 = vrot.slane %v4083_v17, 1  ;;  %v4091_v11 = vrot.slane %v4090_v38, 1  ;;  %v3646_v60 = vpop.f32.mrf.mxu2 }
 0x464   :  { %v4482_v35 = vunpack.c.l.b16 %v4338_v18  ;;  %v4095_v21 = vmax.f32 %v4093_v45, %v4094_v34  ;;  %v3739_v53 = vadd.f32 %v3646_v60, %v9851_v46  ;;  %v3470_v57 = vpop.f32.mrf.mxu0  ;;  %v3559_v15 = vpop.f32.mrf.mxu1 }
 0x465   :  { %v4085_v32 = vmax.f32 %v4083_v17, %v4084_v24  ;;  %v4092_v39 = vmax.f32 %v4090_v38, %v4091_v11  ;;  %v3740_v63 = vadd.f32 %v3470_v57, %v9852_v26  ;;  %v3741_v50 = vadd.f32 %v3559_v15, %v9853_v9 }
 0x466   :  { %v4536_v51 = vrot.slane %v4482_v35, 7  ;;  %v4096_v30 = vrot.slane %v4095_v21, 2  ;;  %v3841_v23 = vadd.f32 %v8831_v22, %v3739_v53 }
 0x467   :  { %v4243_v10 = vadd.f32 %v8561_v1, %v4085_v32  ;;  %v4244_v52 = vadd.f32 %v8565_v61, %v4092_v39  ;;  %v3842_v44 = vadd.f32 %v8815_v0, %v3740_v63  ;;  %v3843_v58 = vadd.f32 %v8821_v47, %v3741_v50  ;;  %v9855_v50 = vld [vmem:[#allocation46_spill] sm:$0xff] }
 0x468   :  { %v8902_v4 = vsel %vm4502_vm12, %v4536_v51, %v4479_v36  ;;  %v4097_v7 = vmax.f32 %v4095_v21, %v4096_v30  ;;  %v9856_v51 = vld [vmem:[#allocation52_spill] sm:$0xff] }
 0x469   :  { %v4291_v55 = vmax.f32 %v4243_v10, 0.0  ;;  %v4292_v42 = vmax.f32 %v4244_v52, 0.0  ;;  %v4100_v54 = vmax.f32 %v3839_v59, %v3842_v44  ;;  %v4107_v5 = vmax.f32 %v3840_v12, %v3843_v58 }
 0x46a   :  { %v4098_v14 = vrot.slane %v4097_v7, 1 }
 0x46b   :  { %v4339_v8 = vpack.c.bf16 %v4291_v55, %v4291_v55  ;;  %v4340_v40 = vpack.c.bf16 %v4292_v42, %v4292_v42  ;;  %v4101_v13 = vrot.slane %v4100_v54, 4  ;;  %v4108_v28 = vrot.slane %v4107_v5, 4  ;;  %v3648_v56 = vpop.f32.mrf.mxu2  ;;  %v9857_v55 = vld [vmem:[#allocation48_spill] sm:$0xff] }
 0x46c   :  { %v4099_v19 = vmax.f32 %v4097_v7, %v4098_v14  ;;  %v3742_v20 = vadd.f32 %v3648_v56, %v3039_v25  ;;  %v3473_v62 = vpop.f32.mrf.mxu0  ;;  %v3562_v45 = vpop.f32.mrf.mxu1 }
 0x46d   :  { %v4483_v17 = vunpack.c.l.b16 %v4339_v8  ;;  %v4484_v38 = vunpack.c.l.b16 %v4340_v40  ;;  %v4102_v18 = vmax.f32 %v4100_v54, %v4101_v13  ;;  %v4109_v34 = vmax.f32 %v4107_v5, %v4108_v28  ;;  %v9858_v54 = vld [vmem:[#allocation129_spill] sm:$0xff] }
 0x46e   :  { %v4245_v24 = vadd.f32 %v8576_v6, %v4099_v19  ;;  %v3844_v11 = vadd.f32 %v8838_v29, %v3742_v20  ;;  %v3743_v53 = vadd.f32 %v3473_v62, %v9855_v50  ;;  %v3744_v30 = vadd.f32 %v3562_v45, %v9856_v51  ;;  %v9859_v19 = vld [vmem:[#allocation45_spill] sm:$0xff]  ;;  %v6075_v51 = vld [vmem:[#allocation4 + $0x10] sm:$0xff] }
 0x46f   :  { %v4504_v60 = vrot.slane %v4483_v17, 6  ;;  %v4524_v36 = vrot.slane %v4484_v38, 6  ;;  %v4103_v35 = vrot.slane %v4102_v18, 2  ;;  %v4110_v21 = vrot.slane %v4109_v34, 2  ;;  %4705 = vmatpush.bf16.msrb.mxu3 %v6075_v51 }
 0x470   :  { %v4293_v46 = vmax.f32 %v4245_v24, 0.0  ;;  %v4114_v57 = vmax.f32 %v3841_v23, %v3844_v11  ;;  %v3845_v14 = vadd.f32 %v8801_v33, %v3743_v53  ;;  %v3846_v8 = vadd.f32 %v8807_v16, %v3744_v30  ;;  %v9860_v24 = vld [vmem:[#allocation130_spill] sm:$0xff] }
 0x471   :  { %v8910_v15 = vsel %vm4505_vm13, %v4504_v60, %v4503_v2  ;;  %v8913_v32 = vsel %vm4505_vm13, %v4524_v36, %v4523_v37  ;;  %v4104_v39 = vmax.f32 %v4102_v18, %v4103_v35  ;;  %v4111_v26 = vmax.f32 %v4109_v34, %v4110_v21  ;;  %v8917_v2 = vpop.f32.mrf.mxu3 }
 0x472   :  { %v4341_v63 = vpack.c.bf16 %v4293_v46, %v4293_v46  ;;  %v4115_v9 = vrot.slane %v4114_v57, 4  ;;  %v3042_v20 = vadd.f32 %v8888_v31, %v9859_v19  ;;  %v3045_v23 = vadd.f32 %v2950_v41, %v9860_v24  ;;  %v9864_v24 = vld [vmem:[#allocation57_spill] sm:$0xff] }
 0x473   :  { %v4105_v59 = vrot.slane %v4104_v39, 1  ;;  %v4112_v12 = vrot.slane %v4111_v26, 1  ;;  %v3651_v10 = vpop.f32.mrf.mxu2 }
 0x474   :  { %v4485_v52 = vunpack.c.l.b16 %v4341_v63  ;;  %v4116_v44 = vmax.f32 %v4114_v57, %v4115_v9  ;;  %v3475_v58 = vpop.f32.mrf.mxu0  ;;  %v3564_v7 = vpop.f32.mrf.mxu1  ;;  %v3745_v60 = vadd.f32 %v3651_v10, %v3042_v20 }
 0x475   :  { %v4106_v3 = vmax.f32 %v4104_v39, %v4105_v59  ;;  %v4113_v37 = vmax.f32 %v4111_v26, %v4112_v12  ;;  %v3746_v42 = vadd.f32 %v3475_v58, %v9857_v55  ;;  %v3747_v5 = vadd.f32 %v3564_v7, %v9858_v54 }
 0x476   :  { %v4538_v48 = vrot.slane %v4485_v52, 6  ;;  %v4117_v25 = vrot.slane %v4116_v44, 2  ;;  %v3847_v41 = vadd.f32 %v8831_v22, %v3745_v60 }
 0x477   :  { %v4246_v40 = vadd.f32 %v8561_v1, %v4106_v3  ;;  %v4247_v13 = vadd.f32 %v8565_v61, %v4113_v37  ;;  %v3848_v28 = vadd.f32 %v8815_v0, %v3746_v42  ;;  %v3849_v56 = vadd.f32 %v8821_v47, %v3747_v5  ;;  %v6074_v5 = vld [vmem:[#allocation4 + $0x8] sm:$0xff] }
 0x478   :  { %v8931_v62 = vsel %vm4505_vm13, %v4538_v48, %v8902_v4  ;;  %v4118_v45 = vmax.f32 %v4116_v44, %v4117_v25  ;;  %4706 = vmatpush.bf16.msrb.mxu3 %v6074_v5 }
 0x479   :  { %v4294_v17 = vmax.f32 %v4246_v40, 0.0  ;;  %v4295_v38 = vmax.f32 %v4247_v13, 0.0  ;;  %v4121_v18 = vmax.f32 %v3845_v14, %v3848_v28  ;;  %v4128_v34 = vmax.f32 %v3846_v8, %v3849_v56  ;;  %v2955_v12 = vpop.f32.mrf.mxu3  ;;  %v9861_v14 = vld [vmem:[#allocation54_spill] sm:$0xff]  ;;  %v9862_v40 = vld [vmem:[#allocation132_spill] sm:$0xff] }
 0x47a   :  { %v4119_v11 = vrot.slane %v4118_v45, 1 }
 0x47b   :  { %v4342_v36 = vpack.c.bf16 %v4294_v17, %v4294_v17  ;;  %v4343_v35 = vpack.c.bf16 %v4295_v38, %v4295_v38  ;;  %v4122_v21 = vrot.slane %v4121_v18, 4  ;;  %v4129_v46 = vrot.slane %v4128_v34, 4  ;;  %v3653_v57 = vpop.f32.mrf.mxu2 }
 0x47c   :  { %v4120_v39 = vmax.f32 %v4118_v45, %v4119_v11  ;;  %v3748_v31 = vadd.f32 %v3653_v57, %v3045_v23  ;;  %v3478_v26 = vpop.f32.mrf.mxu0  ;;  %v3567_v63 = vpop.f32.mrf.mxu1  ;;  %v6073_v11 = vld [vmem:[#allocation4] sm:$0xff] }
 0x47d   :  { %v4486_v4 = vunpack.c.l.b16 %v4342_v36  ;;  %v4487_v9 = vunpack.c.l.b16 %v4343_v35  ;;  %v4123_v50 = vmax.f32 %v4121_v18, %v4122_v21  ;;  %v4130_v53 = vmax.f32 %v4128_v34, %v4129_v46  ;;  %v9863_v18 = vld [vmem:[#allocation51_spill] sm:$0xff]  ;;  %4707 = vmatpush.bf16.msrb.mxu3 %v6073_v11 }
 0x47e   :  { %v4248_v30 = vadd.f32 %v8576_v6, %v4120_v39  ;;  %v3850_v59 = vadd.f32 %v8838_v29, %v3748_v31  ;;  %v3749_v8 = vadd.f32 %v3478_v26, %v9861_v14  ;;  %v3750_v13 = vadd.f32 %v3567_v63, %v9862_v40  ;;  %v6088_v46 = vld [vmem:[#allocation4 + $0x78] sm:$0xff] }
 0x47f   :  { %v4507_v10 = vrot.slane %v4486_v4, 5  ;;  %v4526_v52 = vrot.slane %v4487_v9, 5  ;;  %v4124_v44 = vrot.slane %v4123_v50, 2  ;;  %v4131_v58 = vrot.slane %v4130_v53, 2  ;;  %v9865_v63 = vld [vmem:[#allocation131_spill] sm:$0xff] }
 0x480   :  { %v4296_v7 = vmax.f32 %v4248_v30, 0.0  ;;  %v4135_v3 = vmax.f32 %v3847_v41, %v3850_v59  ;;  %v3851_v35 = vadd.f32 %v8801_v33, %v3749_v8  ;;  %v3852_v21 = vadd.f32 %v8807_v16, %v3750_v13 }
 0x481   :  { %v8939_v37 = vsel %vm4508_vm14, %v4507_v10, %v8910_v15  ;;  %v8943_v55 = vsel %vm4508_vm14, %v4526_v52, %v8913_v32  ;;  %v4125_v42 = vmax.f32 %v4123_v50, %v4124_v44  ;;  %v4132_v54 = vmax.f32 %v4130_v53, %v4131_v58  ;;  %4713 = vmatpush.bf16.msra.mxu3 %v6088_v46  ;;  %v8961_v53 = vpop.f32.mrf.mxu3  ;;  %v9866_v10 = vld [vmem:[#allocation50_spill] sm:$0xff]  ;;  %v9868_v46 = vld [vmem:[#allocation133_spill] sm:$0xff] }
 0x482   :  { %v4344_v48 = vpack.c.bf16 %v4296_v7, %v4296_v7  ;;  %v4136_v25 = vrot.slane %v4135_v3, 4  ;;  %v3048_v4 = vadd.f32 %v8917_v2, %v9865_v63  ;;  %v3051_v52 = vadd.f32 %v2955_v12, %v9866_v10  ;;  %v6087_v7 = vld [vmem:[#allocation4 + $0x70] sm:$0xff] }
 0x483   :  { %v4126_v28 = vrot.slane %v4125_v42, 1  ;;  %v4133_v56 = vrot.slane %v4132_v54, 1  ;;  %v3656_v19 = vpop.f32.mrf.mxu2 }
 0x484   :  { %v4488_v20 = vunpack.c.l.b16 %v4344_v48  ;;  %v4137_v15 = vmax.f32 %v4135_v3, %v4136_v25  ;;  %v3480_v45 = vpop.f32.mrf.mxu0  ;;  %v3569_v17 = vpop.f32.mrf.mxu1  ;;  %v3751_v58 = vadd.f32 %v3656_v19, %v3048_v4 }
 0x485   :  { %v4127_v38 = vmax.f32 %v4125_v42, %v4126_v28  ;;  %v4134_v32 = vmax.f32 %v4132_v54, %v4133_v56  ;;  %v3752_v34 = vadd.f32 %v3480_v45, %v9863_v18  ;;  %v3753_v23 = vadd.f32 %v3569_v17, %v9864_v24  ;;  %4714 = vmatpush.bf16.msra.mxu3 %v6087_v7 }
 0x486   :  { %v4540_v60 = vrot.slane %v4488_v20, 5  ;;  %v4138_v36 = vrot.slane %v4137_v15, 2  ;;  %v3853_v12 = vadd.f32 %v8831_v22, %v3751_v58  ;;  %v6086_v20 = vld [vmem:[#allocation4 + $0x68] sm:$0xff] }
 0x487   :  { %v4249_v57 = vadd.f32 %v8561_v1, %v4127_v38  ;;  %v4250_v39 = vadd.f32 %v8565_v61, %v4134_v32  ;;  %v3854_v31 = vadd.f32 %v8815_v0, %v3752_v34  ;;  %v3855_v26 = vadd.f32 %v8821_v47, %v3753_v23 }
 0x488   :  { %v8959_v9 = vsel %vm4508_vm14, %v4540_v60, %v8931_v62  ;;  %v4139_v50 = vmax.f32 %v4137_v15, %v4138_v36 }
 0x489   :  { %v4297_v51 = vmax.f32 %v4249_v57, 0.0  ;;  %v4298_v30 = vmax.f32 %v4250_v39, 0.0  ;;  %v4142_v41 = vmax.f32 %v3851_v35, %v3854_v31  ;;  %v4149_v59 = vmax.f32 %v3852_v21, %v3855_v26  ;;  %4715 = vmatpush.bf16.msra.mxu3 %v6086_v20  ;;  %v9867_v35 = vld [vmem:[#allocation53_spill] sm:$0xff]  ;;  %v6085_v39 = vld [vmem:[#allocation4 + $0x60] sm:$0xff]  ;;  %v2960_v31 = vpop.f32.mrf.mxu3 }
 0x48a   :  { %v4140_v44 = vrot.slane %v4139_v50, 1 }
 0x48b   :  { %v4345_v3 = vpack.c.bf16 %v4297_v51, %v4297_v51  ;;  %v4346_v42 = vpack.c.bf16 %v4298_v30, %v4298_v30  ;;  %v4143_v2 = vrot.slane %v4142_v41, 4  ;;  %v4150_v54 = vrot.slane %v4149_v59, 4  ;;  %v3658_v5 = vpop.f32.mrf.mxu2 }
 0x48c   :  { %v4141_v62 = vmax.f32 %v4139_v50, %v4140_v44  ;;  %v3754_v48 = vadd.f32 %v3658_v5, %v3051_v52  ;;  %v3483_v25 = vpop.f32.mrf.mxu0  ;;  %v3572_v14 = vpop.f32.mrf.mxu1  ;;  %v9870_v52 = vld [vmem:[#allocation137_spill] sm:$0xff] }
 0x48d   :  { %v4489_v8 = vunpack.c.l.b16 %v4345_v3  ;;  %v4490_v40 = vunpack.c.l.b16 %v4346_v42  ;;  %v4144_v13 = vmax.f32 %v4142_v41, %v4143_v2  ;;  %v4151_v28 = vmax.f32 %v4149_v59, %v4150_v54  ;;  %4716 = vmatpush.bf16.msra.mxu3 %v6085_v39  ;;  %v6084_v2 = vld [vmem:[#allocation4 + $0x58] sm:$0xff] }
 0x48e   :  { %v4251_v56 = vadd.f32 %v8576_v6, %v4141_v62  ;;  %v3856_v19 = vadd.f32 %v8838_v29, %v3754_v48  ;;  %v3755_v21 = vadd.f32 %v3483_v25, %v9867_v35  ;;  %v3756_v57 = vadd.f32 %v3572_v14, %v9868_v46  ;;  %v9871_v25 = vld [vmem:[#allocation134_spill] sm:$0xff] }
 0x48f   :  { %v4510_v15 = vrot.slane %v4489_v8, 4  ;;  %v4528_v45 = vrot.slane %v4490_v40, 4  ;;  %v4145_v17 = vrot.slane %v4144_v13, 2  ;;  %v4152_v38 = vrot.slane %v4151_v28, 2 }
 0x490   :  { %v4299_v32 = vmax.f32 %v4251_v56, 0.0  ;;  %v4156_v18 = vmax.f32 %v3853_v12, %v3856_v19  ;;  %v3857_v3 = vadd.f32 %v8801_v33, %v3755_v21  ;;  %v3858_v42 = vadd.f32 %v8807_v16, %v3756_v57  ;;  %v9872_v19 = vld [vmem:[#allocation135_spill] sm:$0xff] }
 0x491   :  { %v4146_v34 = vmax.f32 %v4144_v13, %v4145_v17  ;;  %v4153_v24 = vmax.f32 %v4151_v28, %v4152_v38  ;;  %v8969_v23 = vsel %vm4511_vm15, %v4510_v15, %v8939_v37  ;;  %v8973_v11 = vsel %vm4511_vm15, %v4528_v45, %v8943_v55  ;;  %v9869_v55 = vld [vmem:[#allocation59_spill] sm:$0xff]  ;;  %4717 = vmatpush.bf16.msra.mxu3 %v6084_v2  ;;  %v6083_v17 = vld [vmem:[#allocation4 + $0x50] sm:$0xff]  ;;  %v9874_v2 = vld [vmem:[#allocation56_spill] sm:$0xff] }
 0x492   :  { %v4347_v60 = vpack.c.bf16 %v4299_v32, %v4299_v32  ;;  %v4157_v36 = vrot.slane %v4156_v18, 4  ;;  %v3054_v14 = vadd.f32 %v8961_v53, %v9871_v25  ;;  %v3057_v20 = vadd.f32 %v2960_v31, %v9872_v19 }
 0x493   :  { %v4147_v26 = vrot.slane %v4146_v34, 1  ;;  %v4154_v63 = vrot.slane %v4153_v24, 1  ;;  %v3661_v4 = vpop.f32.mrf.mxu2 }
 0x494   :  { %v4491_v50 = vunpack.c.l.b16 %v4347_v60  ;;  %v4158_v51 = vmax.f32 %v4156_v18, %v4157_v36  ;;  %v3485_v30 = vpop.f32.mrf.mxu0  ;;  %v3574_v37 = vpop.f32.mrf.mxu1  ;;  %v3757_v45 = vadd.f32 %v3661_v4, %v3054_v14  ;;  %v6082_v4 = vld [vmem:[#allocation4 + $0x48] sm:$0xff] }
 0x495   :  { %v4148_v41 = vmax.f32 %v4146_v34, %v4147_v26  ;;  %v4155_v59 = vmax.f32 %v4153_v24, %v4154_v63  ;;  %v3758_v10 = vadd.f32 %v3485_v30, %v9869_v55  ;;  %v3759_v44 = vadd.f32 %v3574_v37, %v9870_v52  ;;  %4718 = vmatpush.bf16.msra.mxu3 %v6083_v17 }
 0x496   :  { %v4542_v58 = vrot.slane %v4491_v50, 4  ;;  %v4159_v7 = vrot.slane %v4158_v51, 2  ;;  %v3859_v26 = vadd.f32 %v8831_v22, %v3757_v45 }
 0x497   :  { %v4252_v54 = vadd.f32 %v8561_v1, %v4148_v41  ;;  %v4253_v5 = vadd.f32 %v8565_v61, %v4155_v59  ;;  %v3860_v62 = vadd.f32 %v8815_v0, %v3758_v10  ;;  %v3861_v48 = vadd.f32 %v8821_v47, %v3759_v44 }
 0x498   :  { %v4160_v8 = vmax.f32 %v4158_v51, %v4159_v7  ;;  %v8989_v40 = vsel %vm4511_vm15, %v4542_v58, %v8959_v9  ;;  %v2963_v9 = vpop.f32.mrf.mxu3 }
 0x499   :  { %v4300_v13 = vmax.f32 %v4252_v54, 0.0  ;;  %v4301_v28 = vmax.f32 %v4253_v5, 0.0  ;;  %v4163_v56 = vmax.f32 %v3857_v3, %v3860_v62  ;;  %v4170_v12 = vmax.f32 %v3858_v42, %v3861_v48  ;;  %4719 = vmatpush.bf16.msra.mxu3 %v6082_v4  ;;  %v9873_v3 = vld [vmem:[#allocation55_spill] sm:$0xff]  ;;  %v6081_v5 = vld [vmem:[#allocation4 + $0x40] sm:$0xff] }
 0x49a   :  { %v4161_v15 = vrot.slane %v4160_v8, 1 }
 0x49b   :  { %v4348_v38 = vpack.c.bf16 %v4300_v13, %v4300_v13  ;;  %v4349_v32 = vpack.c.bf16 %v4301_v28, %v4301_v28  ;;  %v4164_v18 = vrot.slane %v4163_v56, 4  ;;  %v4171_v34 = vrot.slane %v4170_v12, 4  ;;  %v3663_v53 = vpop.f32.mrf.mxu2 }
 0x49c   :  { %v4162_v24 = vmax.f32 %v4160_v8, %v4161_v15  ;;  %v3760_v60 = vadd.f32 %v3663_v53, %v3057_v20  ;;  %v3488_v36 = vpop.f32.mrf.mxu0  ;;  %v3577_v35 = vpop.f32.mrf.mxu1 }
 0x49d   :  { %v4492_v21 = vunpack.c.l.b16 %v4348_v38  ;;  %v4493_v46 = vunpack.c.l.b16 %v4349_v32  ;;  %v4165_v57 = vmax.f32 %v4163_v56, %v4164_v18  ;;  %v4172_v39 = vmax.f32 %v4170_v12, %v4171_v34  ;;  %4720 = vmatpush.bf16.msra.mxu3 %v6081_v5  ;;  %v9875_v12 = vld [vmem:[#allocation60_spill] sm:$0xff] }
 0x49e   :  { %v4254_v31 = vadd.f32 %v8576_v6, %v4162_v24  ;;  %v3862_v63 = vadd.f32 %v8838_v29, %v3760_v60  ;;  %v3761_v42 = vadd.f32 %v3488_v36, %v9873_v3  ;;  %v3762_v54 = vadd.f32 %v3577_v35, %v9874_v2  ;;  %v9877_v60 = vld [vmem:[#allocation136_spill] sm:$0xff] }
 0x49f   :  { %v4513_v50 = vrot.slane %v4492_v21, 3  ;;  %v4530_v51 = vrot.slane %v4493_v46, 3  ;;  %v4166_v30 = vrot.slane %v4165_v57, 2  ;;  %v4173_v37 = vrot.slane %v4172_v39, 2 }
 0x4a0   :  { %v4302_v41 = vmax.f32 %v4254_v31, 0.0  ;;  %v4177_v59 = vmax.f32 %v3859_v26, %v3862_v63  ;;  %v3863_v17 = vadd.f32 %v8801_v33, %v3761_v42  ;;  %v3864_v38 = vadd.f32 %v8807_v16, %v3762_v54  ;;  %v2965_v32 = vpop.f32.mrf.mxu3  ;;  %v9878_v16 = vld [vmem:[#allocation58_spill] sm:$0xff] }
 0x4a1   :  { %v4167_v55 = vmax.f32 %v4165_v57, %v4166_v30  ;;  %v4174_v10 = vmax.f32 %v4172_v39, %v4173_v37  ;;  %v4515_v52 = vsel %vm4514_vm0, %v4513_v50, %v8969_v23  ;;  %v4531_v44 = vsel %vm4514_vm0, %v4530_v51, %v8973_v11  ;;  %v9876_v11 = vld [vmem:[#allocation61_spill] sm:$0xff] }
 0x4a2   :  { %v4350_v58 = vpack.c.bf16 %v4302_v41, %v4302_v41  ;;  %v4178_v7 = vrot.slane %v4177_v59, 4  ;;  %v3060_v36 = vadd.f32 %v2963_v9, %v9877_v60  ;;  %v3063_v31 = vadd.f32 %v2965_v32, %v9878_v16  ;;  %v6095_v16 = vld [vmem:[#allocation4 + $0xb0] sm:$0xff] }
 0x4a3   :  { %v4168_v62 = vrot.slane %v4167_v55, 1  ;;  %v4175_v48 = vrot.slane %v4174_v10, 1  ;;  %v3666_v25 = vpop.f32.mrf.mxu2 }
 0x4a4   :  { %v4494_v14 = vunpack.c.l.b16 %v4350_v58  ;;  %v4179_v8 = vmax.f32 %v4177_v59, %v4178_v7  ;;  %v3490_v13 = vpop.f32.mrf.mxu0  ;;  %v3579_v28 = vpop.f32.mrf.mxu1  ;;  %v3763_v63 = vadd.f32 %v3666_v25, %v3060_v36 }
 0x4a5   :  { %v4169_v56 = vmax.f32 %v4167_v55, %v4168_v62  ;;  %v4176_v23 = vmax.f32 %v4174_v10, %v4175_v48  ;;  %v3764_v19 = vadd.f32 %v3490_v13, %v9875_v12  ;;  %v3765_v20 = vadd.f32 %v3579_v28, %v9876_v11 }
 0x4a6   :  { %v4544_v15 = vrot.slane %v4494_v14, 3  ;;  %v4180_v45 = vrot.slane %v4179_v8, 2  ;;  %v3865_v10 = vadd.f32 %v8831_v22, %v3763_v63  ;;  %v6094_v63 = vld [vmem:[#allocation4 + $0xa8] sm:$0xff] }
 0x4a7   :  { %v4255_v18 = vadd.f32 %v8561_v1, %v4169_v56  ;;  %v4256_v34 = vadd.f32 %v8565_v61, %v4176_v23  ;;  %v3866_v53 = vadd.f32 %v8815_v0, %v3764_v19  ;;  %v3867_v24 = vadd.f32 %v8821_v47, %v3765_v20 }
 0x4a8   :  { %v4181_v35 = vmax.f32 %v4179_v8, %v4180_v45  ;;  %v4545_v21 = vsel %vm4514_vm0, %v4544_v15, %v8989_v40 }
 0x4a9   :  { %v4303_v46 = vmax.f32 %v4255_v18, 0.0  ;;  %v4304_v57 = vmax.f32 %v4256_v34, 0.0  ;;  %v4184_v33 = vmax.f32 %v3863_v17, %v3866_v53  ;;  %v4191_v39 = vmax.f32 %v3864_v38, %v3867_v24 }
 0x4aa   :  { %v4182_v26 = vrot.slane %v4181_v35, 1 }
 0x4ab   :  { %v4351_v4 = vpack.c.bf16 %v4303_v46, %v4303_v46  ;;  %v4352_v50 = vpack.c.bf16 %v4304_v57, %v4304_v57  ;;  %v4185_v51 = vrot.slane %v4184_v33, 4  ;;  %v4192_v0 = vrot.slane %v4191_v39, 4  ;;  %v3668_v30 = vpop.f32.mrf.mxu2  ;;  %v6096_v57 = vld [vmem:[#allocation4 + $0xb8] sm:$0xff] }
 0x4ac   :  { %v4183_v47 = vmax.f32 %v4181_v35, %v4182_v26  ;;  %v3766_v37 = vadd.f32 %v3668_v30, %v3063_v31  ;;  %v6089_v30 = vld [vmem:[#allocation4 + $0x80] sm:$0xff] }
 0x4ad   :  { %v4495_v9 = vunpack.c.l.b16 %v4351_v4  ;;  %v4496_v41 = vunpack.c.l.b16 %v4352_v50  ;;  %v4186_v59 = vmax.f32 %v4184_v33, %v4185_v51  ;;  %v4193_v55 = vmax.f32 %v4191_v39, %v4192_v0  ;;  %v6092_v4 = vld [vmem:[#allocation4 + $0x98] sm:$0xff]  ;;  %v6091_v51 = vld [vmem:[#allocation4 + $0x90] sm:$0xff]  ;;  %v6090_v0 = vld [vmem:[#allocation4 + $0x88] sm:$0xff] }
 0x4ae   :  { %v4257_v40 = vadd.f32 %v8576_v6, %v4183_v47  ;;  %v3868_v58 = vadd.f32 %v8838_v29, %v3766_v37  ;;  %v6056_v47 = vld [vmem:[%s9140_s4 + $0x38] sm:$0xff] }
 0x4af   :  { %v4516_v7 = vrot.slane %v4495_v9, 2  ;;  %v4532_v3 = vrot.slane %v4496_v41, 2  ;;  %v4187_v42 = vrot.slane %v4186_v59, 2  ;;  %v4194_v2 = vrot.slane %v4193_v55, 2  ;;  %v6055_v9 = vld [vmem:[%s9140_s4 + $0x30] sm:$0xff]  ;;  %v6054_v41 = vld [vmem:[%s9140_s4 + $0x28] sm:$0xff] }
 0x4b0   :  { %v4305_v54 = vmax.f32 %v4257_v40, 0.0  ;;  %v4198_v5 = vmax.f32 %v3865_v10, %v3868_v58  ;;  %v6051_v40 = vld [vmem:[%s9140_s4 + $0x10] sm:$0xff]  ;;  %v6050_v10 = vld [vmem:[%s9140_s4 + $0x8] sm:$0xff]  ;;  %v6049_v58 = vld [vmem:[%s9140_s4] sm:$0xff] }
 0x4b1   :  { %v4188_v62 = vmax.f32 %v4186_v59, %v4187_v42  ;;  %v4195_v48 = vmax.f32 %v4193_v55, %v4194_v2  ;;  %v4518_v25 = vsel %vm4517_vm1, %v4516_v7, %v4515_v52  ;;  %v4533_v14 = vsel %vm4517_vm1, %v4532_v3, %v4531_v44  ;;  %v6053_v59 = vld [vmem:[%s9140_s4 + $0x20] sm:$0xff]  ;;  %v6052_v55 = vld [vmem:[%s9140_s4 + $0x18] sm:$0xff]  ;;  %v6063_v42 = vld [vmem:[%s9140_s4 + $0x70] sm:$0xff] }
 0x4b2   :  { %v4353_v8 = vpack.c.bf16 %v4305_v54, %v4305_v54  ;;  %v4199_v13 = vrot.slane %v4198_v5, 4  ;;  %v6064_v7 = vld [vmem:[%s9140_s4 + $0x78] sm:$0xff]  ;;  %v4829_v3 = vpack.c.b16 %v8845_v27, %v8845_v27  ;;  %v6062_v2 = vld [vmem:[%s9140_s4 + $0x68] sm:$0xff]  ;;  %v6061_v54 = vld [vmem:[%s9140_s4 + $0x60] sm:$0xff] }
 0x4b3   :  { %v4189_v28 = vrot.slane %v4188_v62, 1  ;;  %v4196_v56 = vrot.slane %v4195_v48, 1  ;;  %v6060_v27 = vld [vmem:[%s9140_s4 + $0x58] sm:$0xff] }
 0x4b4   :  { %v4497_v23 = vunpack.c.l.b16 %v4353_v8  ;;  %v4200_v22 = vmax.f32 %v4198_v5, %v4199_v13  ;;  %v6059_v5 = vld [vmem:[%s9140_s4 + $0x50] sm:$0xff]  ;;  %v6070_v13 = vld [vmem:[%s9140_s4 + $0xa8] sm:$0xff] }
 0x4b5   :  { %v4190_v12 = vmax.f32 %v4188_v62, %v4189_v28  ;;  %v4197_v29 = vmax.f32 %v4195_v48, %v4196_v56  ;;  %v6058_v62 = vld [vmem:[%s9140_s4 + $0x48] sm:$0xff]  ;;  %v6057_v48 = vld [vmem:[%s9140_s4 + $0x40] sm:$0xff]  ;;  %v6071_v8 = vld [vmem:[%s9140_s4 + $0xb0] sm:$0xff] }
 0x4b6   :  { %v4546_v19 = vrot.slane %v4497_v23, 2  ;;  %v4201_v11 = vrot.slane %v4200_v22, 2  ;;  %v6069_v28 = vld [vmem:[%s9140_s4 + $0xa0] sm:$0xff]  ;;  %v6067_v56 = vld [vmem:[%s9140_s4 + $0x90] sm:$0xff]  ;;  %v6066_v23 = vld [vmem:[%s9140_s4 + $0x88] sm:$0xff] }
 0x4b7   :  { %v4258_v20 = vadd.f32 %v8561_v1, %v4190_v12  ;;  %v4259_v15 = vadd.f32 %v8565_v61, %v4197_v29  ;;  %v4831_v12 = vpack.c.b16 %v8859_v49, %v8859_v49  ;;  %v6102_v49 = vld [vmem:[%s9143_s7 + $0x28] sm:$0xff] }
 0x4b8   :  { %v4202_v45 = vmax.f32 %v4200_v22, %v4201_v11  ;;  %v4547_v17 = vsel %vm4517_vm1, %v4546_v19, %v4545_v21  ;;  %v6065_v22 = vld [vmem:[%s9140_s4 + $0x80] sm:$0xff] }
 0x4b9   :  { %v4306_v52 = vmax.f32 %v4258_v20, 0.0  ;;  %v4307_v38 = vmax.f32 %v4259_v15, 0.0 }
 0x4ba   :  { %v4203_v44 = vrot.slane %v4202_v45, 1 }
 0x4bb   :  { %v4354_v32 = vpack.c.bf16 %v4306_v52, %v4306_v52  ;;  %v4355_v18 = vpack.c.bf16 %v4307_v38, %v4307_v38  ;;  %v6104_v38 = vld [vmem:[%s9143_s7 + $0x38] sm:$0xff] }
 0x4bc   :  { %v4204_v34 = vmax.f32 %v4202_v45, %v4203_v44 }
 0x4bd   :  { %v4498_v53 = vunpack.c.l.b16 %v4354_v32  ;;  %v4499_v24 = vunpack.c.l.b16 %v4355_v18  ;;  %v6103_v32 = vld [vmem:[%s9143_s7 + $0x30] sm:$0xff] }
 0x4be   :  { %v4260_v60 = vadd.f32 %v8576_v6, %v4204_v34  ;;  %v6093_v6 = vld [vmem:[#allocation4 + $0xa0] sm:$0xff] }
 0x4bf   :  { %v4519_v36 = vrot.slane %v4498_v53, 1  ;;  %v4534_v35 = vrot.slane %v4499_v24, 1  ;;  %v6101_v34 = vld [vmem:[%s9143_s7 + $0x20] sm:$0xff]  ;;  %v6100_v53 = vld [vmem:[%s9143_s7 + $0x18] sm:$0xff]  ;;  %v6099_v24 = vld [vmem:[%s9143_s7 + $0x10] sm:$0xff] }
 0x4c0   :  { %v4308_v46 = vmax.f32 %v4260_v60, 0.0  ;;  %v6098_v60 = vld [vmem:[%s9143_s7 + $0x8] sm:$0xff] }
 0x4c1   :  { %v4521_v1 = vsel %vm4520_vm2, %v4519_v36, %v4518_v25  ;;  %v4535_v61 = vsel %vm4520_vm2, %v4534_v35, %v4533_v14  ;;  %v6072_v25 = vld [vmem:[%s9140_s4 + $0xb8] sm:$0xff]  ;;  %v4830_v14 = vpack.c.b16 %v8849_v43, %v8849_v43  ;;  %v6097_v35 = vld [vmem:[%s9143_s7] sm:$0xff] }
 0x4c2   :  { %v4356_v33 = vpack.c.bf16 %v4308_v46, %v4308_v46  ;;  %v4550_v21 = vpack.c.b16 %v4521_v1, %v4521_v1  ;;  %v4551_v50 = vpack.c.b16 %v4535_v61, %v4535_v61  ;;  %v6068_v43 = vld [vmem:[%s9140_s4 + $0x98] sm:$0xff]  ;;  %v6111_v61 = vld [vmem:[%s9142_s6] ss:$0 sm:$0xff] }
 0x4c4   :  { %v4500_v39 = vunpack.c.l.b16 %v4356_v33  ;;  %4708 = vmatmul.bf16.vlgmr.msrb.gmra.mxu3 %v4550_v21 }
 0x4c5   :  { %4726 = vmatpush.bf16.msrb.mxu3 %v6096_v57 }
 0x4c6   :  { %v4548_v31 = vrot.slane %v4500_v39, 1 }
 0x4c8   :  { %v4549_v26 = vsel %vm4520_vm2, %v4548_v31, %v4547_v17 }
 0x4c9   :  { %4727 = vmatpush.bf16.msrb.mxu3 %v6095_v16  ;;  %v4552_v37 = vpack.c.b16 %v4549_v26, %v4549_v26 }
 0x4cd   :  { %4728 = vmatpush.bf16.msrb.mxu3 %v6094_v63  ;;  %v6112_v63 = vld [vmem:[%s9144_s8] ss:$0 sm:$0xff] }
 0x4d1   :  { %4729 = vmatpush.bf16.msrb.mxu3 %v6093_v6 }
 0x4d4   :  { %4721 = vmatmul.bf16.vlgmr.msra.gmra.mxu3 %v4551_v50 }
 0x4d5   :  { %4730 = vmatpush.bf16.msrb.mxu3 %v6092_v4 }
 0x4d9   :  { %4731 = vmatpush.bf16.msrb.mxu3 %v6091_v51 }
 0x4dd   :  { %4732 = vmatpush.bf16.msrb.mxu3 %v6090_v0 }
 0x4e1   :  { %4733 = vmatpush.bf16.msrb.mxu3 %v6089_v30 }
 0x4e4   :  { %4734 = vmatmul.bf16.vlgmr.msrb.gmra.mxu3 %v4552_v37 }
 0x4e5   :  { %4979 = vmatpush.bf16.msra.mxu3 %v6056_v47 }
 0x4e9   :  { %4980 = vmatpush.bf16.msra.mxu3 %v6055_v9 }
 0x4ed   :  { %4981 = vmatpush.bf16.msra.mxu3 %v6054_v41 }
 0x4f1   :  { %4982 = vmatpush.bf16.msra.mxu3 %v6053_v59 }
 0x4f5   :  { %4983 = vmatpush.bf16.msra.mxu3 %v6052_v55 }
 0x4f9   :  { %4984 = vmatpush.bf16.msra.mxu3 %v6051_v40 }
 0x4fd   :  { %4985 = vmatpush.bf16.msra.mxu3 %v6050_v10 }
 0x501   :  { %4986 = vmatpush.bf16.msra.mxu3 %v6049_v58 }
 0x504   :  { %4987 = vmatmul.bf16.vlgmr.msra.gmra.mxu3 %v4829_v3 }
 0x505   :  { %4992 = vmatpush.bf16.msrb.mxu3 %v6064_v7 }
 0x509   :  { %4993 = vmatpush.bf16.msrb.mxu3 %v6063_v42 }
 0x50d   :  { %4994 = vmatpush.bf16.msrb.mxu3 %v6062_v2 }
 0x511   :  { %4995 = vmatpush.bf16.msrb.mxu3 %v6061_v54 }
 0x515   :  { %4996 = vmatpush.bf16.msrb.mxu3 %v6060_v27 }
 0x519   :  { %4997 = vmatpush.bf16.msrb.mxu3 %v6059_v5 }
 0x51d   :  { %4998 = vmatpush.bf16.msrb.mxu3 %v6058_v62 }
 0x521   :  { %4999 = vmatpush.bf16.msrb.mxu3 %v6057_v48 }
 0x524   :  { %5000 = vmatmul.bf16.vlgmr.msrb.gmra.mxu3 %v4830_v14 }
 0x525   :  { %5005 = vmatpush.bf16.msra.mxu3 %v6072_v25 }
 0x529   :  { %5006 = vmatpush.bf16.msra.mxu3 %v6071_v8 }
 0x52d   :  { %5007 = vmatpush.bf16.msra.mxu3 %v6070_v13 }
 0x531   :  { %5008 = vmatpush.bf16.msra.mxu3 %v6069_v28 }
 0x535   :  { %5009 = vmatpush.bf16.msra.mxu3 %v6068_v43 }
 0x539   :  { %5010 = vmatpush.bf16.msra.mxu3 %v6067_v56 }
 0x53d   :  { %5011 = vmatpush.bf16.msra.mxu3 %v6066_v23 }
 0x541   :  { %5012 = vmatpush.bf16.msra.mxu3 %v6065_v22 }
 0x544   :  { %5013 = vmatmul.bf16.vlgmr.msra.gmra.mxu3 %v4831_v12 }
 0x545   :  { %5093 = vmatpush.bf16.msrb.mxu3 %v6104_v38 }
 0x547   :  { %v4709_v29 = vpop.f32.mrf.mxu3 }
 0x549   :  { %5094 = vmatpush.bf16.msrb.mxu3 %v6103_v32 }
 0x54d   :  { %5095 = vmatpush.bf16.msrb.mxu3 %v6102_v49 }
 0x54f   :  { %v4711_v19 = vpop.f32.mrf.mxu3 }
 0x551   :  { %5096 = vmatpush.bf16.msrb.mxu3 %v6101_v34 }
 0x555   :  { %5097 = vmatpush.bf16.msrb.mxu3 %v6100_v53 }
 0x557   :  { %v4722_v11 = vpop.f32.mrf.mxu3 }
 0x558   :  { %v4723_v20 = vadd.f32 %v4722_v11, %v4709_v29 }
 0x559   :  { %5098 = vmatpush.bf16.msrb.mxu3 %v6099_v24 }
 0x55d   :  { %5099 = vmatpush.bf16.msrb.mxu3 %v6098_v60 }
 0x55f   :  { %v4724_v15 = vpop.f32.mrf.mxu3 }
 0x561   :  { %5100 = vmatpush.bf16.msrb.mxu3 %v6097_v35 }
 0x567   :  { %v4735_v45 = vpop.f32.mrf.mxu3 }
 0x568   :  { %v4736_v17 = vadd.f32 %v4735_v45, %v4723_v20 }
 0x56f   :  { %v4737_v52 = vpop.f32.mrf.mxu3 }
 0x587   :  { %v4988_v44 = vpop.f32.mrf.mxu3 }
 0x588   :  { %v4989_v1 = vadd.f32 %v4988_v44, %v4736_v17 }
 0x58f   :  { %v4990_v18 = vpop.f32.mrf.mxu3 }
 0x5a7   :  { %v5001_v36 = vpop.f32.mrf.mxu3 }
 0x5a8   :  { %v5002_v57 = vadd.f32 %v5001_v36, %v4989_v1 }
 0x5af   :  { %v5003_v46 = vpop.f32.mrf.mxu3 }
 0x5c7   :  { %v5014_v33 = vpop.f32.mrf.mxu3 }
 0x5c8   :  { %v5015_v21 = vadd.f32 %v5014_v33, %v5002_v57 }
 0x5ca   :  { %v5022_v39 = vadd.f32 %v6111_v61, %v5015_v21 }
 0x5cc   :  { %v5023_v16 = vmax.f32 %v5022_v39, 0.0 }
 0x5ce   :  { %v5024_v31 = vpack.c.bf16 %v5023_v16, %v5023_v16 }
 0x5cf   :  { %v5016_v26 = vpop.f32.mrf.mxu3 }
 0x5d0   :  { %5101 = vmatmul.bf16.vlgmr.msrb.gmra.mxu3 %v5024_v31 }
 0x653   :  { %v5102_v6 = vpop.f32.mrf.mxu3 }
 0x654   :  { %v5103_v4 = vadd.f32 %v6112_v63, %v5102_v6 }
 0x656   :  { %5106 = vst [vmem:[%s9145_s9] sm:$0xff] %v5103_v4 }
 0x65b   :  { %v5104_v50 = vpop.f32.mrf.mxu3 }
 0x65c   :  { %5111 = vsyncpa [#allocation3], 1 }
 0x65d   :  { %5112 = vsyncpa [#allocation5], 1 }

</bundles_post_ra>
